<compile_context>
chip_gen: v5e
topology: v5e:2x2
jax: 0.10.0
libtpu: 0.0.40
codegen_flags: <defaults>
</compile_context>

<pallas_src>
import functools

import jax
import jax.numpy as jnp
from jax import lax
from jax.experimental import pallas as pl
from jax.experimental.pallas import tpu as pltpu


_NT = (((1,), (1,)), ((), ()))   # contract last dim of both operands: A @ B.T


def _ffn_kernel(x_ref, g_ref, w1_ref, w3_ref, w2_ref, o_ref, acc_ref, xn_ref,
                *, eps, fuse_norm, fuse_residual):
    # x_ref  : (tm, D)  raw token tile (residual stream)
    # g_ref  : (1, D)   RMSNorm weight (unused if fuse_norm=False)
    # w1_ref : (ti, D)  gate projection tile (PyTorch layout, NT matmul)
    # w3_ref : (ti, D)  up   projection tile
    # w2_ref : (D, ti)  down projection tile
    # o_ref  : (tm, D)  output tile
    # acc_ref: (tm, D)  f32 accumulator (scratch, persists across k)
    # xn_ref : (tm, D)  bf16 normalized activation (scratch, computed at k==0)
    k = pl.program_id(1)

    @pl.when(k == 0)
    def _():
        acc_ref[...] = jnp.zeros_like(acc_ref)
        xf = x_ref[...].astype(jnp.float32)
        if fuse_norm:
            var = jnp.mean(xf * xf, axis=-1, keepdims=True)
            xf = xf * lax.rsqrt(var + eps) * g_ref[...].astype(jnp.float32)
        xn_ref[...] = xf.astype(xn_ref.dtype)

    xn = xn_ref[...]
    h1 = lax.dot_general(xn, w1_ref[...], _NT, preferred_element_type=jnp.float32)
    h3 = lax.dot_general(xn, w3_ref[...], _NT, preferred_element_type=jnp.float32)
    h = (h1 * jax.nn.sigmoid(h1)) * h3              # silu(h1) * h3, f32
    acc_ref[...] += lax.dot_general(h.astype(w2_ref.dtype), w2_ref[...], _NT,
                                    preferred_element_type=jnp.float32)

    @pl.when(k == pl.num_programs(1) - 1)
    def _():
        out = acc_ref[...]
        if fuse_residual:
            out = out + x_ref[...].astype(jnp.float32)
        o_ref[...] = out.astype(o_ref.dtype)


def _round_up(n, k):
    return (n + k - 1) // k * k


def ffn_block(x, w1, w3, w2, *, norm_weight=None, norm_eps=1e-5,
              fuse_residual=False, tm=256, ti=512, param_dtype=jnp.bfloat16):
    """Fused [RMSNorm ->] SwiGLU FFN [-> +residual].

    x           : (..., D)
    w1, w3      : (I, D)  -- PyTorch nn.Linear(dim, intermediate).weight layout
    w2          : (D, I)  -- PyTorch nn.Linear(intermediate, dim).weight layout
    norm_weight : (D,) RMSNorm weight, or None to skip the fused norm
    """
    D = x.shape[-1]
    I = w1.shape[0]
    assert w3.shape == (I, D) and w2.shape == (D, I)
    fuse_norm = norm_weight is not None

    orig_shape = x.shape
    x2 = x.reshape(-1, D)
    T = x2.shape[0]

    # Align tile sizes: tm multiple of 8 (sublane), ti multiple of 128 (lane).
    tm = min(tm, _round_up(T, 8))
    ti = min(ti, _round_up(I, 128))
    T_pad = _round_up(T, tm)
    I_pad = _round_up(I, ti)

    if T_pad != T:
        x2 = jnp.pad(x2, ((0, T_pad - T), (0, 0)))

    # Cast weights once to the compute dtype (no transposes); pad I if needed.
    w1c = w1.astype(param_dtype)
    w3c = w3.astype(param_dtype)
    w2c = w2.astype(param_dtype)
    if I_pad != I:
        w1c = jnp.pad(w1c, ((0, I_pad - I), (0, 0)))
        w3c = jnp.pad(w3c, ((0, I_pad - I), (0, 0)))
        w2c = jnp.pad(w2c, ((0, 0), (0, I_pad - I)))

    if fuse_norm:
        g = norm_weight.astype(jnp.float32).reshape(1, D)
    else:
        g = jnp.ones((1, D), jnp.float32)   # unused, tiny DMA

    wb = jnp.dtype(param_dtype).itemsize
    xb = x2.dtype.itemsize
    ob = x.dtype.itemsize
    # Double-buffered inputs/outputs + f32 accumulator + bf16 activation scratch.
    vmem_est = (2 * tm * D * xb            # x tile
                + 2 * 2 * ti * D * wb      # w1, w3 tiles
                + 2 * D * ti * wb          # w2 tile
                + 2 * tm * D * ob          # output tile
                + tm * D * 4               # f32 accumulator
                + tm * D * 2               # bf16 normalized activation
                + 2 * D * 4)               # norm weight
    vmem_limit = min(max(int(vmem_est * 1.5), 32 * 1024 * 1024), 64 * 1024 * 1024)

    grid = (T_pad // tm, I_pad // ti)

    kernel = functools.partial(_ffn_kernel, eps=float(norm_eps),
                               fuse_norm=fuse_norm, fuse_residual=fuse_residual)

    out = pl.pallas_call(
        kernel,
        out_shape=jax.ShapeDtypeStruct((T_pad, D), x.dtype),
        grid_spec=pltpu.PrefetchScalarGridSpec(
            num_scalar_prefetch=0,
            grid=grid,
            in_specs=[
                pl.BlockSpec((tm, D), lambda i, k: (i, 0)),   # x: constant over k
                pl.BlockSpec((1, D), lambda i, k: (0, 0)),    # RMSNorm weight
                pl.BlockSpec((ti, D), lambda i, k: (k, 0)),   # w1 tile (I, D)
                pl.BlockSpec((ti, D), lambda i, k: (k, 0)),   # w3 tile (I, D)
                pl.BlockSpec((D, ti), lambda i, k: (0, k)),   # w2 tile (D, I)
            ],
            out_specs=pl.BlockSpec((tm, D), lambda i, k: (i, 0)),
            scratch_shapes=[pltpu.VMEM((tm, D), jnp.float32),
                            pltpu.VMEM((tm, D), param_dtype)],
        ),
        compiler_params=pltpu.CompilerParams(
            dimension_semantics=("parallel", "arbitrary"),
            vmem_limit_bytes=vmem_limit,
        ),
    )(x2, g, w1c, w3c, w2c)

    if T_pad != T:
        out = out[:T]
    return out.reshape(orig_shape)


def feed_forward(x, w1, w3, w2, *, tm=256, ti=512, param_dtype=jnp.bfloat16):
    """Plain SwiGLU FFN (no norm / residual): w2(silu(w1(x)) * w3(x))."""
    return ffn_block(x, w1, w3, w2, norm_weight=None, fuse_residual=False,
                     tm=tm, ti=ti, param_dtype=param_dtype)


def ffn_block_ref(x, w1, w3, w2, norm_weight=None, norm_eps=1e-5,
                  fuse_residual=False, param_dtype=jnp.bfloat16):
    """Plain-JAX reference with the same bf16-compute / f32-accumulate recipe."""
    xf = x.astype(jnp.float32)
    if norm_weight is not None:
        var = jnp.mean(xf * xf, axis=-1, keepdims=True)
        xn = xf * lax.rsqrt(var + norm_eps) * norm_weight.astype(jnp.float32)
    else:
        xn = xf
    xb = xn.astype(param_dtype)
    h1 = jnp.dot(xb, w1.astype(param_dtype).T, preferred_element_type=jnp.float32)
    h3 = jnp.dot(xb, w3.astype(param_dtype).T, preferred_element_type=jnp.float32)
    h = (h1 * jax.nn.sigmoid(h1)) * h3
    out = jnp.dot(h.astype(param_dtype), w2.astype(param_dtype).T,
                  preferred_element_type=jnp.float32)
    if fuse_residual:
        out = out + xf
    return out.astype(x.dtype)


if __name__ == "__main__":
    # Small but lane-aligned config (BaseModelArgs fields dim / intermediate_size).
    dim = 256
    intermediate_size = 1024
    batch, seq = 2, 128
    initializer_range = 0.02
    norm_eps = 1e-5

    key = jax.random.PRNGKey(0)
    kx, k1, k2, k3, kg = jax.random.split(key, 5)

    x = jax.random.normal(kx, (batch, seq, dim), dtype=jnp.float32)
    # nn.Linear(dim, intermediate_size, bias=False).weight -> (I, D)
    w1 = initializer_range * jax.random.normal(k1, (intermediate_size, dim), jnp.float32)
    w3 = initializer_range * jax.random.normal(k3, (intermediate_size, dim), jnp.float32)
    # nn.Linear(intermediate_size, dim, bias=False).weight -> (D, I)
    w2 = initializer_range * jax.random.normal(k2, (dim, intermediate_size), jnp.float32)
    # RMSNorm weight (ffn_norm), perturbed away from 1.0 for a non-trivial test.
    g = 1.0 + 0.1 * jax.random.normal(kg, (dim,), jnp.float32)

    # 2 token tiles (even count -> both TCs busy) x 2 intermediate tiles
    # (exercises the accumulator init / accumulate / flush path).

    # (1) Plain FeedForward (exactly the FeedForward module's forward).
    out_ffn = feed_forward(x, w1, w3, w2, tm=128, ti=512)
    out_ffn = jax.block_until_ready(out_ffn)
    ref_ffn = ffn_block_ref(x, w1, w3, w2)
    assert out_ffn.shape == ref_ffn.shape == (batch, seq, dim)
    err_ffn = jnp.max(jnp.abs(out_ffn - ref_ffn))
    assert jnp.allclose(out_ffn, ref_ffn, atol=5e-4, rtol=2e-2), \
        f"FFN mismatch vs reference (max abs err {err_ffn})"

    # (2) Fused RMSNorm + FeedForward + residual (TransformerBlock FFN half).
    out_blk = ffn_block(x, w1, w3, w2, norm_weight=g, norm_eps=norm_eps,
                        fuse_residual=True, tm=128, ti=512)
    out_blk = jax.block_until_ready(out_blk)
    ref_blk = ffn_block_ref(x, w1, w3, w2, norm_weight=g, norm_eps=norm_eps,
                            fuse_residual=True)
    assert out_blk.shape == ref_blk.shape == (batch, seq, dim)
    err_blk = jnp.max(jnp.abs(out_blk - ref_blk))
    assert jnp.allclose(out_blk, ref_blk, atol=5e-4, rtol=2e-2), \
        f"fused block mismatch vs reference (max abs err {err_blk})"

    print("KERNEL_OK")
</pallas_src>

<mosaic_0001>
module attributes {stable_mosaic.version = 11 : i64} {
  func.func @_ffn_kernel(%arg0: i32, %arg1: i32, %arg2: memref<128x256xf32, #tpu.memory_space<vmem>>, %arg3: memref<1x256xf32, #tpu.memory_space<vmem>>, %arg4: memref<512x256xbf16, #tpu.memory_space<vmem>>, %arg5: memref<512x256xbf16, #tpu.memory_space<vmem>>, %arg6: memref<256x512xbf16, #tpu.memory_space<vmem>>, %arg7: memref<128x256xf32, #tpu.memory_space<vmem>>, %arg8: memref<128x256xf32, #tpu.memory_space<vmem>>, %arg9: memref<128x256xbf16, #tpu.memory_space<vmem>>) attributes {dimension_semantics = [#tpu.dimension_semantics<parallel>, #tpu.dimension_semantics<arbitrary>], iteration_bounds = array<i64: 2, 2>, scalar_prefetch = 0 : i64, scratch_operands = 2 : i64, tpu.core_type = #tpu.core_type<tc>, window_params = [{transform_indices = @transform_0, window_bounds = array<i64: 128, 256>}, {pipeline_mode = #tpu.pipeline_mode<synchronous>, transform_indices = @transform_1, window_bounds = array<i64: 1, 256>}, {transform_indices = @transform_2, window_bounds = array<i64: 512, 256>}, {transform_indices = @transform_3, window_bounds = array<i64: 512, 256>}, {transform_indices = @transform_4, window_bounds = array<i64: 256, 512>}, {transform_indices = @transform_5, window_bounds = array<i64: 128, 256>}]} {
    %c0_i32 = arith.constant 0 : i32
    %0 = arith.cmpi eq, %arg1, %c0_i32 : i32
    %1 = arith.extui %0 : i1 to i32
    %c0_i32_0 = arith.constant 0 : i32
    %2 = arith.cmpi ne, %1, %c0_i32_0 : i32
    scf.if %2 {
      %cst_16 = arith.constant 0.000000e+00 : f32
      %24 = vector.broadcast %cst_16 : f32 to vector<128x256xf32>
      %c0_17 = arith.constant 0 : index
      %c0_18 = arith.constant 0 : index
      %25 = vector.load %arg8[%c0_17, %c0_18] : memref<128x256xf32, #tpu.memory_space<vmem>>, vector<128x256xf32>
      tpu.vector_store %arg8[%c0_17, %c0_18], %24 {strides = array<i32>} : memref<128x256xf32, #tpu.memory_space<vmem>>, vector<128x256xf32>,
      %c0_19 = arith.constant 0 : index
      %c0_20 = arith.constant 0 : index
      %26 = vector.load %arg2[%c0_19, %c0_20] : memref<128x256xf32, #tpu.memory_space<vmem>>, vector<128x256xf32>
      %27 = arith.truncf %26 : vector<128x256xf32> to vector<128x256xbf16>
      %c0_21 = arith.constant 0 : index
      %c0_22 = arith.constant 0 : index
      %28 = vector.load %arg9[%c0_21, %c0_22] : memref<128x256xbf16, #tpu.memory_space<vmem>>, vector<128x256xbf16>
      tpu.vector_store %arg9[%c0_21, %c0_22], %27 {strides = array<i32>} : memref<128x256xbf16, #tpu.memory_space<vmem>>, vector<128x256xbf16>,
    } else {
    }
    %c0 = arith.constant 0 : index
    %c0_1 = arith.constant 0 : index
    %3 = vector.load %arg9[%c0, %c0_1] : memref<128x256xbf16, #tpu.memory_space<vmem>>, vector<128x256xbf16>
    %c0_2 = arith.constant 0 : index
    %c0_3 = arith.constant 0 : index
    %4 = vector.load %arg4[%c0_2, %c0_3] : memref<512x256xbf16, #tpu.memory_space<vmem>>, vector<512x256xbf16>
    %cst = arith.constant dense<0.000000e+00> : vector<128x512xf32>
    %5 = tpu.matmul %3, %4, %cst {dimension_numbers = #tpu.dot_dimension_numbers<[1], [1], [0], [0], [0, 0, 1, 0], [], []>} : vector<128x256xbf16>, vector<512x256xbf16>, vector<128x512xf32> -> vector<128x512xf32>
    %c0_4 = arith.constant 0 : index
    %c0_5 = arith.constant 0 : index
    %6 = vector.load %arg5[%c0_4, %c0_5] : memref<512x256xbf16, #tpu.memory_space<vmem>>, vector<512x256xbf16>
    %cst_6 = arith.constant dense<0.000000e+00> : vector<128x512xf32>
    %7 = tpu.matmul %3, %6, %cst_6 {dimension_numbers = #tpu.dot_dimension_numbers<[1], [1], [0], [0], [0, 0, 1, 0], [], []>} : vector<128x256xbf16>, vector<512x256xbf16>, vector<128x512xf32> -> vector<128x512xf32>
    %8 = arith.negf %5 : vector<128x512xf32>
    %9 = math.exp %8 : vector<128x512xf32>
    %cst_7 = arith.constant 1.000000e+00 : f32
    %10 = vector.broadcast %cst_7 : f32 to vector<128x512xf32>
    %11 = arith.addf %10, %9 : vector<128x512xf32>
    %12 = arith.divf %10, %11 : vector<128x512xf32>
    %13 = arith.mulf %5, %12 : vector<128x512xf32>
    %14 = arith.mulf %13, %7 : vector<128x512xf32>
    %c0_8 = arith.constant 0 : index
    %c0_9 = arith.constant 0 : index
    %15 = vector.load %arg8[%c0_8, %c0_9] : memref<128x256xf32, #tpu.memory_space<vmem>>, vector<128x256xf32>
    %16 = arith.truncf %14 : vector<128x512xf32> to vector<128x512xbf16>
    %c0_10 = arith.constant 0 : index
    %c0_11 = arith.constant 0 : index
    %17 = vector.load %arg6[%c0_10, %c0_11] : memref<256x512xbf16, #tpu.memory_space<vmem>>, vector<256x512xbf16>
    %cst_12 = arith.constant dense<0.000000e+00> : vector<128x256xf32>
    %18 = tpu.matmul %16, %17, %cst_12 {dimension_numbers = #tpu.dot_dimension_numbers<[1], [1], [0], [0], [0, 0, 1, 0], [], []>} : vector<128x512xbf16>, vector<256x512xbf16>, vector<128x256xf32> -> vector<128x256xf32>
    %19 = arith.addf %15, %18 : vector<128x256xf32>
    %c0_13 = arith.constant 0 : index
    %c0_14 = arith.constant 0 : index
    %20 = vector.load %arg8[%c0_13, %c0_14] : memref<128x256xf32, #tpu.memory_space<vmem>>, vector<128x256xf32>
    tpu.vector_store %arg8[%c0_13, %c0_14], %19 {strides = array<i32>} : memref<128x256xf32, #tpu.memory_space<vmem>>, vector<128x256xf32>,
    %c1_i32 = arith.constant 1 : i32
    %21 = arith.cmpi eq, %arg1, %c1_i32 : i32
    %22 = arith.extui %21 : i1 to i32
    %c0_i32_15 = arith.constant 0 : i32
    %23 = arith.cmpi ne, %22, %c0_i32_15 : i32
    scf.if %23 {
      %c0_16 = arith.constant 0 : index
      %c0_17 = arith.constant 0 : index
      %24 = vector.load %arg8[%c0_16, %c0_17] : memref<128x256xf32, #tpu.memory_space<vmem>>, vector<128x256xf32>
      %c0_18 = arith.constant 0 : index
      %c0_19 = arith.constant 0 : index
      %25 = vector.load %arg7[%c0_18, %c0_19] : memref<128x256xf32, #tpu.memory_space<vmem>>, vector<128x256xf32>
      tpu.vector_store %arg7[%c0_18, %c0_19], %24 {strides = array<i32>} : memref<128x256xf32, #tpu.memory_space<vmem>>, vector<128x256xf32>,
    } else {
    }
    return
  }
  func.func @transform_0(%arg0: i32, %arg1: i32) -> (i32, i32) {
    %c0_i32 = arith.constant 0 : i32
    %c0_i32_0 = arith.constant 0 : i32
    return %arg0, %c0_i32 : i32, i32
  }
  func.func @transform_1(%arg0: i32, %arg1: i32) -> (i32, i32) {
    %c0_i32 = arith.constant 0 : i32
    %c0_i32_0 = arith.constant 0 : i32
    %c0_i32_1 = arith.constant 0 : i32
    return %c0_i32, %c0_i32_0 : i32, i32
  }
  func.func @transform_2(%arg0: i32, %arg1: i32) -> (i32, i32) {
    %c0_i32 = arith.constant 0 : i32
    %c0_i32_0 = arith.constant 0 : i32
    return %arg1, %c0_i32 : i32, i32
  }
  func.func @transform_3(%arg0: i32, %arg1: i32) -> (i32, i32) {
    %c0_i32 = arith.constant 0 : i32
    %c0_i32_0 = arith.constant 0 : i32
    return %arg1, %c0_i32 : i32, i32
  }
  func.func @transform_4(%arg0: i32, %arg1: i32) -> (i32, i32) {
    %c0_i32 = arith.constant 0 : i32
    %c0_i32_0 = arith.constant 0 : i32
    return %c0_i32, %arg1 : i32, i32
  }
  func.func @transform_5(%arg0: i32, %arg1: i32) -> (i32, i32) {
    %c0_i32 = arith.constant 0 : i32
    %c0_i32_0 = arith.constant 0 : i32
    return %arg0, %c0_i32 : i32, i32
  }
}

</mosaic_0001>

<bundles_post_ra>
// kernel: tpu_custom_call.1
= control target key start
LH: loop header
LB: loop body
LE: loop exit
PB: predicated region body
PF: predicated region fallthrough
CT: control target
= control target key end

     0   :  { %s10167_s0 = inlined_call_operand.hbm [shape: f32[256,256], index: 0, kind: input, shape index: {}]   ;;  %s10168_s1 = inlined_call_operand.hbm [shape: f32[1,256], index: 1, kind: input, shape index: {}]   ;;  %s10169_s2 = inlined_call_operand.hbm [shape: bf16[1024,256], index: 2, kind: input, shape index: {}]   ;;  %s10170_s3 = inlined_call_operand.hbm [shape: bf16[1024,256], index: 3, kind: input, shape index: {}]   ;;  %s10171_s4 = inlined_call_operand.hbm [shape: bf16[256,1024], index: 4, kind: input, shape index: {}]   ;;  %s10172_s5 = inlined_call_operand.hbm [shape: f32[256,256], index: 5, kind: output, shape index: {}]  }
   0x1   :  { %10276 = sst [smem:[#allocation98_spill]] %s10167_s0 }
   0x2   :  { %10277 = sst [smem:[#allocation99_spill]] %s10168_s1 }
   0x3   :  { %10278 = sst [smem:[#allocation100_spill]] %s10169_s2 }
   0x4   :  { %10279 = sst [smem:[#allocation101_spill]] %s10170_s3 }
   0x5   :  { %10280 = sst [smem:[#allocation102_spill]] %s10172_s5 }
   0x6   :  { %10 = vsyncpa [#allocation5], 0 }
   0x7   :  { %12 = vsyncpa [#allocation5 + $0x1], 0 }
   0x8   :  { %13 = vsyncpa [#allocation8], 0 }
   0x9   :  { %14 = vsyncpa [#allocation6], 0 }
   0xa   :  { %16 = vsyncpa [#allocation6 + $0x1], 0  ;;  %s6493_s18 = smov 0   ;;  %s6495_s19 = smov 0  }
   0xb   :  { %s6497_s20 = smov 0   ;;  %s6499_s21 = smov 0  }
   0xc   :  { %s6501_s22 = smov 0   ;;  %s6503_s23 = smov 0  }
   0xd   :  { %s6505_s24 = smov 0   ;;  %s6507_s25 = smov 0  }
   0xe   :  { %s6509_s26 = smov 0   ;;  %s6511_s27 = smov 0  }
   0xf   :  { %s6513_s28 = smov 0  }
  0x10 LB: > { %10281 = sst [smem:[#allocation17_spill]] %s6432_s23  ;;  %s31_s29 = sadd.s32 1, %s6444_s26  ;;  %s6452_s28 = sphi %s6513_s28, %s22_s28   ;;  %s6448_s27 = sphi %s6511_s27, %s10788_s27   ;;  %s6444_s26 = sphi %s6509_s26, %s10795_s26   ;;  %s6440_s25 = sphi %s6507_s25, %s10786_s25   ;;  %s6436_s24 = sphi %s6505_s24, %s10794_s24   ;;  %s6432_s23 = sphi %s6503_s23, %s10785_s23   ;;  %s6428_s22 = sphi %s6501_s22, %s10793_s22   ;;  %s6424_s21 = sphi %s6499_s21, %s10792_s21   ;;  %s6420_s20 = sphi %s6497_s20, %s10791_s20   ;;  %s6416_s19 = sphi %s6495_s19, %s10790_s19   ;;  %s6412_s18 = sphi %s6493_s18, %s10789_s18  }
  0x11   : > { %10282 = sst [smem:[#allocation18_spill]] %s6448_s27  ;;  %s34_s30 = sadd.s32 1, %s6448_s27 }
  0x12   : > { %p32_p0 = scmp.ge.s32.totalorder %s31_s29, 2  ;;  %s41_s6 = sadd.s32 1, %s6432_s23 }
  0x13   : > { %p48_p1 = scmp.ne.s32.totalorder %s6432_s23, %s6428_s22  ;;  %p49_p2 = scmp.eq.s32.totalorder %s6452_s28, 0 }
  0x14   : > { %s10797_s29 = smov (%p32_p0, %s31_s29), 0  ;;  %s10799_s30 = smov (!%p32_p0, %s34_s30), %s6448_s27 }
  0x15   : > { %10283 = sst [smem:[#allocation19_spill]] %s10797_s29  ;;  %p6562_p3 = por %p49_p2, %p48_p1 }
  0x16   : > { %s85_s8 = ssub.s32 %s6444_s26, %s10797_s29  ;;  %p36_p4 = scmp.ge.s32.totalorder %s10799_s30, 2 }
  0x17   : > { %p6568_p5 = scmp.eq.s32.totalorder %s85_s8, 0  ;;  %p5816_p6 = scmp.lt.s32.totalorder %s6452_s28, 4 }
  0x18   : > { %s10801_s30 = smov (%p36_p4, %s10799_s30), 0  ;;  %s215_s10 = sand.u32 1, %s6452_s28  }
  0x19   : > { %10286 = sst [smem:[#allocation20_spill]] %s10801_s30  ;;  %s217_s11 = sand.u32 1, %s6432_s23  }
  0x1a   : > { %s38_s12 = ssub.s32 %s6448_s27, %s10801_s30  ;;  %s4637_s13 = sshll.u32 %s217_s11, 8 }
  0x1b   : > { %p39_p7 = scmp.eq.s32.totalorder %s38_s12, 0  ;;  %s5564_s14 = sshll.u32 %s6448_s27, 8 }
  0x1c   : > { %s10288_s0 = sld [smem:[#allocation98_spill]]  ;;  %s219_s29 = scalar_lea.vmem [#allocation4], %s4637_s13 }
  0x1d   : > { %s6581_s15 = scalar_select %p39_p7, %s6432_s23, %s41_s6  }
  0x1e   : > { %s228_s5 = sshll.u32 %s219_s29, 4  ;;  %p5799_p8 = pnand %p5816_p6, %p6562_p3  ;;  %s229_s5 = int_to_ptr.vmem [resolvable:$true] %s228_s5 }
  0x1f   : > { %10287 = sst [smem:[#allocation21_spill]] %s6581_s15  ;;  %s6590_s11 = scalar_lea.sflag [#allocation5], %s215_s10 }
  0x20   : > { %s10176_s12 = smov 256   ;;  %s10177_s6 = smov 16  }
  0x21   : > { %s88_s13 = sadd.s32 1, %s6420_s20  ;;  %p95_p9 = scmp.ne.s32.totalorder %s6420_s20, %s6416_s19 }
  0x22   : > { %s225_s8 = scalar_lea.hbm %s10288_s0, %s5564_s14  ;;  %s5566_s14 = sshll.u32 %s6444_s26, 9 }
  0x23   : > { %s226_s30 = sshll.u32 %s225_s8, 4  ;;  %p97_p10 = por %p95_p9, %p49_p2  ;;  %s227_s30 = int_to_ptr.hbm [resolvable:$true] %s226_s30 }
  0x24   : > { %5801 = dma.hbm_to_vmem [thread:$0]  (!%p5799_p8), %s227_s30, 4096, %s229_s5, %s6590_s11, %s10176_s12, %s10176_s12, %s10177_s6  }
  0x25   : > { %s6603_s29 = scalar_select %p6568_p5, %s6420_s20, %s88_s13  }
  0x26   : > { %s240_s7 = sand.u32 1, %s6420_s20   ;;  %s10290_s2 = sld [smem:[#allocation100_spill]] }
  0x27   : > { %10289 = sst [smem:[#allocation22_spill]] %s6603_s29  ;;  %s6608_s10 = sshll.u32 %s240_s7, 9 }
  0x28   : > { %s242_s30 = scalar_lea.vmem [#allocation9], %s6608_s10  ;;  %p6616_p11 = pnand %p5816_p6, %p97_p10 }
  0x29   : > { %s251_s9 = sshll.u32 %s242_s30, 4  ;;  %s6456_s7 = smov 128   ;;  %s252_s9 = int_to_ptr.vmem [resolvable:$true] %s251_s9 }
  0x2a   : > { %s6457_s16 = smov 8   ;;  %s10292_s3 = sld [smem:[#allocation101_spill]] }
  0x2b   : > { %s265_s30 = scalar_lea.vmem [#allocation10], %s6608_s10  ;;  %p54_p12 = scmp.ne.s32.totalorder %s6428_s22, %s6424_s21 }
  0x2c   : > { %s248_s8 = scalar_lea.hbm %s10290_s2, %s5566_s14  ;;  %s274_s6 = sshll.u32 %s265_s30, 4  ;;  %s275_s6 = int_to_ptr.vmem [resolvable:$true] %s274_s6 }
  0x2d   : > { %s249_s5 = sshll.u32 %s248_s8, 4  ;;  %s6631_s2 = sadd.s32 4294967295, %s6452_s28   ;;  %s250_s5 = int_to_ptr.hbm [resolvable:$true] %s249_s5 }
  0x2e   : > { %5804 = dma.hbm_to_vmem [thread:$0]  (!%p6616_p11), %s250_s5, 8192, %s252_s9, %s6590_s11, %s6456_s7, %s6456_s7, %s6457_s16  }
  0x2f   : > { %s4633_s5 = sadd.s32 4294967294, %s6452_s28   ;;  %p55_p13 = scmp.eq.s32.totalorder %s6631_s2, 0 }
  0x30   : > { %s271_s12 = scalar_lea.hbm %s10292_s3, %s5566_s14  ;;  %p101_p0 = scmp.ne.s32.totalorder %s6416_s19, %s6412_s18 }
  0x31   : > { %s272_s0 = sshll.u32 %s271_s12, 4  ;;  %p177_p2 = scmp.eq.s32.totalorder %s6631_s2, 3  ;;  %s273_s0 = int_to_ptr.hbm [resolvable:$true] %s272_s0 }
  0x32   : > { %5807 = dma.hbm_to_vmem [thread:$0]  (!%p6616_p11), %s273_s0, 8192, %s275_s6, %s6590_s11, %s6456_s7, %s6456_s7, %s6457_s16  }
  0x33   : > { %p183_p3 = scmp.eq.s32.totalorder %s4633_s5, 3  ;;  %p6642_p4 = por %p55_p13, %p54_p12 }
  0x34   : > { %p6648_p5 = por %p101_p0, %p55_p13  ;;  %p6655_p6 = por %p177_p2, %p48_p1 }
  0x35   : > { %p6659_p7 = por %p183_p3, %p54_p12  ;;  %p4634_p8 = scmp.ge.s32.totalorder %s6452_s28, 1 }
  0x36   : > { %p190_p9 = scmp.lt.s32.totalorder %s6452_s28, 5  ;;  %s10297_s1 = sld [smem:[#allocation99_spill]] }
  0x37   : > { %s6458_s17 = smov [#allocation7]   ;;  %s5569_s30 = sshll.u32 %s6444_s26, 4 }
  0x38   : > { %p6668_p10 = pnand %p4634_p8, %p190_p9  ;;  %s204_s8 = sshll.u32 %s6458_s17, 4  ;;  %s205_s8 = int_to_ptr.vmem [resolvable:$true] %s204_s8 }
  0x39   : > { %s293_s14 = scalar_lea.hbm %s10171_s4, %s5569_s30  ;;  %s6459_s15 = smov 512  }
  0x3a   : > { %p5794_p1 = pneg %p6668_p10  ;;  %s294_s9 = sshll.u32 %s293_s14, 4  ;;  %s295_s9 = int_to_ptr.hbm [resolvable:$true] %s294_s9 }
  0x3b   : > { %s10299_s23 = smov 16   ;;  %s10300_s29 = smov 256  }
  0x3c   : > { %s202_s7 = sshll.u32 %s10297_s1, 4  ;;  %p5795_p12 = pnand %p5794_p1, %p55_p13  ;;  %s203_s7 = int_to_ptr.hbm [resolvable:$true] %s202_s7 }
  0x3d   : > { %s288_s1 = scalar_lea.vmem [#allocation11], %s6608_s10  ;;  %308 = sbr.rel (%p6668_p10) target bundleno = 1202 (0x4b2), region = 40 }
  0x3e   : > { %s296_s27 = sshll.u32 %s288_s1, 4  ;;  %s297_s27 = int_to_ptr.vmem [resolvable:$true] %s296_s27 }
  0x3f   : > { %5797 = dma.hbm_to_vmem [thread:$0]  (!%p5795_p12), %s203_s7, 32, %s205_s8, [#allocation8]  }
  0x40   : > { %5810 = dma.hbm_to_vmem [thread:$0]  (!%p6616_p11), %s295_s9, 8192, %s297_s27, %s6590_s11, %s6459_s15, %s10300_s29, %s10299_s23  }
  0x42   : > { %s310_s3 = sand.u32 1, %s6631_s2   ;;  %s312_s17 = sand.u32 1, %s6428_s22  }
  0x43   : > { %s4653_s10 = sshll.u32 %s312_s17, 8  ;;  %s311_s1 = scalar_lea.sflag [#allocation5], %s310_s3 }
  0x44   : > { %s6692_s30 = scalar_lea.vmem [#allocation4], %s4653_s10 }
  0x45   : > { %6395 = dma.done.wait (%p6642_p4), %s311_s1, 4096  }
  0x46   : > { %6397 = vsyncadd (%p6642_p4), %s311_s1, 4294963200 }
  0x47   : > { %6399 = dma.done.wait (%p55_p13), [#allocation8], 32  }
  0x48   : > { %6401 = vsyncadd (%p55_p13), [#allocation8], 4294967264  ;;  %s327_s23 = sand.u32 1, %s6416_s19  }
  0x49   : > { %s4655_s27 = sshll.u32 %s327_s23, 9 }
  0x4a   : > { %s6703_s15 = scalar_lea.vmem [#allocation9], %s4655_s27 }
  0x4b   : > { %6403 = dma.done.wait (%p6648_p5), %s311_s1, 24576  }
  0x4c   : > { %6405 = vsyncadd (%p6648_p5), %s311_s1, 4294942720  ;;  %s6709_s11 = scalar_lea.vmem [#allocation10], %s4655_s27  ;;  %s6711_s29 = scalar_lea.vmem [#allocation11], %s4655_s27 }
  0x4d   : > { %s6713_s13 = scalar_lea.vmem [#allocation12], %s4653_s10  ;;  %p4659_p11 = scmp.ne.s32.totalorder %s6436_s24, 0 }
  0x4f   : > { %400 = sbr.rel (%p4659_p11) target bundleno = 133 (0x85), region = 64 }
  0x54   : > { %v6460_v0 = vmov 0.0   ;;  %v433_v1 = vld [vmem:[%s6692_s30] sm:$0xff]  ;;  %v434_v2 = vld [vmem:[%s6692_s30 + $0x8] sm:$0xff]  ;;  %v435_v3 = vld [vmem:[%s6692_s30 + $0x10] sm:$0xff] }
  0x55   : > { %401 = vst [vmem:[#allocation2 + $0xb0] sm:$0xff] %v6460_v0  ;;  %v436_v4 = vld [vmem:[%s6692_s30 + $0x18] sm:$0xff]  ;;  %v437_v5 = vld [vmem:[%s6692_s30 + $0x20] sm:$0xff]  ;;  %v438_v6 = vld [vmem:[%s6692_s30 + $0x28] sm:$0xff]  ;;  %v465_v7 = vpack.c.bf16 %v434_v2, %v433_v1 }
  0x56   : > { %402 = vst [vmem:[#allocation2] sm:$0xff] %v6460_v0  ;;  %v439_v8 = vld [vmem:[%s6692_s30 + $0x30] sm:$0xff]  ;;  %v440_v9 = vld [vmem:[%s6692_s30 + $0x38] sm:$0xff]  ;;  %v466_v10 = vpack.c.bf16 %v436_v4, %v435_v3  ;;  %v441_v11 = vld [vmem:[%s6692_s30 + $0x40] sm:$0xff]  ;;  %v467_v13 = vpack.c.bf16 %v438_v6, %v437_v5 }
  0x57   : > { %403 = vst [vmem:[#allocation2 + $0xd8] sm:$0xff] %v6460_v0  ;;  %v442_v12 = vld [vmem:[%s6692_s30 + $0x48] sm:$0xff]  ;;  %v443_v14 = vld [vmem:[%s6692_s30 + $0x50] sm:$0xff]  ;;  %v444_v15 = vld [vmem:[%s6692_s30 + $0x58] sm:$0xff]  ;;  %v468_v16 = vpack.c.bf16 %v440_v9, %v439_v8 }
  0x58   : > { %404 = vst [vmem:[#allocation2 + $0x18] sm:$0xff] %v6460_v0  ;;  %v445_v17 = vld [vmem:[%s6692_s30 + $0x60] sm:$0xff]  ;;  %v446_v18 = vld [vmem:[%s6692_s30 + $0x68] sm:$0xff]  ;;  %v469_v19 = vpack.c.bf16 %v442_v12, %v441_v11  ;;  %v447_v20 = vld [vmem:[%s6692_s30 + $0x70] sm:$0xff]  ;;  %v470_v22 = vpack.c.bf16 %v444_v15, %v443_v14 }
  0x59   : > { %405 = vst [vmem:[#allocation2 + $0x50] sm:$0xff] %v6460_v0  ;;  %v448_v21 = vld [vmem:[%s6692_s30 + $0x78] sm:$0xff]  ;;  %v449_v23 = vld [vmem:[%s6692_s30 + $0x80] sm:$0xff]  ;;  %v450_v24 = vld [vmem:[%s6692_s30 + $0x88] sm:$0xff]  ;;  %v471_v25 = vpack.c.bf16 %v446_v18, %v445_v17 }
  0x5a   : > { %406 = vst [vmem:[#allocation2 + $0x68] sm:$0xff] %v6460_v0  ;;  %v451_v26 = vld [vmem:[%s6692_s30 + $0x90] sm:$0xff]  ;;  %v452_v27 = vld [vmem:[%s6692_s30 + $0x98] sm:$0xff]  ;;  %v472_v28 = vpack.c.bf16 %v448_v21, %v447_v20  ;;  %v453_v29 = vld [vmem:[%s6692_s30 + $0xa0] sm:$0xff]  ;;  %v473_v31 = vpack.c.bf16 %v450_v24, %v449_v23 }
  0x5b   : > { %407 = vst [vmem:[#allocation2 + $0x30] sm:$0xff] %v6460_v0  ;;  %v454_v30 = vld [vmem:[%s6692_s30 + $0xa8] sm:$0xff]  ;;  %v455_v32 = vld [vmem:[%s6692_s30 + $0xb0] sm:$0xff]  ;;  %v456_v33 = vld [vmem:[%s6692_s30 + $0xb8] sm:$0xff]  ;;  %v474_v34 = vpack.c.bf16 %v452_v27, %v451_v26 }
  0x5c   : > { %408 = vst [vmem:[#allocation2 + $0x48] sm:$0xff] %v6460_v0  ;;  %v457_v35 = vld [vmem:[%s6692_s30 + $0xc0] sm:$0xff]  ;;  %v458_v36 = vld [vmem:[%s6692_s30 + $0xc8] sm:$0xff]  ;;  %v475_v37 = vpack.c.bf16 %v454_v30, %v453_v29  ;;  %v459_v38 = vld [vmem:[%s6692_s30 + $0xd0] sm:$0xff]  ;;  %v476_v40 = vpack.c.bf16 %v456_v33, %v455_v32 }
  0x5d   : > { %409 = vst [vmem:[#allocation2 + $0x80] sm:$0xff] %v6460_v0  ;;  %v460_v39 = vld [vmem:[%s6692_s30 + $0xd8] sm:$0xff]  ;;  %v461_v41 = vld [vmem:[%s6692_s30 + $0xe0] sm:$0xff]  ;;  %v462_v42 = vld [vmem:[%s6692_s30 + $0xe8] sm:$0xff]  ;;  %v477_v43 = vpack.c.bf16 %v458_v36, %v457_v35 }
  0x5e   : > { %410 = vst [vmem:[#allocation2 + $0x88] sm:$0xff] %v6460_v0  ;;  %v463_v44 = vld [vmem:[%s6692_s30 + $0xf0] sm:$0xff]  ;;  %v464_v45 = vld [vmem:[%s6692_s30 + $0xf8] sm:$0xff]  ;;  %v478_v46 = vpack.c.bf16 %v460_v39, %v459_v38  ;;  %v479_v47 = vpack.c.bf16 %v462_v42, %v461_v41 }
  0x5f   : > { %411 = vst [vmem:[#allocation2 + $0xe8] sm:$0xff] %v6460_v0  ;;  %v480_v48 = vpack.c.bf16 %v464_v45, %v463_v44 }
  0x60   : > { %412 = vst [vmem:[#allocation2 + $0xb8] sm:$0xff] %v6460_v0 }
  0x61   : > { %413 = vst [vmem:[#allocation2 + $0x60] sm:$0xff] %v6460_v0 }
  0x62   : > { %414 = vst [vmem:[#allocation2 + $0xf0] sm:$0xff] %v6460_v0 }
  0x63   : > { %415 = vst [vmem:[#allocation2 + $0x8] sm:$0xff] %v6460_v0 }
  0x64   : > { %416 = vst [vmem:[#allocation2 + $0x78] sm:$0xff] %v6460_v0 }
  0x65   : > { %417 = vst [vmem:[#allocation2 + $0x38] sm:$0xff] %v6460_v0 }
  0x66   : > { %418 = vst [vmem:[#allocation2 + $0x58] sm:$0xff] %v6460_v0 }
  0x67   : > { %419 = vst [vmem:[#allocation2 + $0x40] sm:$0xff] %v6460_v0 }
  0x68   : > { %420 = vst [vmem:[#allocation2 + $0xc8] sm:$0xff] %v6460_v0 }
  0x69   : > { %421 = vst [vmem:[#allocation2 + $0xe0] sm:$0xff] %v6460_v0 }
  0x6a   : > { %422 = vst [vmem:[#allocation2 + $0x90] sm:$0xff] %v6460_v0 }
  0x6b   : > { %423 = vst [vmem:[#allocation2 + $0x70] sm:$0xff] %v6460_v0 }
  0x6c   : > { %424 = vst [vmem:[#allocation2 + $0xc0] sm:$0xff] %v6460_v0 }
  0x6d   : > { %425 = vst [vmem:[#allocation2 + $0xa8] sm:$0xff] %v6460_v0 }
  0x6e   : > { %426 = vst [vmem:[#allocation2 + $0xd0] sm:$0xff] %v6460_v0 }
  0x6f   : > { %427 = vst [vmem:[#allocation2 + $0x10] sm:$0xff] %v6460_v0 }
  0x70   : > { %428 = vst [vmem:[#allocation2 + $0x28] sm:$0xff] %v6460_v0 }
  0x71   : > { %429 = vst [vmem:[#allocation2 + $0xa0] sm:$0xff] %v6460_v0 }
  0x72   : > { %430 = vst [vmem:[#allocation2 + $0xf8] sm:$0xff] %v6460_v0 }
  0x73   : > { %431 = vst [vmem:[#allocation2 + $0x20] sm:$0xff] %v6460_v0 }
  0x74   : > { %432 = vst [vmem:[#allocation2 + $0x98] sm:$0xff] %v6460_v0 }
  0x75   : > { %481 = vst [vmem:[#allocation3] sm:$0xff] %v465_v7 }
  0x76   : > { %482 = vst [vmem:[#allocation3 + $0x8] sm:$0xff] %v466_v10 }
  0x77   : > { %483 = vst [vmem:[#allocation3 + $0x10] sm:$0xff] %v467_v13 }
  0x78   : > { %484 = vst [vmem:[#allocation3 + $0x18] sm:$0xff] %v468_v16 }
  0x79   : > { %485 = vst [vmem:[#allocation3 + $0x20] sm:$0xff] %v469_v19 }
  0x7a   : > { %486 = vst [vmem:[#allocation3 + $0x28] sm:$0xff] %v470_v22 }
  0x7b   : > { %487 = vst [vmem:[#allocation3 + $0x30] sm:$0xff] %v471_v25 }
  0x7c   : > { %488 = vst [vmem:[#allocation3 + $0x38] sm:$0xff] %v472_v28 }
  0x7d   : > { %489 = vst [vmem:[#allocation3 + $0x40] sm:$0xff] %v473_v31 }
  0x7e   : > { %490 = vst [vmem:[#allocation3 + $0x48] sm:$0xff] %v474_v34 }
  0x7f   : > { %491 = vst [vmem:[#allocation3 + $0x50] sm:$0xff] %v475_v37 }
  0x80   : > { %492 = vst [vmem:[#allocation3 + $0x58] sm:$0xff] %v476_v40 }
  0x81   : > { %493 = vst [vmem:[#allocation3 + $0x60] sm:$0xff] %v477_v43 }
  0x82   : > { %494 = vst [vmem:[#allocation3 + $0x68] sm:$0xff] %v478_v46 }
  0x83   : > { %495 = vst [vmem:[#allocation3 + $0x70] sm:$0xff] %v479_v47 }
  0x84   : > { %496 = vst [vmem:[#allocation3 + $0x78] sm:$0xff] %v480_v48 }
  0x85 PF: > { %v4782_v49 = vld [vmem:[%s6703_s15 + $0x70] sm:$0xf]  ;;  %v5601_v50 = vld [vmem:[%s6703_s15 + $0x74] sm:$0xf0]  ;;  %v5600_v51 = vld [vmem:[%s6703_s15 + $0x74] sm:$0xf] }
  0x86   : > { %v4783_v52 = vor.u32 %v5601_v50, %v4782_v49  ;;  %v4784_v53 = vld [vmem:[%s6703_s15 + $0x78] sm:$0xf0]  ;;  %v4846_v54 = vld [vmem:[%s6703_s15 + $0xf0] sm:$0xf]  ;;  %v5617_v55 = vld [vmem:[%s6703_s15 + $0xf4] sm:$0xf0] }
  0x87   : > { %v4787_v56 = vor.u32 %v5600_v51, %v4784_v53  ;;  %v4847_v57 = vor.u32 %v5617_v55, %v4846_v54  ;;  %v5616_v58 = vld [vmem:[%s6703_s15 + $0xf4] sm:$0xf]  ;;  %v4848_v59 = vld [vmem:[%s6703_s15 + $0xf8] sm:$0xf0]  ;;  %v4774_v61 = vld [vmem:[%s6703_s15 + $0x60] sm:$0xf] }
  0x88   : > { %977 = vmatpush.bf16.xpose.msra.mxu0 %v4783_v52  ;;  %v4851_v60 = vor.u32 %v5616_v58, %v4848_v59  ;;  %v5599_v62 = vld [vmem:[%s6703_s15 + $0x64] sm:$0xf0]  ;;  %v5598_v63 = vld [vmem:[%s6703_s15 + $0x64] sm:$0xf]  ;;  %v4776_v0 = vld [vmem:[%s6703_s15 + $0x68] sm:$0xf0] }
  0x89   : > { %1026 = vmatpush.bf16.xpose.msra.mxu1 %v4787_v56  ;;  %1075 = vmatpush.bf16.xpose.msra.mxu2 %v4847_v57  ;;  %v4838_v1 = vld [vmem:[%s6703_s15 + $0xe0] sm:$0xf]  ;;  %v5615_v2 = vld [vmem:[%s6703_s15 + $0xe4] sm:$0xf0]  ;;  %v5614_v3 = vld [vmem:[%s6703_s15 + $0xe4] sm:$0xf]  ;;  %v4775_v5 = vor.u32 %v5599_v62, %v4774_v61  ;;  %v4779_v6 = vor.u32 %v5598_v63, %v4776_v0 }
  0x8a   : > { %1124 = vmatpush.bf16.xpose.msra.mxu3 %v4851_v60  ;;  %v4840_v4 = vld [vmem:[%s6703_s15 + $0xe8] sm:$0xf0]  ;;  %v4839_v7 = vor.u32 %v5615_v2, %v4838_v1  ;;  %v4766_v9 = vld [vmem:[%s6703_s15 + $0x50] sm:$0xf]  ;;  %v5597_v10 = vld [vmem:[%s6703_s15 + $0x54] sm:$0xf0] }
  0x8b   : > { %v4843_v8 = vor.u32 %v5614_v3, %v4840_v4  ;;  %v5596_v11 = vld [vmem:[%s6703_s15 + $0x54] sm:$0xf]  ;;  %v4768_v12 = vld [vmem:[%s6703_s15 + $0x58] sm:$0xf0]  ;;  %v4830_v13 = vld [vmem:[%s6703_s15 + $0xd0] sm:$0xf]  ;;  %v4767_v17 = vor.u32 %v5597_v10, %v4766_v9 }
  0x8c   : > { %v5613_v14 = vld [vmem:[%s6703_s15 + $0xd4] sm:$0xf0]  ;;  %v5612_v15 = vld [vmem:[%s6703_s15 + $0xd4] sm:$0xf]  ;;  %v4832_v16 = vld [vmem:[%s6703_s15 + $0xd8] sm:$0xf0]  ;;  %v4771_v18 = vor.u32 %v5596_v11, %v4768_v12 }
  0x8d   : > { %v4831_v19 = vor.u32 %v5613_v14, %v4830_v13  ;;  %v4835_v20 = vor.u32 %v5612_v15, %v4832_v16  ;;  %v4758_v21 = vld [vmem:[%s6703_s15 + $0x40] sm:$0xf]  ;;  %v5595_v22 = vld [vmem:[%s6703_s15 + $0x44] sm:$0xf0]  ;;  %v5594_v23 = vld [vmem:[%s6703_s15 + $0x44] sm:$0xf] }
  0x8e   : > { %v4760_v24 = vld [vmem:[%s6703_s15 + $0x48] sm:$0xf0]  ;;  %v4822_v25 = vld [vmem:[%s6703_s15 + $0xc0] sm:$0xf]  ;;  %v5611_v26 = vld [vmem:[%s6703_s15 + $0xc4] sm:$0xf0]  ;;  %v4759_v29 = vor.u32 %v5595_v22, %v4758_v21 }
  0x8f   : > { %v5610_v27 = vld [vmem:[%s6703_s15 + $0xc4] sm:$0xf]  ;;  %v4824_v28 = vld [vmem:[%s6703_s15 + $0xc8] sm:$0xf0]  ;;  %v4763_v30 = vor.u32 %v5594_v23, %v4760_v24  ;;  %v4823_v31 = vor.u32 %v5611_v26, %v4822_v25  ;;  %v4750_v33 = vld [vmem:[%s6703_s15 + $0x30] sm:$0xf] }
  0x90   : > { %978 = vmatpush.bf16.xpose.msra.mxu0 %v4775_v5  ;;  %v4827_v32 = vor.u32 %v5610_v27, %v4824_v28  ;;  %v5593_v34 = vld [vmem:[%s6703_s15 + $0x34] sm:$0xf0]  ;;  %v5592_v35 = vld [vmem:[%s6703_s15 + $0x34] sm:$0xf]  ;;  %v4752_v36 = vld [vmem:[%s6703_s15 + $0x38] sm:$0xf0] }
  0x91   : > { %1027 = vmatpush.bf16.xpose.msra.mxu1 %v4779_v6  ;;  %1076 = vmatpush.bf16.xpose.msra.mxu2 %v4839_v7  ;;  %v4814_v37 = vld [vmem:[%s6703_s15 + $0xb0] sm:$0xf]  ;;  %v5609_v38 = vld [vmem:[%s6703_s15 + $0xb4] sm:$0xf0]  ;;  %v5608_v39 = vld [vmem:[%s6703_s15 + $0xb4] sm:$0xf]  ;;  %v4751_v41 = vor.u32 %v5593_v34, %v4750_v33  ;;  %v4755_v42 = vor.u32 %v5592_v35, %v4752_v36 }
  0x92   : > { %1125 = vmatpush.bf16.xpose.msra.mxu3 %v4843_v8  ;;  %v4816_v40 = vld [vmem:[%s6703_s15 + $0xb8] sm:$0xf0]  ;;  %v4815_v43 = vor.u32 %v5609_v38, %v4814_v37  ;;  %v4742_v45 = vld [vmem:[%s6703_s15 + $0x20] sm:$0xf]  ;;  %v5591_v46 = vld [vmem:[%s6703_s15 + $0x24] sm:$0xf0] }
  0x93   : > { %v4819_v44 = vor.u32 %v5608_v39, %v4816_v40  ;;  %v5590_v47 = vld [vmem:[%s6703_s15 + $0x24] sm:$0xf]  ;;  %v4744_v48 = vld [vmem:[%s6703_s15 + $0x28] sm:$0xf0]  ;;  %v4806_v49 = vld [vmem:[%s6703_s15 + $0xa0] sm:$0xf]  ;;  %v4743_v53 = vor.u32 %v5591_v46, %v4742_v45 }
  0x94   : > { %v5607_v50 = vld [vmem:[%s6703_s15 + $0xa4] sm:$0xf0]  ;;  %v5606_v51 = vld [vmem:[%s6703_s15 + $0xa4] sm:$0xf]  ;;  %v4808_v52 = vld [vmem:[%s6703_s15 + $0xa8] sm:$0xf0]  ;;  %v4747_v54 = vor.u32 %v5590_v47, %v4744_v48 }
  0x95   : > { %v4807_v55 = vor.u32 %v5607_v50, %v4806_v49  ;;  %v4811_v56 = vor.u32 %v5606_v51, %v4808_v52  ;;  %v4734_v57 = vld [vmem:[%s6703_s15 + $0x10] sm:$0xf]  ;;  %v5589_v58 = vld [vmem:[%s6703_s15 + $0x14] sm:$0xf0]  ;;  %v5588_v59 = vld [vmem:[%s6703_s15 + $0x14] sm:$0xf] }
  0x96   : > { %v4736_v60 = vld [vmem:[%s6703_s15 + $0x18] sm:$0xf0]  ;;  %v4798_v61 = vld [vmem:[%s6703_s15 + $0x90] sm:$0xf]  ;;  %v5605_v62 = vld [vmem:[%s6703_s15 + $0x94] sm:$0xf0]  ;;  %v4735_v1 = vor.u32 %v5589_v58, %v4734_v57 }
  0x97   : > { %v5604_v63 = vld [vmem:[%s6703_s15 + $0x94] sm:$0xf]  ;;  %v4800_v0 = vld [vmem:[%s6703_s15 + $0x98] sm:$0xf0]  ;;  %v4739_v2 = vor.u32 %v5588_v59, %v4736_v60  ;;  %v4799_v3 = vor.u32 %v5605_v62, %v4798_v61  ;;  %v4726_v5 = vld [vmem:[%s6703_s15] sm:$0xf] }
  0x98   : > { %979 = vmatpush.bf16.xpose.msra.mxu0 %v4767_v17  ;;  %v4803_v4 = vor.u32 %v5604_v63, %v4800_v0  ;;  %v5587_v6 = vld [vmem:[%s6703_s15 + $0x4] sm:$0xf0]  ;;  %v5586_v7 = vld [vmem:[%s6703_s15 + $0x4] sm:$0xf]  ;;  %v4728_v8 = vld [vmem:[%s6703_s15 + $0x8] sm:$0xf0] }
  0x99   : > { %1028 = vmatpush.bf16.xpose.msra.mxu1 %v4771_v18  ;;  %1077 = vmatpush.bf16.xpose.msra.mxu2 %v4831_v19  ;;  %v4790_v9 = vld [vmem:[%s6703_s15 + $0x80] sm:$0xf]  ;;  %v5603_v10 = vld [vmem:[%s6703_s15 + $0x84] sm:$0xf0]  ;;  %v5602_v11 = vld [vmem:[%s6703_s15 + $0x84] sm:$0xf]  ;;  %v4727_v16 = vor.u32 %v5587_v6, %v4726_v5 }
  0x9a   : > { %1126 = vmatpush.bf16.xpose.msra.mxu3 %v4835_v20  ;;  %v4792_v12 = vld [vmem:[%s6703_s15 + $0x88] sm:$0xf0]  ;;  %v4974_v13 = vld [vmem:[%s6703_s15 + $0x1f0] sm:$0xf]  ;;  %v5649_v14 = vld [vmem:[%s6703_s15 + $0x1f4] sm:$0xf0]  ;;  %v4731_v20 = vor.u32 %v5586_v7, %v4728_v8  ;;  %v4791_v21 = vor.u32 %v5603_v10, %v4790_v9 }
  0x9b   : > { %v5648_v15 = vld [vmem:[%s6703_s15 + $0x1f4] sm:$0xf]  ;;  %v4976_v17 = vld [vmem:[%s6703_s15 + $0x1f8] sm:$0xf0]  ;;  %v4910_v18 = vld [vmem:[%s6703_s15 + $0x170] sm:$0xf]  ;;  %v4795_v24 = vor.u32 %v5602_v11, %v4792_v12  ;;  %v4975_v25 = vor.u32 %v5649_v14, %v4974_v13 }
  0x9c   : > { %v5633_v19 = vld [vmem:[%s6703_s15 + $0x174] sm:$0xf0]  ;;  %v5632_v22 = vld [vmem:[%s6703_s15 + $0x174] sm:$0xf]  ;;  %v4912_v23 = vld [vmem:[%s6703_s15 + $0x178] sm:$0xf0]  ;;  %v4979_v26 = vor.u32 %v5648_v15, %v4976_v17 }
  0x9d   : > { %v4911_v27 = vor.u32 %v5633_v19, %v4910_v18  ;;  %v4662_v28 = vld [vmem:[#allocation3] sm:$0xf]  ;;  %v5647_v35 = vld [vmem:[%s6703_s15 + $0x1e4] sm:$0xf0]  ;;  %v5646_v36 = vld [vmem:[%s6703_s15 + $0x1e4] sm:$0xf] }
  0x9e   : > { %v4966_v34 = vld [vmem:[%s6703_s15 + $0x1e0] sm:$0xf]  ;;  %v4968_v38 = vld [vmem:[%s6703_s15 + $0x1e8] sm:$0xf0]  ;;  %v5631_v40 = vld [vmem:[%s6703_s15 + $0x164] sm:$0xf0] }
  0x9f   : > { %v4902_v39 = vld [vmem:[%s6703_s15 + $0x160] sm:$0xf]  ;;  %v4958_v47 = vld [vmem:[%s6703_s15 + $0x1d0] sm:$0xf]  ;;  %v5645_v48 = vld [vmem:[%s6703_s15 + $0x1d4] sm:$0xf0] }
  0xa0   : > { %980 = vmatpush.bf16.xpose.msra.mxu0 %v4759_v29  ;;  %v5571_v29 = vld [vmem:[#allocation3 + $0x4] sm:$0xf0]  ;;  %v4903_v45 = vor.u32 %v5631_v40, %v4902_v39  ;;  %v5644_v49 = vld [vmem:[%s6703_s15 + $0x1d4] sm:$0xf]  ;;  %v4960_v50 = vld [vmem:[%s6703_s15 + $0x1d8] sm:$0xf0] }
  0xa1   : > { %1029 = vmatpush.bf16.xpose.msra.mxu1 %v4763_v30  ;;  %1078 = vmatpush.bf16.xpose.msra.mxu2 %v4823_v31  ;;  %v4915_v30 = vor.u32 %v5632_v22, %v4912_v23  ;;  %v5570_v31 = vld [vmem:[#allocation3 + $0x4] sm:$0xf]  ;;  %v6820_v33 = vor.u32 %v5571_v29, %v4662_v28  ;;  %v4894_v51 = vld [vmem:[%s6703_s15 + $0x150] sm:$0xf]  ;;  %v5629_v52 = vld [vmem:[%s6703_s15 + $0x154] sm:$0xf0] }
  0xa2   : > { %1127 = vmatpush.bf16.xpose.msra.mxu3 %v4827_v32  ;;  %v4664_v32 = vld [vmem:[#allocation3 + $0x8] sm:$0xf0]  ;;  %v4895_v57 = vor.u32 %v5629_v52, %v4894_v51  ;;  %v4670_v58 = vld [vmem:[#allocation3 + $0x10] sm:$0xf]  ;;  %v5573_v59 = vld [vmem:[#allocation3 + $0x14] sm:$0xf0] }
  0xa3   : > { %10301 = vst [vmem:[#allocation23_spill] sm:$0xff] %v6820_v33  ;;  %v6825_v37 = vor.u32 %v5570_v31, %v4664_v32  ;;  %v5572_v61 = vld [vmem:[#allocation3 + $0x14] sm:$0xf]  ;;  %v4672_v62 = vld [vmem:[#allocation3 + $0x18] sm:$0xf0]  ;;  %v6844_v63 = vor.u32 %v5573_v59, %v4670_v58  ;;  %p5556_p13 = scmp.ne.s32.totalorder %s6436_s24, 1 }
  0xa4   : > { %v6846_v0 = vor.u32 %v5572_v61, %v4672_v62  ;;  %v4952_v5 = vld [vmem:[%s6703_s15 + $0x1c8] sm:$0xf0]  ;;  %v4886_v6 = vld [vmem:[%s6703_s15 + $0x140] sm:$0xf]  ;;  %v5627_v7 = vld [vmem:[%s6703_s15 + $0x144] sm:$0xf0] }
  0xa5   : > { %10302 = vst [vmem:[#allocation24_spill] sm:$0xff] %v6825_v37  ;;  %v4887_v9 = vor.u32 %v5627_v7, %v4886_v6  ;;  %v5626_v10 = vld [vmem:[%s6703_s15 + $0x144] sm:$0xf]  ;;  %v4888_v11 = vld [vmem:[%s6703_s15 + $0x148] sm:$0xf0] }
  0xa6   : > { %10303 = vst [vmem:[#allocation25_spill] sm:$0xff] %v6844_v63  ;;  %v4891_v12 = vor.u32 %v5626_v10, %v4888_v11  ;;  %v4678_v13 = vld [vmem:[#allocation3 + $0x20] sm:$0xf]  ;;  %v5575_v14 = vld [vmem:[#allocation3 + $0x24] sm:$0xf0] }
  0xa7   : > { %10304 = vst [vmem:[#allocation26_spill] sm:$0xff] %v6846_v0  ;;  %v5574_v15 = vld [vmem:[#allocation3 + $0x24] sm:$0xf]  ;;  %v6860_v17 = vor.u32 %v5575_v14, %v4678_v13  ;;  %v4942_v19 = vld [vmem:[%s6703_s15 + $0x1b0] sm:$0xf] }
  0xa8   : > { %981 = vmatpush.bf16.xpose.msra.mxu0 %v4751_v41  ;;  %v5630_v41 = vld [vmem:[%s6703_s15 + $0x164] sm:$0xf]  ;;  %v4944_v23 = vld [vmem:[%s6703_s15 + $0x1b8] sm:$0xf0]  ;;  %v5624_v28 = vld [vmem:[%s6703_s15 + $0x134] sm:$0xf] }
  0xa9   : > { %1030 = vmatpush.bf16.xpose.msra.mxu1 %v4755_v42  ;;  %1079 = vmatpush.bf16.xpose.msra.mxu2 %v4815_v43  ;;  %v4904_v42 = vld [vmem:[%s6703_s15 + $0x168] sm:$0xf0]  ;;  %v4967_v43 = vor.u32 %v5647_v35, %v4966_v34  ;;  %10305 = vst [vmem:[#allocation27_spill] sm:$0xff] %v6860_v17  ;;  %v4880_v29 = vld [vmem:[%s6703_s15 + $0x138] sm:$0xf0] }
  0xaa   : > { %1128 = vmatpush.bf16.xpose.msra.mxu3 %v4819_v44  ;;  %v4971_v44 = vor.u32 %v5646_v36, %v4968_v38  ;;  %v4907_v46 = vor.u32 %v5630_v41, %v4904_v42  ;;  %v4686_v31 = vld [vmem:[#allocation3 + $0x30] sm:$0xf]  ;;  %v5577_v32 = vld [vmem:[#allocation3 + $0x34] sm:$0xf0]  ;;  %v5576_v34 = vld [vmem:[#allocation3 + $0x34] sm:$0xf] }
  0xab   : > { %v4688_v35 = vld [vmem:[#allocation3 + $0x38] sm:$0xf0]  ;;  %v6876_v36 = vor.u32 %v5577_v32, %v4686_v31  ;;  %v4934_v39 = vld [vmem:[%s6703_s15 + $0x1a0] sm:$0xf]  ;;  %v5639_v40 = vld [vmem:[%s6703_s15 + $0x1a4] sm:$0xf0] }
  0xac   : > { %v6878_v38 = vor.u32 %v5576_v34, %v4688_v35  ;;  %v5638_v41 = vld [vmem:[%s6703_s15 + $0x1a4] sm:$0xf]  ;;  %v4935_v42 = vor.u32 %v5639_v40, %v4934_v39  ;;  %v4694_v51 = vld [vmem:[#allocation3 + $0x40] sm:$0xf]  ;;  %v5637_v58 = vld [vmem:[%s6703_s15 + $0x194] sm:$0xf0] }
  0xad   : > { %10307 = vst [vmem:[#allocation29_spill] sm:$0xff] %v6876_v36  ;;  %v5579_v52 = vld [vmem:[#allocation3 + $0x44] sm:$0xf0]  ;;  %v5636_v59 = vld [vmem:[%s6703_s15 + $0x194] sm:$0xf] }
  0xae   : > { %10308 = vst [vmem:[#allocation30_spill] sm:$0xff] %v6878_v38  ;;  %v4928_v61 = vld [vmem:[%s6703_s15 + $0x198] sm:$0xf0]  ;;  %v4862_v62 = vld [vmem:[%s6703_s15 + $0x110] sm:$0xf] }
  0xaf   : > { %v4702_v7 = vld [vmem:[#allocation3 + $0x50] sm:$0xf]  ;;  %v4704_v10 = vld [vmem:[#allocation3 + $0x58] sm:$0xf0]  ;;  %v4918_v13 = vld [vmem:[%s6703_s15 + $0x180] sm:$0xf] }
  0xb0   : > { %982 = vmatpush.bf16.xpose.msra.mxu0 %v4743_v53  ;;  %v5628_v53 = vld [vmem:[%s6703_s15 + $0x154] sm:$0xf]  ;;  %v5635_v14 = vld [vmem:[%s6703_s15 + $0x184] sm:$0xf0]  ;;  %v4718_v34 = vld [vmem:[#allocation3 + $0x70] sm:$0xf] }
  0xb1   : > { %1031 = vmatpush.bf16.xpose.msra.mxu1 %v4747_v54  ;;  %1080 = vmatpush.bf16.xpose.msra.mxu2 %v4807_v55  ;;  %v4896_v54 = vld [vmem:[%s6703_s15 + $0x158] sm:$0xf0]  ;;  %v4959_v55 = vor.u32 %v5645_v48, %v4958_v47  ;;  %v5622_v48 = vld [vmem:[%s6703_s15 + $0x124] sm:$0xf]  ;;  %v5585_v35 = vld [vmem:[#allocation3 + $0x74] sm:$0xf0] }
  0xb2   : > { %1129 = vmatpush.bf16.xpose.msra.mxu3 %v4811_v56  ;;  %v4963_v56 = vor.u32 %v5644_v49, %v4960_v50  ;;  %v4899_v60 = vor.u32 %v5628_v53, %v4896_v54  ;;  %v4872_v49 = vld [vmem:[%s6703_s15 + $0x128] sm:$0xf0]  ;;  %v5578_v53 = vld [vmem:[#allocation3 + $0x44] sm:$0xf]  ;;  %v5584_v39 = vld [vmem:[#allocation3 + $0x74] sm:$0xf] }
  0xb3   : > { %v4875_v50 = vor.u32 %v5622_v48, %v4872_v49  ;;  %v4696_v54 = vld [vmem:[#allocation3 + $0x48] sm:$0xf0]  ;;  %v4720_v40 = vld [vmem:[#allocation3 + $0x78] sm:$0xf0] }
  0xb4   : > { %v5104_v49 = vld [vmem:[%s6709_s11 + $0xf8] sm:$0xf0] }
  0xb8   : > { %983 = vmatpush.bf16.xpose.msra.mxu0 %v4735_v1  ;;  %v4950_v1 = vld [vmem:[%s6703_s15 + $0x1c0] sm:$0xf] }
  0xb9   : > { %1032 = vmatpush.bf16.xpose.msra.mxu1 %v4739_v2  ;;  %1081 = vmatpush.bf16.xpose.msra.mxu2 %v4799_v3  ;;  %v5643_v2 = vld [vmem:[%s6703_s15 + $0x1c4] sm:$0xf0]  ;;  %v5642_v3 = vld [vmem:[%s6703_s15 + $0x1c4] sm:$0xf] }
  0xba   : > { %1130 = vmatpush.bf16.xpose.msra.mxu3 %v4803_v4  ;;  %v4951_v4 = vor.u32 %v5643_v2, %v4950_v1  ;;  %v4955_v8 = vor.u32 %v5642_v3, %v4952_v5  ;;  %v5621_v1 = vld [vmem:[%s6703_s15 + $0x114] sm:$0xf0]  ;;  %v4931_v2 = vor.u32 %v5636_v59, %v4928_v61  ;;  %v4864_v5 = vld [vmem:[%s6703_s15 + $0x118] sm:$0xf0] }
  0xbb   : > { %v4863_v3 = vor.u32 %v5621_v1, %v4862_v62 }
  0xc0   : > { %984 = vmatpush.bf16.xpose.msra.mxu0 %v4727_v16  ;;  %v4680_v16 = vld [vmem:[#allocation3 + $0x28] sm:$0xf0] }
  0xc1   : > { %1033 = vmatpush.bf16.xpose.msra.mxu1 %v4731_v20  ;;  %1082 = vmatpush.bf16.xpose.msra.mxu2 %v4791_v21  ;;  %v6862_v18 = vor.u32 %v5574_v15, %v4680_v16  ;;  %v5641_v20 = vld [vmem:[%s6703_s15 + $0x1b4] sm:$0xf0]  ;;  %v5640_v21 = vld [vmem:[%s6703_s15 + $0x1b4] sm:$0xf]  ;;  %v5634_v15 = vld [vmem:[%s6703_s15 + $0x184] sm:$0xf]  ;;  %v4919_v16 = vor.u32 %v5635_v14, %v4918_v13 }
  0xc2   : > { %1131 = vmatpush.bf16.xpose.msra.mxu3 %v4795_v24  ;;  %v4943_v22 = vor.u32 %v5641_v20, %v4942_v19  ;;  %v4878_v24 = vld [vmem:[%s6703_s15 + $0x130] sm:$0xf]  ;;  %v4920_v19 = vld [vmem:[%s6703_s15 + $0x188] sm:$0xf0]  ;;  %v4854_v20 = vld [vmem:[%s6703_s15 + $0x100] sm:$0xf] }
  0xc3   : > { %10306 = vst [vmem:[#allocation28_spill] sm:$0xff] %v6862_v18  ;;  %v5679_v13 = vld [vmem:[%s6709_s11 + $0xe4] sm:$0xf0] }
  0xc7   : > { %985 = vmatmul.bf16.vlgmr.msra.gmra.mxu0 %v6820_v33 }
  0xc8   : > { %1173 = vmatpush.bf16.xpose.msrb.mxu0 %v4911_v27  ;;  %1034 = vmatmul.bf16.vlgmr.msra.gmra.mxu1 %v6825_v37 }
  0xc9   : > { %1271 = vmatpush.bf16.xpose.msrb.mxu2 %v4975_v25  ;;  %1222 = vmatpush.bf16.xpose.msrb.mxu1 %v4915_v30  ;;  %v5625_v25 = vld [vmem:[%s6703_s15 + $0x134] sm:$0xf0]  ;;  %v4883_v30 = vor.u32 %v5624_v28, %v4880_v29  ;;  %v5583_v28 = vld [vmem:[#allocation3 + $0x64] sm:$0xf0]  ;;  %v5582_v29 = vld [vmem:[#allocation3 + $0x64] sm:$0xf] }
  0xca   : > { %1320 = vmatpush.bf16.xpose.msrb.mxu3 %v4979_v26  ;;  %1083 = vmatmul.bf16.vlgmr.msra.gmra.mxu2 %v6820_v33  ;;  %v4947_v26 = vor.u32 %v5640_v21, %v4944_v23  ;;  %v4879_v27 = vor.u32 %v5625_v25, %v4878_v24  ;;  %v5619_v21 = vld [vmem:[%s6703_s15 + $0x104] sm:$0xf0]  ;;  %v5618_v24 = vld [vmem:[%s6703_s15 + $0x104] sm:$0xf]  ;;  %v4856_v25 = vld [vmem:[%s6703_s15 + $0x108] sm:$0xf0] }
  0xcb   : > { %1132 = vmatmul.bf16.vlgmr.msra.gmra.mxu3 %v6825_v37  ;;  %v4855_v23 = vor.u32 %v5619_v21, %v4854_v20  ;;  %v5030_v20 = vld [vmem:[%s6709_s11 + $0x60] sm:$0xf] }
  0xd0   : > { %1174 = vmatpush.bf16.xpose.msrb.mxu0 %v4903_v45  ;;  %v5623_v45 = vld [vmem:[%s6703_s15 + $0x124] sm:$0xf0] }
  0xd1   : > { %1272 = vmatpush.bf16.xpose.msrb.mxu2 %v4967_v43  ;;  %1223 = vmatpush.bf16.xpose.msrb.mxu1 %v4907_v46  ;;  %v4936_v43 = vld [vmem:[%s6703_s15 + $0x1a8] sm:$0xf0] }
  0xd2   : > { %1321 = vmatpush.bf16.xpose.msrb.mxu3 %v4971_v44  ;;  %v4870_v44 = vld [vmem:[%s6703_s15 + $0x120] sm:$0xf]  ;;  %v4939_v46 = vor.u32 %v5638_v41, %v4936_v43  ;;  %v6932_v41 = vor.u32 %v5585_v35, %v4718_v34 }
  0xd3   : > { %v4871_v47 = vor.u32 %v5623_v45, %v4870_v44  ;;  %v5102_v44 = vld [vmem:[%s6709_s11 + $0xf0] sm:$0xf]  ;;  %v5681_v45 = vld [vmem:[%s6709_s11 + $0xf4] sm:$0xf0] }
  0xd4   : > { %10315 = vst [vmem:[#allocation37_spill] sm:$0xff] %v6932_v41  ;;  %v5103_v48 = vor.u32 %v5681_v45, %v5102_v44 }
  0xd7   : > { %990 = vmatmul.bf16.gmra.mxu0 %v6844_v63 }
  0xd8   : > { %1175 = vmatpush.bf16.xpose.msrb.mxu0 %v4895_v57  ;;  %1039 = vmatmul.bf16.gmra.mxu1 %v6846_v0  ;;  %v4926_v57 = vld [vmem:[%s6703_s15 + $0x190] sm:$0xf] }
  0xd9   : > { %1273 = vmatpush.bf16.xpose.msrb.mxu2 %v4959_v55  ;;  %1224 = vmatpush.bf16.xpose.msrb.mxu1 %v4899_v60  ;;  %v6892_v55 = vor.u32 %v5579_v52, %v4694_v51  ;;  %v4927_v60 = vor.u32 %v5637_v58, %v4926_v57  ;;  %v5664_v57 = vld [vmem:[%s6709_s11 + $0x74] sm:$0xf] }
  0xda   : > { %1322 = vmatpush.bf16.xpose.msrb.mxu3 %v4963_v56  ;;  %1088 = vmatmul.bf16.gmra.mxu2 %v6844_v63  ;;  %v6894_v56 = vor.u32 %v5578_v53, %v4696_v54  ;;  %v5038_v53 = vld [vmem:[%s6709_s11 + $0x70] sm:$0xf]  ;;  %v5665_v54 = vld [vmem:[%s6709_s11 + $0x74] sm:$0xf0] }
  0xdb   : > { %1137 = vmatmul.bf16.gmra.mxu3 %v6846_v0  ;;  %10309 = vst [vmem:[#allocation31_spill] sm:$0xff] %v6892_v55  ;;  %v5039_v59 = vor.u32 %v5665_v54, %v5038_v53  ;;  %v5088_v53 = vld [vmem:[%s6709_s11 + $0xd8] sm:$0xf0] }
  0xdc   : > { %10310 = vst [vmem:[#allocation32_spill] sm:$0xff] %v6894_v56 }
  0xe0   : > { %1176 = vmatpush.bf16.xpose.msrb.mxu0 %v4887_v9  ;;  %v5580_v9 = vld [vmem:[#allocation3 + $0x54] sm:$0xf] }
  0xe1   : > { %1274 = vmatpush.bf16.xpose.msrb.mxu2 %v4951_v4  ;;  %1225 = vmatpush.bf16.xpose.msrb.mxu1 %v4891_v12  ;;  %v5620_v4 = vld [vmem:[%s6703_s15 + $0x114] sm:$0xf]  ;;  %v6910_v12 = vor.u32 %v5580_v9, %v4704_v10  ;;  %v5094_v10 = vld [vmem:[%s6709_s11 + $0xe0] sm:$0xf] }
  0xe2   : > { %1323 = vmatpush.bf16.xpose.msrb.mxu3 %v4955_v8  ;;  %v4867_v6 = vor.u32 %v5620_v4, %v4864_v5  ;;  %v5581_v8 = vld [vmem:[#allocation3 + $0x54] sm:$0xf0]  ;;  %v5095_v14 = vor.u32 %v5679_v13, %v5094_v10  ;;  %v5024_v10 = vld [vmem:[%s6709_s11 + $0x58] sm:$0xf0] }
  0xe3   : > { %v6908_v11 = vor.u32 %v5581_v8, %v4702_v7  ;;  %10312 = vst [vmem:[#allocation34_spill] sm:$0xff] %v6910_v12 }
  0xe5   : > { %10311 = vst [vmem:[#allocation33_spill] sm:$0xff] %v6908_v11 }
  0xe7   : > { %995 = vmatmul.bf16.gmra.mxu0 %v6860_v17 }
  0xe8   : > { %1044 = vmatmul.bf16.gmra.mxu1 %v6862_v18  ;;  %1177 = vmatpush.bf16.xpose.msrb.mxu0 %v4879_v27  ;;  %v4710_v27 = vld [vmem:[#allocation3 + $0x60] sm:$0xf] }
  0xe9   : > { %1275 = vmatpush.bf16.xpose.msrb.mxu2 %v4943_v22  ;;  %1226 = vmatpush.bf16.xpose.msrb.mxu1 %v4883_v30  ;;  %v4923_v22 = vor.u32 %v5634_v15, %v4920_v19  ;;  %v4712_v30 = vld [vmem:[#allocation3 + $0x68] sm:$0xf0]  ;;  %v6924_v31 = vor.u32 %v5583_v28, %v4710_v27  ;;  %v5678_v15 = vld [vmem:[%s6709_s11 + $0xe4] sm:$0xf] }
  0xea   : > { %1093 = vmatmul.bf16.gmra.mxu2 %v6860_v17  ;;  %1324 = vmatpush.bf16.xpose.msrb.mxu3 %v4947_v26  ;;  %v4859_v26 = vor.u32 %v5618_v24, %v4856_v25  ;;  %v6926_v32 = vor.u32 %v5582_v29, %v4712_v30  ;;  %v5032_v27 = vld [vmem:[%s6709_s11 + $0x68] sm:$0xf0] }
  0xeb   : > { %1142 = vmatmul.bf16.gmra.mxu3 %v6862_v18  ;;  %10313 = vst [vmem:[#allocation35_spill] sm:$0xff] %v6924_v31 }
  0xec   : > { %10314 = vst [vmem:[#allocation36_spill] sm:$0xff] %v6926_v32 }
  0xf0   : > { %1178 = vmatpush.bf16.xpose.msrb.mxu0 %v4871_v47 }
  0xf1   : > { %1276 = vmatpush.bf16.xpose.msrb.mxu2 %v4935_v42  ;;  %1227 = vmatpush.bf16.xpose.msrb.mxu1 %v4875_v50  ;;  %v6934_v42 = vor.u32 %v5584_v39, %v4720_v40 }
  0xf2   : > { %1325 = vmatpush.bf16.xpose.msrb.mxu3 %v4939_v46  ;;  %v5680_v46 = vld [vmem:[%s6709_s11 + $0xf4] sm:$0xf] }
  0xf3   : > { %10316 = vst [vmem:[#allocation38_spill] sm:$0xff] %v6934_v42  ;;  %v5107_v51 = vor.u32 %v5680_v46, %v5104_v49 }
  0xf7   : > { %1000 = vmatmul.bf16.gmra.mxu0 %v6876_v36 }
  0xf8   : > { %1049 = vmatmul.bf16.gmra.mxu1 %v6878_v38  ;;  %1179 = vmatpush.bf16.xpose.msrb.mxu0 %v4863_v3 }
  0xf9   : > { %1277 = vmatpush.bf16.xpose.msrb.mxu2 %v4927_v60  ;;  %1228 = vmatpush.bf16.xpose.msrb.mxu1 %v4867_v6  ;;  %v5040_v60 = vld [vmem:[%s6709_s11 + $0x78] sm:$0xf0] }
  0xfa   : > { %1098 = vmatmul.bf16.gmra.mxu2 %v6876_v36  ;;  %1326 = vmatpush.bf16.xpose.msrb.mxu3 %v4931_v2  ;;  %v5043_v1 = vor.u32 %v5664_v57, %v5040_v60  ;;  %v5022_v60 = vld [vmem:[%s6709_s11 + $0x50] sm:$0xf] }
  0xfb   : > { %1147 = vmatmul.bf16.gmra.mxu3 %v6878_v38 }
 0x100   : > { %1180 = vmatpush.bf16.xpose.msrb.mxu0 %v4855_v23 }
 0x101   : > { %1278 = vmatpush.bf16.xpose.msrb.mxu2 %v4919_v16  ;;  %1229 = vmatpush.bf16.xpose.msrb.mxu1 %v4859_v26  ;;  %v5096_v16 = vld [vmem:[%s6709_s11 + $0xe8] sm:$0xf0]  ;;  %v5662_v26 = vld [vmem:[%s6709_s11 + $0x64] sm:$0xf] }
 0x102   : > { %1327 = vmatpush.bf16.xpose.msrb.mxu3 %v4923_v22  ;;  %v5663_v22 = vld [vmem:[%s6709_s11 + $0x64] sm:$0xf0]  ;;  %v5099_v24 = vor.u32 %v5678_v15, %v5096_v16  ;;  %v5035_v30 = vor.u32 %v5662_v26, %v5032_v27  ;;  %v5674_v26 = vld [vmem:[%s6709_s11 + $0xc4] sm:$0xf]  ;;  %v5080_v27 = vld [vmem:[%s6709_s11 + $0xc8] sm:$0xf0] }
 0x103   : > { %v5031_v29 = vor.u32 %v5663_v22, %v5030_v20  ;;  %v5675_v20 = vld [vmem:[%s6709_s11 + $0xc4] sm:$0xf0] }
 0x107   : > { %1005 = vmatmul.bf16.gmra.mxu0 %v6892_v55 }
 0x108   : > { %1054 = vmatmul.bf16.gmra.mxu1 %v6894_v56  ;;  %1753 = vmatpush.bf16.xpose.msra.mxu0 %v5039_v59 }
 0x109   : > { %1851 = vmatpush.bf16.xpose.msra.mxu2 %v5103_v48  ;;  %1802 = vmatpush.bf16.xpose.msra.mxu1 %v5043_v1 }
 0x10a   : > { %1103 = vmatmul.bf16.gmra.mxu2 %v6892_v55  ;;  %1900 = vmatpush.bf16.xpose.msra.mxu3 %v5107_v51  ;;  %v5677_v51 = vld [vmem:[%s6709_s11 + $0xd4] sm:$0xf0] }
 0x10b   : > { %1152 = vmatmul.bf16.gmra.mxu3 %v6894_v56 }
 0x110   : > { %1754 = vmatpush.bf16.xpose.msra.mxu0 %v5031_v29  ;;  %v5083_v29 = vor.u32 %v5674_v26, %v5080_v27 }
 0x111   : > { %1852 = vmatpush.bf16.xpose.msra.mxu2 %v5095_v14  ;;  %1803 = vmatpush.bf16.xpose.msra.mxu1 %v5035_v30 }
 0x112   : > { %1901 = vmatpush.bf16.xpose.msra.mxu3 %v5099_v24 }
 0x117   : > { %1010 = vmatmul.bf16.gmra.mxu0 %v6908_v11 }
 0x118   : > { %1059 = vmatmul.bf16.gmra.mxu1 %v6910_v12 }
 0x11a   : > { %1108 = vmatmul.bf16.gmra.mxu2 %v6908_v11 }
 0x11b   : > { %1157 = vmatmul.bf16.gmra.mxu3 %v6910_v12 }
 0x127   : > { %1015 = vmatmul.bf16.gmra.mxu0 %v6924_v31 }
 0x128   : > { %1064 = vmatmul.bf16.gmra.mxu1 %v6926_v32 }
 0x12a   : > { %1113 = vmatmul.bf16.gmra.mxu2 %v6924_v31 }
 0x12b   : > { %1162 = vmatmul.bf16.gmra.mxu3 %v6926_v32 }
 0x137   : > { %1020 = vmatmul.bf16.gmra.mxu0 %v6932_v41 }
 0x138   : > { %1069 = vmatmul.bf16.gmra.mxu1 %v6934_v42 }
 0x13a   : > { %1118 = vmatmul.bf16.gmra.mxu2 %v6932_v41 }
 0x13b   : > { %1167 = vmatmul.bf16.gmra.mxu3 %v6934_v42 }
 0x144   : > { %v986_v43 = vpop.f32.mrf.mxu0 }
 0x145   : > { %v1035_v47 = vpop.f32.mrf.mxu1 }
 0x146   : > { %v6944_v50 = vadd.f32 %v1035_v47, %v986_v43  ;;  %v5086_v47 = vld [vmem:[%s6709_s11 + $0xd0] sm:$0xf] }
 0x147   : > { %1181 = vmatmul.bf16.vlgmr.msrb.gmra.mxu0 %v6820_v33  ;;  %v5087_v57 = vor.u32 %v5677_v51, %v5086_v47  ;;  %v5658_v51 = vld [vmem:[%s6709_s11 + $0x44] sm:$0xf] }
 0x148   : > { %1230 = vmatmul.bf16.vlgmr.msrb.gmra.mxu1 %v6825_v37 }
 0x149   : > { %1853 = vmatpush.bf16.xpose.msra.mxu2 %v5087_v57 }
 0x14a   : > { %1279 = vmatmul.bf16.vlgmr.msrb.gmra.mxu2 %v6820_v33 }
 0x14b   : > { %1328 = vmatmul.bf16.vlgmr.msrb.gmra.mxu3 %v6825_v37 }
 0x14c   : > { %v988_v61 = vpop.f32.mrf.mxu0 }
 0x14d   : > { %v1084_v52 = vpop.f32.mrf.mxu2  ;;  %v1037_v2 = vpop.f32.mrf.mxu1 }
 0x14e   : > { %v1133_v58 = vpop.f32.mrf.mxu3  ;;  %v6956_v3 = vadd.f32 %v1037_v2, %v988_v61  ;;  %v5661_v61 = vld [vmem:[%s6709_s11 + $0x54] sm:$0xf0] }
 0x14f   : > { %v6954_v62 = vadd.f32 %v1133_v58, %v1084_v52  ;;  %v5676_v52 = vld [vmem:[%s6709_s11 + $0xd4] sm:$0xf]  ;;  %v5023_v2 = vor.u32 %v5661_v61, %v5022_v60  ;;  %v5070_v61 = vld [vmem:[%s6709_s11 + $0xb0] sm:$0xf] }
 0x150   : > { %v5091_v58 = vor.u32 %v5676_v52, %v5088_v53  ;;  %v5016_v52 = vld [vmem:[%s6709_s11 + $0x48] sm:$0xf0] }
 0x151   : > { %1755 = vmatpush.bf16.xpose.msra.mxu0 %v5023_v2 }
 0x152   : > { %1902 = vmatpush.bf16.xpose.msra.mxu3 %v5091_v58  ;;  %v5019_v58 = vor.u32 %v5658_v51, %v5016_v52  ;;  %v5062_v51 = vld [vmem:[%s6709_s11 + $0xa0] sm:$0xf]  ;;  %v5671_v52 = vld [vmem:[%s6709_s11 + $0xa4] sm:$0xf0] }
 0x154   : > { %v991_v6 = vpop.f32.mrf.mxu0 }
 0x155   : > { %v1086_v4 = vpop.f32.mrf.mxu2  ;;  %v1040_v8 = vpop.f32.mrf.mxu1 }
 0x156   : > { %v1135_v5 = vpop.f32.mrf.mxu3  ;;  %v6960_v9 = vadd.f32 %v1040_v8, %v991_v6  ;;  %v5660_v8 = vld [vmem:[%s6709_s11 + $0x54] sm:$0xf] }
 0x157   : > { %v6958_v7 = vadd.f32 %v1135_v5, %v1086_v4  ;;  %1186 = vmatmul.bf16.gmra.mxu0 %v6844_v63  ;;  %v5027_v14 = vor.u32 %v5660_v8, %v5024_v10  ;;  %v5072_v8 = vld [vmem:[%s6709_s11 + $0xb8] sm:$0xf0] }
 0x158   : > { %1235 = vmatmul.bf16.gmra.mxu1 %v6846_v0 }
 0x159   : > { %1804 = vmatpush.bf16.xpose.msra.mxu1 %v5027_v14 }
 0x15a   : > { %1284 = vmatmul.bf16.gmra.mxu2 %v6844_v63  ;;  %1903 = vmatpush.bf16.xpose.msra.mxu3 %v5083_v29 }
 0x15b   : > { %1333 = vmatmul.bf16.gmra.mxu3 %v6846_v0 }
 0x15c   : > { %v993_v23 = vpop.f32.mrf.mxu0 }
 0x15d   : > { %v1089_v19 = vpop.f32.mrf.mxu2  ;;  %v1042_v28 = vpop.f32.mrf.mxu1 }
 0x15e   : > { %v1138_v21 = vpop.f32.mrf.mxu3  ;;  %v6976_v34 = vadd.f32 %v1042_v28, %v993_v23 }
 0x15f   : > { %v6972_v25 = vadd.f32 %v1138_v21, %v1089_v19  ;;  %v5078_v19 = vld [vmem:[%s6709_s11 + $0xc0] sm:$0xf] }
 0x160   : > { %10317 = vst [vmem:[#allocation39_spill] sm:$0xff] %v6976_v34  ;;  %v5079_v22 = vor.u32 %v5675_v20, %v5078_v19 }
 0x161   : > { %1805 = vmatpush.bf16.xpose.msra.mxu1 %v5019_v58 }
 0x162   : > { %1854 = vmatpush.bf16.xpose.msra.mxu2 %v5079_v22  ;;  %v5006_v22 = vld [vmem:[%s6709_s11 + $0x30] sm:$0xf] }
 0x164   : > { %v996_v40 = vpop.f32.mrf.mxu0 }
 0x165   : > { %v1091_v35 = vpop.f32.mrf.mxu2  ;;  %v1045_v44 = vpop.f32.mrf.mxu1 }
 0x166   : > { %v1140_v39 = vpop.f32.mrf.mxu3  ;;  %v6981_v45 = vadd.f32 %v1045_v44, %v996_v40 }
 0x167   : > { %v6978_v43 = vadd.f32 %v1140_v39, %v1091_v35  ;;  %1191 = vmatmul.bf16.gmra.mxu0 %v6860_v17  ;;  %v5014_v35 = vld [vmem:[%s6709_s11 + $0x40] sm:$0xf]  ;;  %v5659_v39 = vld [vmem:[%s6709_s11 + $0x44] sm:$0xf0] }
 0x168   : > { %10319 = vst [vmem:[#allocation41_spill] sm:$0xff] %v6981_v45  ;;  %1240 = vmatmul.bf16.gmra.mxu1 %v6862_v18  ;;  %v5015_v44 = vor.u32 %v5659_v39, %v5014_v35 }
 0x169   : > { %10318 = vst [vmem:[#allocation40_spill] sm:$0xff] %v6978_v43 }
 0x16a   : > { %1289 = vmatmul.bf16.gmra.mxu2 %v6860_v17  ;;  %1756 = vmatpush.bf16.xpose.msra.mxu0 %v5015_v44 }
 0x16b   : > { %1338 = vmatmul.bf16.gmra.mxu3 %v6862_v18 }
 0x16c   : > { %v998_v49 = vpop.f32.mrf.mxu0 }
 0x16d   : > { %v1094_v46 = vpop.f32.mrf.mxu2  ;;  %v1047_v54 = vpop.f32.mrf.mxu1 }
 0x16e   : > { %v1143_v48 = vpop.f32.mrf.mxu3  ;;  %v6994_v4 = vadd.f32 %v1047_v54, %v998_v49 }
 0x16f   : > { %v6990_v59 = vadd.f32 %v1143_v48, %v1094_v46 }
 0x174   : > { %v1001_v6 = vpop.f32.mrf.mxu0 }
 0x175   : > { %v1096_v1 = vpop.f32.mrf.mxu2  ;;  %v1050_v13 = vpop.f32.mrf.mxu1 }
 0x176   : > { %v1145_v5 = vpop.f32.mrf.mxu3  ;;  %v7004_v16 = vadd.f32 %v1050_v13, %v1001_v6  ;;  %v5672_v6 = vld [vmem:[%s6709_s11 + $0xb4] sm:$0xf] }
 0x177   : > { %1196 = vmatmul.bf16.gmra.mxu0 %v6876_v36  ;;  %v7002_v15 = vadd.f32 %v1145_v5, %v1096_v1  ;;  %v5673_v1 = vld [vmem:[%s6709_s11 + $0xb4] sm:$0xf0]  ;;  %v5075_v20 = vor.u32 %v5672_v6, %v5072_v8 }
 0x178   : > { %1245 = vmatmul.bf16.gmra.mxu1 %v6878_v38  ;;  %v5071_v13 = vor.u32 %v5673_v1, %v5070_v61  ;;  %v5063_v61 = vor.u32 %v5671_v52, %v5062_v51 }
 0x179   : > { %1904 = vmatpush.bf16.xpose.msra.mxu3 %v5075_v20 }
 0x17a   : > { %1294 = vmatmul.bf16.gmra.mxu2 %v6876_v36 }
 0x17b   : > { %1343 = vmatmul.bf16.gmra.mxu3 %v6878_v38  ;;  %1855 = vmatpush.bf16.xpose.msra.mxu2 %v5071_v13  ;;  %v4998_v13 = vld [vmem:[%s6709_s11 + $0x20] sm:$0xf] }
 0x17c   : > { %v1003_v24 = vpop.f32.mrf.mxu0 }
 0x17d   : > { %v1099_v21 = vpop.f32.mrf.mxu2  ;;  %v1052_v28 = vpop.f32.mrf.mxu1 }
 0x17e   : > { %v1148_v23 = vpop.f32.mrf.mxu3  ;;  %v7014_v40 = vadd.f32 %v1052_v28, %v1003_v24  ;;  %v5656_v24 = vld [vmem:[%s6709_s11 + $0x34] sm:$0xf]  ;;  %v5008_v28 = vld [vmem:[%s6709_s11 + $0x38] sm:$0xf0] }
 0x17f   : > { %v7010_v30 = vadd.f32 %v1148_v23, %v1099_v21  ;;  %v5657_v23 = vld [vmem:[%s6709_s11 + $0x34] sm:$0xf0]  ;;  %v5011_v29 = vor.u32 %v5656_v24, %v5008_v28  ;;  %v5654_v24 = vld [vmem:[%s6709_s11 + $0x24] sm:$0xf] }
 0x180   : > { %v5007_v27 = vor.u32 %v5657_v23, %v5006_v22 }
 0x181   : > { %1806 = vmatpush.bf16.xpose.msra.mxu1 %v5011_v29 }
 0x182   : > { %1757 = vmatpush.bf16.xpose.msra.mxu0 %v5007_v27  ;;  %v5000_v27 = vld [vmem:[%s6709_s11 + $0x28] sm:$0xf0] }
 0x183   : > { %1856 = vmatpush.bf16.xpose.msra.mxu2 %v5063_v61  ;;  %v5003_v29 = vor.u32 %v5654_v24, %v5000_v27  ;;  %v5669_v61 = vld [vmem:[%s6709_s11 + $0x94] sm:$0xf0] }
 0x184   : > { %v1006_v48 = vpop.f32.mrf.mxu0 }
 0x185   : > { %v1101_v46 = vpop.f32.mrf.mxu2  ;;  %v1055_v49 = vpop.f32.mrf.mxu1 }
 0x186   : > { %v1150_v47 = vpop.f32.mrf.mxu3  ;;  %v7030_v5 = vadd.f32 %v1055_v49, %v1006_v48 }
 0x187   : > { %1201 = vmatmul.bf16.gmra.mxu0 %v6892_v55  ;;  %v7028_v2 = vadd.f32 %v1150_v47, %v1101_v46 }
 0x188   : > { %1250 = vmatmul.bf16.gmra.mxu1 %v6894_v56  ;;  %10320 = vst [vmem:[#allocation42_spill] sm:$0xff] %v7030_v5 }
 0x189   : > { %1807 = vmatpush.bf16.xpose.msra.mxu1 %v5003_v29 }
 0x18a   : > { %1299 = vmatmul.bf16.gmra.mxu2 %v6892_v55 }
 0x18b   : > { %1348 = vmatmul.bf16.gmra.mxu3 %v6894_v56 }
 0x18c   : > { %v7022_v57 = vpop.f32.mrf.mxu0 }
 0x18d   : > { %v1104_v53 = vpop.f32.mrf.mxu2  ;;  %v7024_v60 = vpop.f32.mrf.mxu1 }
 0x18e   : > { %v1153_v54 = vpop.f32.mrf.mxu3 }
 0x18f   : > { %v7037_v26 = vadd.f32 %v1153_v54, %v1104_v53  ;;  %v5670_v53 = vld [vmem:[%s6709_s11 + $0xa4] sm:$0xf]  ;;  %v5064_v54 = vld [vmem:[%s6709_s11 + $0xa8] sm:$0xf0] }
 0x190   : > { %v5067_v1 = vor.u32 %v5670_v53, %v5064_v54  ;;  %v5054_v54 = vld [vmem:[%s6709_s11 + $0x90] sm:$0xf] }
 0x191   : > { %10321 = vst [vmem:[#allocation43_spill] sm:$0xff] %v7037_v26  ;;  %v5055_v24 = vor.u32 %v5669_v61, %v5054_v54  ;;  %v5046_v61 = vld [vmem:[%s6709_s11 + $0x80] sm:$0xf] }
 0x192   : > { %1905 = vmatpush.bf16.xpose.msra.mxu3 %v5067_v1  ;;  %v5668_v1 = vld [vmem:[%s6709_s11 + $0x94] sm:$0xf] }
 0x193   : > { %1857 = vmatpush.bf16.xpose.msra.mxu2 %v5055_v24 }
 0x194   : > { %v1011_v19 = vpop.f32.mrf.mxu0 }
 0x195   : > { %v1106_v10 = vpop.f32.mrf.mxu2  ;;  %v1060_v21 = vpop.f32.mrf.mxu1 }
 0x196   : > { %v1155_v14 = vpop.f32.mrf.mxu3  ;;  %v7048_v47 = vadd.f32 %v1060_v21, %v1011_v19 }
 0x197   : > { %1206 = vmatmul.bf16.gmra.mxu0 %v6908_v11  ;;  %v7044_v35 = vadd.f32 %v1155_v14, %v1106_v10  ;;  %v5655_v14 = vld [vmem:[%s6709_s11 + $0x24] sm:$0xf0] }
 0x198   : > { %1255 = vmatmul.bf16.gmra.mxu1 %v6910_v12  ;;  %10324 = vst [vmem:[#allocation46_spill] sm:$0xff] %v7048_v47  ;;  %v4999_v23 = vor.u32 %v5655_v14, %v4998_v13  ;;  %v5056_v13 = vld [vmem:[%s6709_s11 + $0x98] sm:$0xf0]  ;;  %v4990_v14 = vld [vmem:[%s6709_s11 + $0x10] sm:$0xf] }
 0x199   : > { %10322 = vst [vmem:[#allocation44_spill] sm:$0xff] %v7044_v35 }
 0x19a   : > { %1304 = vmatmul.bf16.gmra.mxu2 %v6908_v11  ;;  %1758 = vmatpush.bf16.xpose.msra.mxu0 %v4999_v23  ;;  %v5653_v23 = vld [vmem:[%s6709_s11 + $0x14] sm:$0xf0] }
 0x19b   : > { %1353 = vmatmul.bf16.gmra.mxu3 %v6910_v12 }
 0x19c   : > { %v7046_v46 = vpop.f32.mrf.mxu0 }
 0x19d   : > { %v1109_v39 = vpop.f32.mrf.mxu2  ;;  %10323 = vst [vmem:[#allocation45_spill] sm:$0xff] %v7046_v46  ;;  %v7052_v49 = vpop.f32.mrf.mxu1 }
 0x19e   : > { %v1158_v44 = vpop.f32.mrf.mxu3  ;;  %10326 = vst [vmem:[#allocation48_spill] sm:$0xff] %v7052_v49  ;;  %v5667_v49 = vld [vmem:[%s6709_s11 + $0x84] sm:$0xf0] }
 0x19f   : > { %v7050_v48 = vadd.f32 %v1158_v44, %v1109_v39 }
 0x1a1   : > { %10325 = vst [vmem:[#allocation47_spill] sm:$0xff] %v7050_v48 }
 0x1a4   : > { %v1016_v8 = vpop.f32.mrf.mxu0 }
 0x1a5   : > { %v1111_v58 = vpop.f32.mrf.mxu2  ;;  %v1065_v10 = vpop.f32.mrf.mxu1 }
 0x1a6   : > { %v1160_v6 = vpop.f32.mrf.mxu3  ;;  %v7072_v53 = vadd.f32 %v1065_v10, %v1016_v8  ;;  %v5059_v10 = vor.u32 %v5668_v1, %v5056_v13 }
 0x1a7   : > { %1211 = vmatmul.bf16.gmra.mxu0 %v6924_v31  ;;  %v7070_v52 = vadd.f32 %v1160_v6, %v1111_v58  ;;  %v5652_v58 = vld [vmem:[%s6709_s11 + $0x14] sm:$0xf]  ;;  %v4992_v6 = vld [vmem:[%s6709_s11 + $0x18] sm:$0xf0] }
 0x1a8   : > { %1260 = vmatmul.bf16.gmra.mxu1 %v6926_v32  ;;  %10330 = vst [vmem:[#allocation52_spill] sm:$0xff] %v7072_v53  ;;  %1906 = vmatpush.bf16.xpose.msra.mxu3 %v5059_v10  ;;  %v5048_v10 = vld [vmem:[%s6709_s11 + $0x88] sm:$0xf0] }
 0x1a9   : > { %10329 = vst [vmem:[#allocation51_spill] sm:$0xff] %v7070_v52  ;;  %v4995_v52 = vor.u32 %v5652_v58, %v4992_v6  ;;  %v4982_v58 = vld [vmem:[%s6709_s11] sm:$0xf]  ;;  %v5651_v6 = vld [vmem:[%s6709_s11 + $0x4] sm:$0xf0] }
 0x1aa   : > { %1309 = vmatmul.bf16.gmra.mxu2 %v6924_v31 }
 0x1ab   : > { %1358 = vmatmul.bf16.gmra.mxu3 %v6926_v32  ;;  %1808 = vmatpush.bf16.xpose.msra.mxu1 %v4995_v52 }
 0x1ac   : > { %v7064_v21 = vpop.f32.mrf.mxu0 }
 0x1ad   : > { %v1114_v19 = vpop.f32.mrf.mxu2  ;;  %10327 = vst [vmem:[#allocation49_spill] sm:$0xff] %v7064_v21  ;;  %v7066_v22 = vpop.f32.mrf.mxu1  ;;  %v4991_v21 = vor.u32 %v5653_v23, %v4990_v14  ;;  %v5666_v23 = vld [vmem:[%s6709_s11 + $0x84] sm:$0xf] }
 0x1ae   : > { %v1163_v20 = vpop.f32.mrf.mxu3  ;;  %10328 = vst [vmem:[#allocation50_spill] sm:$0xff] %v7066_v22 }
 0x1af   : > { %v7086_v27 = vadd.f32 %v1163_v20, %v1114_v19  ;;  %1759 = vmatpush.bf16.xpose.msra.mxu0 %v4991_v21  ;;  %v5047_v20 = vor.u32 %v5667_v49, %v5046_v61 }
 0x1b1   : > { %10331 = vst [vmem:[#allocation53_spill] sm:$0xff] %v7086_v27  ;;  %1858 = vmatpush.bf16.xpose.msra.mxu2 %v5047_v20 }
 0x1b4   : > { %v1021_v44 = vpop.f32.mrf.mxu0 }
 0x1b5   : > { %v1116_v28 = vpop.f32.mrf.mxu2  ;;  %v1070_v51 = vpop.f32.mrf.mxu1 }
 0x1b6   : > { %v1165_v39 = vpop.f32.mrf.mxu3  ;;  %v7096_v1 = vadd.f32 %v1070_v51, %v1021_v44 }
 0x1b7   : > { %1216 = vmatmul.bf16.gmra.mxu0 %v6932_v41  ;;  %v7092_v54 = vadd.f32 %v1165_v39, %v1116_v28  ;;  %v5051_v28 = vor.u32 %v5666_v23, %v5048_v10  ;;  %v5650_v23 = vld [vmem:[%s6709_s11 + $0x4] sm:$0xf]  ;;  %v4984_v10 = vld [vmem:[%s6709_s11 + $0x8] sm:$0xf0] }
 0x1b8   : > { %1265 = vmatmul.bf16.gmra.mxu1 %v6934_v42  ;;  %10335 = vst [vmem:[#allocation57_spill] sm:$0xff] %v7096_v1 }
 0x1b9   : > { %10334 = vst [vmem:[#allocation56_spill] sm:$0xff] %v7092_v54  ;;  %1907 = vmatpush.bf16.xpose.msra.mxu3 %v5051_v28 }
 0x1ba   : > { %1314 = vmatmul.bf16.gmra.mxu2 %v6932_v41 }
 0x1bb   : > { %1363 = vmatmul.bf16.gmra.mxu3 %v6934_v42 }
 0x1bc   : > { %v7088_v22 = vpop.f32.mrf.mxu0 }
 0x1bd   : > { %v1119_v8 = vpop.f32.mrf.mxu2  ;;  %10332 = vst [vmem:[#allocation54_spill] sm:$0xff] %v7088_v22  ;;  %v7090_v53 = vpop.f32.mrf.mxu1 }
 0x1be   : > { %v1168_v29 = vpop.f32.mrf.mxu3  ;;  %10333 = vst [vmem:[#allocation55_spill] sm:$0xff] %v7090_v53  ;;  %v4983_v53 = vor.u32 %v5651_v6, %v4982_v58 }
 0x1bf   : > { %v7110_v28 = vadd.f32 %v1168_v29, %v1119_v8  ;;  %v5230_v29 = vld [vmem:[%s6709_s11 + $0x1f0] sm:$0xf] }
 0x1c0   : > { %1760 = vmatpush.bf16.xpose.msra.mxu0 %v4983_v53  ;;  %v5713_v53 = vld [vmem:[%s6709_s11 + $0x1f4] sm:$0xf0] }
 0x1c1   : > { %10338 = vst [vmem:[#allocation60_spill] sm:$0xff] %v7110_v28  ;;  %v5231_v6 = vor.u32 %v5713_v53, %v5230_v29  ;;  %v5693_v28 = vld [vmem:[%s6709_s11 + $0x154] sm:$0xf0] }
 0x1c3   : > { %2047 = vmatpush.bf16.xpose.msrb.mxu2 %v5231_v6 }
 0x1c4   : > { %v1182_v24 = vpop.f32.mrf.mxu0 }
 0x1c5   : > { %v1121_v19 = vpop.f32.mrf.mxu2  ;;  %v1231_v14 = vpop.f32.mrf.mxu1 }
 0x1c6   : > { %v1170_v13 = vpop.f32.mrf.mxu3  ;;  %v7115_v54 = vadd.f32 %v1231_v14, %v1182_v24  ;;  %v5232_v24 = vld [vmem:[%s6709_s11 + $0x1f8] sm:$0xf0]  ;;  %v5166_v14 = vld [vmem:[%s6709_s11 + $0x170] sm:$0xf] }
 0x1c7   : > { %1761 = vmatmul.bf16.vlgmr.msra.gmra.mxu0 %v6820_v33 }
 0x1c8   : > { %10340 = vst [vmem:[#allocation62_spill] sm:$0xff] %v7115_v54 }
 0x1ca   : > { %1859 = vmatmul.bf16.vlgmr.msra.gmra.mxu2 %v6820_v33 }
 0x1cb   : > { %1908 = vmatmul.bf16.vlgmr.msra.gmra.mxu3 %v6825_v37 }
 0x1cc   : > { %v7100_v52 = vpop.f32.mrf.mxu0 }
 0x1cd   : > { %v1280_v39 = vpop.f32.mrf.mxu2  ;;  %10336 = vst [vmem:[#allocation58_spill] sm:$0xff] %v7100_v52  ;;  %v7103_v44 = vpop.f32.mrf.mxu1  ;;  %v4987_v52 = vor.u32 %v5650_v23, %v4984_v10  ;;  %v5712_v23 = vld [vmem:[%s6709_s11 + $0x1f4] sm:$0xf] }
 0x1ce   : > { %v1329_v21 = vpop.f32.mrf.mxu3  ;;  %10337 = vst [vmem:[#allocation59_spill] sm:$0xff] %v7103_v44  ;;  %v7112_v44 = vadd.f32 %v1170_v13, %v1121_v19 }
 0x1cf   : > { %1809 = vmatpush.bf16.xpose.msra.mxu1 %v4987_v52  ;;  %v7117_v27 = vadd.f32 %v1329_v21, %v1280_v39  ;;  %v5235_v39 = vor.u32 %v5712_v23, %v5232_v24  ;;  %v5697_v21 = vld [vmem:[%s6709_s11 + $0x174] sm:$0xf0] }
 0x1d0   : > { %10339 = vst [vmem:[#allocation61_spill] sm:$0xff] %v7112_v44 }
 0x1d1   : > { %10341 = vst [vmem:[#allocation63_spill] sm:$0xff] %v7117_v27  ;;  %2096 = vmatpush.bf16.xpose.msrb.mxu3 %v5235_v39  ;;  %v5709_v27 = vld [vmem:[%s6709_s11 + $0x1d4] sm:$0xf0] }
 0x1d4   : > { %v1187_v61 = vpop.f32.mrf.mxu0 }
 0x1d5   : > { %v1282_v49 = vpop.f32.mrf.mxu2  ;;  %v1236_v20 = vpop.f32.mrf.mxu1 }
 0x1d6   : > { %v1331_v51 = vpop.f32.mrf.mxu3  ;;  %v7123_v52 = vadd.f32 %v1236_v20, %v1187_v61  ;;  %1810 = vmatmul.bf16.vlgmr.msra.gmra.mxu1 %v6825_v37  ;;  %v5168_v61 = vld [vmem:[%s6709_s11 + $0x178] sm:$0xf0] }
 0x1d7   : > { %v7119_v8 = vadd.f32 %v1331_v51, %v1282_v49  ;;  %v5696_v49 = vld [vmem:[%s6709_s11 + $0x174] sm:$0xf]  ;;  %v5167_v51 = vor.u32 %v5697_v21, %v5166_v14  ;;  %1766 = vmatmul.bf16.gmra.mxu0 %v6844_v63 }
 0x1d8   : > { %10343 = vst [vmem:[#allocation65_spill] sm:$0xff] %v7123_v52 }
 0x1d9   : > { %10342 = vst [vmem:[#allocation64_spill] sm:$0xff] %v7119_v8  ;;  %1949 = vmatpush.bf16.xpose.msrb.mxu0 %v5167_v51  ;;  %v5711_v51 = vld [vmem:[%s6709_s11 + $0x1e4] sm:$0xf0] }
 0x1da   : > { %1864 = vmatmul.bf16.gmra.mxu2 %v6844_v63 }
 0x1db   : > { %1913 = vmatmul.bf16.gmra.mxu3 %v6846_v0 }
 0x1dc   : > { %v7127_v13 = vpop.f32.mrf.mxu0 }
 0x1dd   : > { %v1285_v22 = vpop.f32.mrf.mxu2  ;;  %10345 = vst [vmem:[#allocation67_spill] sm:$0xff] %v7127_v13  ;;  %v7129_v58 = vpop.f32.mrf.mxu1  ;;  %v5694_v13 = vld [vmem:[%s6709_s11 + $0x164] sm:$0xf] }
 0x1de   : > { %v1334_v1 = vpop.f32.mrf.mxu3  ;;  %10346 = vst [vmem:[#allocation68_spill] sm:$0xff] %v7129_v58  ;;  %v5695_v58 = vld [vmem:[%s6709_s11 + $0x164] sm:$0xf0] }
 0x1df   : > { %v7125_v19 = vadd.f32 %v1334_v1, %v1285_v22  ;;  %v5171_v22 = vor.u32 %v5696_v49, %v5168_v61  ;;  %v5222_v49 = vld [vmem:[%s6709_s11 + $0x1e0] sm:$0xf]  ;;  %v5710_v61 = vld [vmem:[%s6709_s11 + $0x1e4] sm:$0xf] }
 0x1e1   : > { %10344 = vst [vmem:[#allocation66_spill] sm:$0xff] %v7125_v19  ;;  %1998 = vmatpush.bf16.xpose.msrb.mxu1 %v5171_v22  ;;  %v5224_v22 = vld [vmem:[%s6709_s11 + $0x1e8] sm:$0xf0] }
 0x1e2   : > { %v5160_v19 = vld [vmem:[%s6709_s11 + $0x168] sm:$0xf0] }
 0x1e4   : > { %v1192_v29 = vpop.f32.mrf.mxu0 }
 0x1e5   : > { %v1287_v1 = vpop.f32.mrf.mxu2  ;;  %v1241_v53 = vpop.f32.mrf.mxu1 }
 0x1e6   : > { %v1336_v20 = vpop.f32.mrf.mxu3  ;;  %1815 = vmatmul.bf16.gmra.mxu1 %v6846_v0 }
 0x1e7   : > { %v7140_v10 = vadd.f32 %v1336_v20, %v1287_v1  ;;  %1771 = vmatmul.bf16.gmra.mxu0 %v6860_v17 }
 0x1e9   : > { %10347 = vst [vmem:[#allocation69_spill] sm:$0xff] %v7140_v10  ;;  %v5223_v10 = vor.u32 %v5711_v51, %v5222_v49  ;;  %v5163_v51 = vor.u32 %v5694_v13, %v5160_v19  ;;  %v5708_v19 = vld [vmem:[%s6709_s11 + $0x1d4] sm:$0xf]  ;;  %v5216_v13 = vld [vmem:[%s6709_s11 + $0x1d8] sm:$0xf0] }
 0x1ea   : > { %1869 = vmatmul.bf16.gmra.mxu2 %v6860_v17  ;;  %v5152_v17 = vld [vmem:[%s6709_s11 + $0x158] sm:$0xf0] }
 0x1eb   : > { %1918 = vmatmul.bf16.gmra.mxu3 %v6862_v18  ;;  %2048 = vmatpush.bf16.xpose.msrb.mxu2 %v5223_v10 }
 0x1ec   : > { %v7144_v24 = vpop.f32.mrf.mxu0  ;;  %1999 = vmatpush.bf16.xpose.msrb.mxu1 %v5163_v51  ;;  %v5237_v51 = vmul.f32 -1.442695, %v6954_v62 }
 0x1ed   : > { %v1290_v6 = vpop.f32.mrf.mxu2  ;;  %10348 = vst [vmem:[#allocation70_spill] sm:$0xff] %v7144_v24  ;;  %v7146_v14 = vpop.f32.mrf.mxu1  ;;  %v5158_v24 = vld [vmem:[%s6709_s11 + $0x160] sm:$0xf] }
 0x1ee   : > { %v1339_v23 = vpop.f32.mrf.mxu3  ;;  %10349 = vst [vmem:[#allocation71_spill] sm:$0xff] %v7146_v14  ;;  %v5227_v14 = vor.u32 %v5710_v61, %v5224_v22  ;;  %v5159_v49 = vor.u32 %v5695_v58, %v5158_v24  ;;  %v7165_v61 = vadd.f32 %v1241_v53, %v1192_v29  ;;  %v5214_v22 = vld [vmem:[%s6709_s11 + $0x1d0] sm:$0xf] }
 0x1ef   : > { %v7169_v54 = vadd.f32 %v1339_v23, %v1290_v6  ;;  %v5215_v58 = vor.u32 %v5709_v27, %v5214_v22  ;;  %v5150_v24 = vld [vmem:[%s6709_s11 + $0x150] sm:$0xf]  ;;  %v5240_v22 = vmul.f32 -1.442695, %v6956_v3 }
 0x1f0   : > { %2097 = vmatpush.bf16.xpose.msrb.mxu3 %v5227_v14  ;;  %v5236_v14 = vmul.f32 -1.442695, %v6944_v50  ;;  %10351 = vst [vmem:[#allocation73_spill] sm:$0xff] %v7165_v61  ;;  %1950 = vmatpush.bf16.xpose.msrb.mxu0 %v5159_v49  ;;  %v5151_v29 = vor.u32 %v5693_v28, %v5150_v24 }
 0x1f1   : > { %10352 = vst [vmem:[#allocation74_spill] sm:$0xff] %v7169_v54 }
 0x1f2   : > { %5916 = vpow2.f32 %v5236_v14  ;;  %v5206_v14 = vld [vmem:[%s6709_s11 + $0x1c0] sm:$0xf] }
 0x1f3   : > { %2049 = vmatpush.bf16.xpose.msrb.mxu2 %v5215_v58  ;;  %5918 = vpow2.f32 %v5237_v51  ;;  %v5707_v58 = vld [vmem:[%s6709_s11 + $0x1c4] sm:$0xf0] }
 0x1f4   : > { %v1197_v1 = vpop.f32.mrf.mxu0  ;;  %5920 = vpow2.f32 %v5240_v22  ;;  %v5245_v22 = vmul.f32 -1.442695, %v6972_v25 }
 0x1f5   : > { %v1292_v39 = vpop.f32.mrf.mxu2  ;;  %v1246_v20 = vpop.f32.mrf.mxu1 }
 0x1f6   : > { %v1341_v21 = vpop.f32.mrf.mxu3  ;;  %1820 = vmatmul.bf16.gmra.mxu1 %v6862_v18  ;;  %v5692_v18 = vld [vmem:[%s6709_s11 + $0x154] sm:$0xf]  ;;  %v7181_v6 = vadd.f32 %v1246_v20, %v1197_v1 }
 0x1f7   : > { %v5155_v53 = vor.u32 %v5692_v18, %v5152_v17  ;;  %v7179_v61 = vadd.f32 %v1341_v21, %v1292_v39  ;;  %1776 = vmatmul.bf16.gmra.mxu0 %v6876_v36 }
 0x1f8   : > { %10355 = vst [vmem:[#allocation77_spill] sm:$0xff] %v7181_v6  ;;  %1951 = vmatpush.bf16.xpose.msrb.mxu0 %v5151_v29  ;;  %v5917_v17 = vpop.eup %5916 }
 0x1f9   : > { %10354 = vst [vmem:[#allocation76_spill] sm:$0xff] %v7179_v61  ;;  %2000 = vmatpush.bf16.xpose.msrb.mxu1 %v5155_v53  ;;  %v5919_v1 = vpop.eup %5918  ;;  %v5207_v53 = vor.u32 %v5707_v58, %v5206_v14  ;;  %v5691_v58 = vld [vmem:[%s6709_s11 + $0x144] sm:$0xf0] }
 0x1fa   : > { %1874 = vmatmul.bf16.gmra.mxu2 %v6876_v36  ;;  %v5921_v20 = vpop.eup %5920  ;;  %v7214_v24 = vadd.f32 1.0, %v5919_v1  ;;  %v5706_v1 = vld [vmem:[%s6709_s11 + $0x1c4] sm:$0xf] }
 0x1fb   : > { %1923 = vmatmul.bf16.gmra.mxu3 %v6878_v38  ;;  %v7216_v29 = vadd.f32 1.0, %v5921_v20  ;;  %2050 = vmatpush.bf16.xpose.msrb.mxu2 %v5207_v53 }
 0x1fc   : > { %v7162_v10 = vpop.f32.mrf.mxu0  ;;  %vm2421_vm4 = vweird.f32 %v7214_v24 }
 0x1fd   : > { %v1295_v52 = vpop.f32.mrf.mxu2  ;;  %10350 = vst [vmem:[#allocation72_spill] sm:$0xff] %v7162_v10  ;;  %v7171_v44 = vpop.f32.mrf.mxu1  ;;  %v5219_v10 = vor.u32 %v5708_v19, %v5216_v13  ;;  %v2472_v47 = vand.u32 2147483648, %v7216_v29  ;;  %vm2466_vm5 = vweird.f32 %v7216_v29 }
 0x1fe   : > { %v1344_v8 = vpop.f32.mrf.mxu3  ;;  %10353 = vst [vmem:[#allocation75_spill] sm:$0xff] %v7171_v44 }
 0x1ff   : > { %2098 = vmatpush.bf16.xpose.msrb.mxu3 %v5219_v10  ;;  %v7183_v23 = vadd.f32 %v1344_v8, %v1295_v52  ;;  %v7197_v8 = vadd.f32 1.0, %v5917_v17  ;;  %v5241_v52 = vmul.f32 -1.442695, %v6958_v7  ;;  %v5244_v10 = vmul.f32 -1.442695, %v6960_v9 }
 0x200   : > { %v5248_v17 = vmul.f32 -1.442695, %v6976_v34 }
 0x201   : > { %10356 = vst [vmem:[#allocation78_spill] sm:$0xff] %v7183_v23  ;;  %5922 = vrcp.f32 %v7197_v8  ;;  %vm2406_vm1 = vweird.f32 %v7197_v8 }
 0x202   : > { %5924 = vpow2.f32 %v5241_v52 }
 0x203   : > { %5926 = vpow2.f32 %v5244_v10  ;;  %v5142_v10 = vld [vmem:[%s6709_s11 + $0x140] sm:$0xf] }
 0x204   : > { %v7192_v28 = vpop.f32.mrf.mxu0  ;;  %5928 = vrcp.f32 %v7214_v24  ;;  %v5143_v6 = vor.u32 %v5691_v58, %v5142_v10 }
 0x205   : > { %v7185_v49 = vpop.f32.mrf.mxu2  ;;  %v7194_v18 = vpop.f32.mrf.mxu1  ;;  %5930 = vrcp.f32 %v7216_v29 }
 0x206   : > { %v7187_v27 = vpop.f32.mrf.mxu3  ;;  %1825 = vmatmul.bf16.gmra.mxu1 %v6878_v38  ;;  %5932 = vpow2.f32 %v5245_v22  ;;  %v5249_v38 = vmul.f32 -1.442695, %v6978_v43  ;;  %1952 = vmatpush.bf16.xpose.msrb.mxu0 %v5143_v6  ;;  %v2412_v6 = vand.u32 2147483648, %v7197_v8  ;;  %v2470_v43 = vand.u32 2147483647, %v7216_v29 }
 0x207   : > { %v7218_v51 = vpop.eup %5922  ;;  %5934 = vpow2.f32 %v5248_v17  ;;  %1781 = vmatmul.bf16.gmra.mxu0 %v6892_v55  ;;  %v5144_v17 = vld [vmem:[%s6709_s11 + $0x148] sm:$0xf0]  ;;  %v7257_v0 = vadd.f32 %v7187_v27, %v7185_v49 }
 0x208   : > { %v5925_v52 = vpop.eup %5924  ;;  %v2402_v14 = vmul.f32 %v7218_v51, %v7197_v8  ;;  %vm2407_vm0 = vweird.f32 %v7218_v51  ;;  %vm7351_vm9 = vcmp.eq.f32.partialorder %v2470_v43, 8.507059e+37 }
 0x209   : > { %v7231_v44 = vadd.f32 1.0, %v5925_v52  ;;  %v5927_v23 = vpop.eup %5926  ;;  %v5690_v52 = vld [vmem:[%s6709_s11 + $0x144] sm:$0xf]  ;;  %10359 = vst [vmem:[#allocation81_spill] sm:$0xff] %v7257_v0  ;;  %vm7301_vm3 = vmor %vm2406_vm1, %vm2407_vm0 }
 0x20a   : > { %1879 = vmatmul.bf16.gmra.mxu2 %v6892_v55  ;;  %v2403_v54 = vsub.f32 1.0, %v2402_v14  ;;  %v7240_v22 = vpop.eup %5928 }
 0x20b   : > { %1928 = vmatmul.bf16.gmra.mxu3 %v6894_v56  ;;  %5936 = vrcp.f32 %v7231_v44  ;;  %v2417_v55 = vmul.f32 %v7240_v22, %v7214_v24  ;;  %vm2422_vm7 = vweird.f32 %v7240_v22  ;;  %vm2481_vm10 = vweird.f32 %v7231_v44 }
 0x20c   : > { %v7210_v19 = vpop.f32.mrf.mxu0  ;;  %v2404_v58 = vmul.f32 %v7218_v51, %v2403_v54  ;;  %5938 = vpow2.f32 %v5249_v38  ;;  %v5252_v54 = vmul.f32 -1.442695, %v6981_v45  ;;  %v2485_v43 = vand.u32 2147483647, %v7231_v44  ;;  %vm7377_vm11 = vmor %vm2421_vm4, %vm2422_vm7 }
 0x20d   : > { %v7202_v39 = vpop.f32.mrf.mxu2  ;;  %10357 = vst [vmem:[#allocation79_spill] sm:$0xff] %v7210_v19  ;;  %v7212_v13 = vpop.f32.mrf.mxu1 }
 0x20e   : > { %v7204_v21 = vpop.f32.mrf.mxu3  ;;  %10358 = vst [vmem:[#allocation80_spill] sm:$0xff] %v7212_v13  ;;  %v5208_v13 = vld [vmem:[%s6709_s11 + $0x1c8] sm:$0xf0]  ;;  %vm7402_vm13 = vcmp.eq.f32.partialorder %v2485_v43, 8.507059e+37 }
 0x20f   : > { %v5211_v53 = vor.u32 %v5706_v1, %v5208_v13  ;;  %v7245_v13 = vpop.eup %5930  ;;  %v7248_v1 = vadd.f32 1.0, %v5927_v23  ;;  %v7274_v0 = vadd.f32 %v7204_v21, %v7202_v39  ;;  %v2413_v39 = vor.u32 1.1754944e-38, %v2412_v6 }
 0x210   : > { %v5933_v10 = vpop.eup %5932  ;;  %v2462_v38 = vmul.f32 %v7245_v13, %v7216_v29  ;;  %v2418_v21 = vsub.f32 1.0, %v2417_v55  ;;  %vm2467_vm8 = vweird.f32 %v7245_v13  ;;  %v5190_v55 = vld [vmem:[%s6709_s11 + $0x1a0] sm:$0xf] }
 0x211   : > { %2099 = vmatpush.bf16.xpose.msrb.mxu3 %v5211_v53  ;;  %v5935_v14 = vpop.eup %5934  ;;  %v5147_v53 = vor.u32 %v5690_v52, %v5144_v17  ;;  %5940 = vrcp.f32 %v7248_v1  ;;  %v7265_v52 = vadd.f32 %v7194_v18, %v7192_v28  ;;  %v7267_v49 = vadd.f32 1.0, %v5933_v10  ;;  %v5198_v17 = vld [vmem:[%s6709_s11 + $0x1b0] sm:$0xf]  ;;  %10361 = vst [vmem:[#allocation83_spill] sm:$0xff] %v7274_v0  ;;  %v5705_v28 = vld [vmem:[%s6709_s11 + $0x1b4] sm:$0xf0]  ;;  %vm7398_vm12 = vmor %vm2466_vm5, %vm2467_vm8 }
 0x212   : > { %v7269_v27 = vadd.f32 1.0, %v5935_v14  ;;  %v7278_v48 = vpop.eup %5936  ;;  %v5704_v18 = vld [vmem:[%s6709_s11 + $0x1b4] sm:$0xf]  ;;  %v5200_v10 = vld [vmem:[%s6709_s11 + $0x1b8] sm:$0xf0]  ;;  %v2427_v0 = vand.u32 2147483648, %v7214_v24  ;;  %5942 = vpow2.f32 %v5252_v54  ;;  %v2419_v35 = vmul.f32 %v7240_v22, %v2418_v21 }
 0x213   : > { %2001 = vmatpush.bf16.xpose.msrb.mxu1 %v5147_v53  ;;  %10360 = vst [vmem:[#allocation82_spill] sm:$0xff] %v7265_v52  ;;  %v2405_v53 = vadd.f32 %v7218_v51, %v2404_v58  ;;  %v5939_v58 = vpop.eup %5938  ;;  %v2463_v52 = vsub.f32 1.0, %v2462_v38  ;;  %v2477_v6 = vmul.f32 %v7278_v48, %v7231_v44  ;;  %5944 = vrcp.f32 %v7267_v49  ;;  %v5688_v38 = vld [vmem:[%s6709_s11 + $0x134] sm:$0xf]  ;;  %v5136_v54 = vld [vmem:[%s6709_s11 + $0x138] sm:$0xf0] }
 0x214   : > { %v7235_v61 = vpop.f32.mrf.mxu0  ;;  %v5203_v37 = vor.u32 %v5704_v18, %v5200_v10  ;;  %5946 = vrcp.f32 %v7269_v27  ;;  %v7320_v34 = vadd.f32 1.0, %v5939_v58  ;;  %v5256_v14 = vmul.f32 -1.442695, %v6994_v4 }
 0x215   : > { %v1302_v20 = vpop.f32.mrf.mxu2  ;;  %v7238_v36 = vpop.f32.mrf.mxu1  ;;  %v2478_v10 = vsub.f32 1.0, %v2477_v6  ;;  %v5703_v6 = vld [vmem:[%s6709_s11 + $0x1a4] sm:$0xf0]  ;;  %vm2482_vm14 = vweird.f32 %v7278_v48  ;;  %vm2526_vm15 = vweird.f32 %v7248_v1 }
 0x216   : > { %v1351_v19 = vpop.f32.mrf.mxu3  ;;  %1830 = vmatmul.bf16.gmra.mxu1 %v6894_v56  ;;  %v2410_v56 = vand.u32 2147483647, %v7197_v8  ;;  %5948 = vrcp.f32 %v7320_v34  ;;  %vm7439_vm0 = vmor %vm2481_vm10, %vm2482_vm14 }
 0x217   : > { %v7276_v46 = vadd.f32 %v1351_v19, %v1302_v20  ;;  %v5134_v19 = vld [vmem:[%s6709_s11 + $0x130] sm:$0xf]  ;;  %v7311_v33 = vpop.eup %5940  ;;  %1786 = vmatmul.bf16.gmra.mxu0 %v6908_v11  ;;  %v2479_v58 = vmul.f32 %v7278_v48, %v2478_v10  ;;  %v5192_v10 = vld [vmem:[%s6709_s11 + $0x1a8] sm:$0xf0] }
 0x218   : > { %vm7286_vm2 = vcmp.eq.f32.partialorder %v2410_v56, 8.507059e+37  ;;  %v5689_v56 = vld [vmem:[%s6709_s11 + $0x134] sm:$0xf0]  ;;  %v2522_v21 = vmul.f32 %v7311_v33, %v7248_v1  ;;  %vm2527_vm1 = vweird.f32 %v7311_v33 }
 0x219   : > { %10362 = vst [vmem:[#allocation84_spill] sm:$0xff] %v7276_v46  ;;  %v2425_v46 = vand.u32 2147483647, %v7214_v24  ;;  %v5135_v45 = vor.u32 %v5689_v56, %v5134_v19  ;;  %2100 = vmatpush.bf16.xpose.msrb.mxu3 %v5203_v37  ;;  %v5253_v37 = vmul.f32 -1.442695, %v6990_v59  ;;  %v2420_v19 = vadd.f32 %v7240_v22, %v2419_v35  ;;  %vm7468_vm4 = vmor %vm2526_vm15, %vm2527_vm1 }
 0x21a   : > { %1884 = vmatmul.bf16.gmra.mxu2 %v6908_v11  ;;  %v2523_v56 = vsub.f32 1.0, %v2522_v21 }
 0x21b   : > { %1933 = vmatmul.bf16.gmra.mxu3 %v6910_v12  ;;  %1953 = vmatpush.bf16.xpose.msrb.mxu0 %v5135_v45  ;;  %vm7340_vm6 = vcmp.eq.f32.partialorder %v2425_v46, 8.507059e+37  ;;  %5950 = vpow2.f32 %v5253_v37  ;;  %v2424_v37 = vsel %vm7377_vm11, %v7240_v22, %v2420_v19  ;;  %v2530_v22 = vand.u32 2147483647, %v7248_v1 }
 0x21c   : > { %v7291_v20 = vpop.f32.mrf.mxu0  ;;  %5952 = vpow2.f32 %v5256_v14  ;;  %v2532_v19 = vand.u32 2147483648, %v7248_v1  ;;  %v2524_v43 = vmul.f32 %v7311_v33, %v2523_v56  ;;  %v2547_v14 = vand.u32 2147483648, %v7267_v49 }
 0x21d   : > { %v1305_v23 = vpop.f32.mrf.mxu2  ;;  %10365 = vst [vmem:[#allocation85_spill] sm:$0xff] %v7291_v20  ;;  %v7297_v8 = vpop.f32.mrf.mxu1  ;;  %v5199_v20 = vor.u32 %v5705_v28, %v5198_v17  ;;  %v5139_v17 = vor.u32 %v5688_v38, %v5136_v54  ;;  %v2464_v28 = vmul.f32 %v7245_v13, %v2463_v52  ;;  %v5261_v38 = vmul.f32 -1.442695, %v7010_v30 }
 0x21e   : > { %v1354_v63 = vpop.f32.mrf.mxu3  ;;  %10366 = vst [vmem:[#allocation86_spill] sm:$0xff] %v7297_v8  ;;  %v2409_v8 = vsel %vm7301_vm3, %v7218_v51, %v2405_v53  ;;  %v7326_v51 = vadd.f32 %v7238_v36, %v7235_v61  ;;  %v5943_v36 = vpop.eup %5942  ;;  %v2428_v61 = vor.u32 1.1754944e-38, %v2427_v0  ;;  %v2525_v46 = vadd.f32 %v7311_v33, %v2524_v43 }
 0x21f   : > { %2051 = vmatpush.bf16.xpose.msrb.mxu2 %v5199_v20  ;;  %v7328_v53 = vadd.f32 %v1354_v63, %v1305_v23  ;;  %v2414_v18 = vsel %vm7286_vm2, %v2413_v39, %v2409_v8  ;;  %2002 = vmatpush.bf16.xpose.msrb.mxu1 %v5139_v17  ;;  %v2473_v23 = vor.u32 1.1754944e-38, %v2472_v47  ;;  %v7346_v39 = vpop.eup %5944  ;;  %v2465_v35 = vadd.f32 %v7245_v13, %v2464_v28 }
 0x220   : > { %10369 = vst [vmem:[#allocation87_spill] sm:$0xff] %v7326_v51  ;;  %v7357_v0 = vpop.eup %5946  ;;  %v7360_v47 = vmul.f32 %v2414_v18, %v6944_v50  ;;  %v2487_v20 = vand.u32 2147483648, %v7231_v44  ;;  %v7367_v8 = vadd.f32 1.0, %v5943_v36  ;;  %v2537_v54 = vmul.f32 %v7346_v39, %v7267_v49  ;;  %v5702_v18 = vld [vmem:[%s6709_s11 + $0x1a4] sm:$0xf] }
 0x221   : > { %10370 = vst [vmem:[#allocation88_spill] sm:$0xff] %v7328_v53  ;;  %v5257_v17 = vmul.f32 -1.442695, %v7002_v15  ;;  %v5191_v28 = vor.u32 %v5703_v6, %v5190_v55  ;;  %v2582_v24 = vmul.f32 %v7357_v0, %v7269_v27  ;;  %v5260_v36 = vmul.f32 -1.442695, %v7004_v16 }
 0x222   : > { %v5195_v53 = vor.u32 %v5702_v18, %v5192_v10  ;;  %v2488_v6 = vor.u32 1.1754944e-38, %v2487_v20  ;;  %v7409_v18 = vpop.eup %5948  ;;  %v2469_v29 = vsel %vm7398_vm12, %v7245_v13, %v2465_v35  ;;  %5954 = vrcp.f32 %v7367_v8 }
 0x223   : > { %v2429_v20 = vsel %vm7340_vm6, %v2428_v61, %v2424_v37  ;;  %v2480_v10 = vadd.f32 %v7278_v48, %v2479_v58  ;;  %v2538_v51 = vsub.f32 1.0, %v2537_v54  ;;  %5956 = vpow2.f32 %v5257_v17 }
 0x224   : > { %v7371_v50 = vpop.f32.mrf.mxu0  ;;  %2101 = vmatpush.bf16.xpose.msrb.mxu3 %v5195_v53  ;;  %v2583_v13 = vsub.f32 1.0, %v2582_v24  ;;  %5958 = vpow2.f32 %v5260_v36  ;;  %v2474_v63 = vsel %vm7351_vm9, %v2473_v23, %v2469_v29  ;;  %v2545_v61 = vand.u32 2147483647, %v7267_v49 }
 0x225   : > { %v7336_v52 = vpop.f32.mrf.mxu2  ;;  %v7386_v21 = vpop.f32.mrf.mxu1  ;;  %v2597_v58 = vmul.f32 %v7409_v18, %v7320_v34  ;;  %5960 = vpow2.f32 %v5261_v38  ;;  %v7433_v54 = vmul.f32 %v2429_v20, %v6954_v62  ;;  %vm7445_vm2 = vcmp.eq.f32.partialorder %v2530_v22, 8.507059e+37 }
 0x226   : > { %v7338_v45 = vpop.f32.mrf.mxu3  ;;  %1835 = vmatmul.bf16.gmra.mxu1 %v6910_v12  ;;  %v2533_v37 = vor.u32 1.1754944e-38, %v2532_v19  ;;  %v2484_v62 = vsel %vm7439_vm0, %v7278_v48, %v2480_v10  ;;  %v2539_v24 = vmul.f32 %v7346_v39, %v2538_v51  ;;  %vm2541_vm3 = vweird.f32 %v7267_v49 }
 0x227   : > { %2052 = vmatpush.bf16.xpose.msrb.mxu2 %v5191_v28  ;;  %v5951_v28 = vpop.eup %5950  ;;  %v7459_v38 = vmul.f32 %v2474_v63, %v6956_v3  ;;  %v2548_v22 = vor.u32 1.1754944e-38, %v2547_v14  ;;  %v2584_v29 = vmul.f32 %v7357_v0, %v2583_v13  ;;  %vm7472_vm5 = vcmp.eq.f32.partialorder %v2545_v61, 8.507059e+37  ;;  %1791 = vmatmul.bf16.gmra.mxu0 %v6924_v31 }
 0x228   : > { %v5953_v53 = vpop.eup %5952  ;;  %v7454_v44 = vadd.f32 1.0, %v5951_v28  ;;  %vm2586_vm6 = vweird.f32 %v7269_v27  ;;  %v2590_v3 = vand.u32 2147483647, %v7269_v27  ;;  %v2592_v10 = vand.u32 2147483648, %v7269_v27 }
 0x229   : > { %v7456_v36 = vpop.eup %5954  ;;  %v7462_v43 = vadd.f32 1.0, %v5953_v53  ;;  %v2598_v28 = vsub.f32 1.0, %v2597_v58  ;;  %v7483_v1 = vsel %vm7402_vm13, %v2488_v6, %v2484_v62  ;;  %v2529_v53 = vsel %vm7468_vm4, %v7311_v33, %v2525_v46 }
 0x22a   : > { %1889 = vmatmul.bf16.gmra.mxu2 %v6924_v31  ;;  %v5957_v20 = vpop.eup %5956  ;;  %vm2542_vm7 = vweird.f32 %v7346_v39  ;;  %v2607_v63 = vand.u32 2147483648, %v7320_v34  ;;  %v2540_v58 = vadd.f32 %v7346_v39, %v2539_v24  ;;  %vm2587_vm8 = vweird.f32 %v7357_v0 }
 0x22b   : > { %1938 = vmatmul.bf16.gmra.mxu3 %v6926_v32  ;;  %v5959_v13 = vpop.eup %5958  ;;  %v2605_v17 = vand.u32 2147483647, %v7320_v34  ;;  %5962 = vrcp.f32 %v7454_v44  ;;  %v2585_v55 = vadd.f32 %v7357_v0, %v2584_v29  ;;  %v2642_v33 = vmul.f32 %v7456_v36, %v7367_v8  ;;  %vm7514_vm10 = vmor %vm2541_vm3, %vm2542_vm7 }
 0x22c   : > { %v7464_v19 = vpop.f32.mrf.mxu0  ;;  %v5961_v61 = vpop.eup %5960  ;;  %5964 = vrcp.f32 %v7462_v43  ;;  %v7500_v6 = vadd.f32 1.0, %v5957_v20  ;;  %vm7503_vm9 = vcmp.eq.f32.partialorder %v2590_v3, 8.507059e+37  ;;  %v2593_v62 = vor.u32 1.1754944e-38, %v2592_v10  ;;  %vm7539_vm11 = vmor %vm2586_vm6, %vm2587_vm8 }
 0x22d   : > { %v7422_v35 = vpop.f32.mrf.mxu2  ;;  %10385 = vst [vmem:[#allocation89_spill] sm:$0xff] %v7464_v19  ;;  %v7479_v14 = vpop.f32.mrf.mxu1  ;;  %v2599_v24 = vmul.f32 %v7409_v18, %v2598_v28  ;;  %v7508_v48 = vadd.f32 1.0, %v5959_v13  ;;  %v7518_v20 = vor.u32 1.1754944e-38, %v2607_v63  ;;  %v2652_v10 = vand.u32 2147483648, %v7367_v8 }
 0x22e   : > { %v7424_v56 = vpop.f32.mrf.mxu3  ;;  %10390 = vst [vmem:[#allocation90_spill] sm:$0xff] %v7479_v14  ;;  %v7522_v14 = vadd.f32 1.0, %v5961_v61  ;;  %v7530_v19 = vsel %vm7445_vm2, %v2533_v37, %v2529_v53  ;;  %v2544_v49 = vsel %vm7514_vm10, %v7346_v39, %v2540_v58  ;;  %vm2601_vm12 = vweird.f32 %v7320_v34  ;;  %v5126_v37 = vld [vmem:[%s6709_s11 + $0x120] sm:$0xf]  ;;  %v5687_v53 = vld [vmem:[%s6709_s11 + $0x124] sm:$0xf0] }
 0x22f   : > { %vm7544_vm13 = vcmp.eq.f32.partialorder %v2605_v17, 8.507059e+37  ;;  %v5264_v23 = vmul.f32 -1.442695, %v7014_v40  ;;  %v2589_v27 = vsel %vm7539_vm11, %v7357_v0, %v2585_v55  ;;  %v2643_v39 = vsub.f32 1.0, %v2642_v33 }
 0x230   : > { %5966 = vrcp.f32 %v7500_v6  ;;  %v5265_v58 = vmul.f32 -1.442695, %v7028_v2  ;;  %v2600_v17 = vadd.f32 %v7409_v18, %v2599_v24  ;;  %vm2602_vm14 = vweird.f32 %v7409_v18  ;;  %v5128_v24 = vld [vmem:[%s6709_s11 + $0x128] sm:$0xf0] }
 0x231   : > { %v7556_v29 = vpop.eup %5962  ;;  %5968 = vrcp.f32 %v7508_v48  ;;  %v5268_v3 = vmul.f32 -1.442695, %v7030_v5  ;;  %v2549_v0 = vsel %vm7472_vm5, %v2548_v22, %v2544_v49  ;;  %v7566_v55 = vor.u32 1.1754944e-38, %v2652_v10  ;;  %v5182_v22 = vld [vmem:[%s6709_s11 + $0x190] sm:$0xf]  ;;  %vm7585_vm0 = vmor %vm2601_vm12, %vm2602_vm14 }
 0x232   : > { %v7562_v63 = vpop.eup %5964  ;;  %5970 = vrcp.f32 %v7522_v14  ;;  %v5127_v33 = vor.u32 %v5687_v53, %v5126_v37  ;;  %v2594_v12 = vsel %vm7503_vm9, %v2593_v62, %v2589_v27  ;;  %vm2646_vm15 = vweird.f32 %v7367_v8  ;;  %v5701_v10 = vld [vmem:[%s6709_s11 + $0x194] sm:$0xf0]  ;;  %v5700_v53 = vld [vmem:[%s6709_s11 + $0x194] sm:$0xf]  ;;  %v5184_v27 = vld [vmem:[%s6709_s11 + $0x198] sm:$0xf0] }
 0x233   : > { %5972 = vpow2.f32 %v5264_v23  ;;  %v5269_v51 = vmul.f32 -1.442695, %v7037_v26  ;;  %v2644_v46 = vmul.f32 %v7456_v36, %v2643_v39  ;;  %v2657_v62 = vmul.f32 %v7556_v29, %v7454_v44 }
 0x234   : > { %v7571_v31 = vpop.f32.mrf.mxu0  ;;  %v2667_v23 = vand.u32 2147483648, %v7454_v44  ;;  %5974 = vpow2.f32 %v5265_v58  ;;  %1954 = vmatpush.bf16.xpose.msrb.mxu0 %v5127_v33  ;;  %v2604_v11 = vsel %vm7585_vm0, %v7409_v18, %v2600_v17  ;;  %v2702_v34 = vmul.f32 %v7562_v63, %v7462_v43 }
 0x235   : > { %v7524_v28 = vpop.f32.mrf.mxu2  ;;  %v7579_v49 = vpop.f32.mrf.mxu1  ;;  %5976 = vpow2.f32 %v5268_v3  ;;  %v7604_v39 = vadd.f32 %v7024_v60, %v7022_v57  ;;  %v7608_v58 = vadd.f32 %v7338_v45, %v7336_v52  ;;  %v7612_v33 = vadd.f32 %v7386_v21, %v7371_v50 }
 0x236   : > { %1840 = vmatmul.bf16.gmra.mxu1 %v6926_v32  ;;  %v7526_v13 = vpop.f32.mrf.mxu3  ;;  %v5686_v32 = vld [vmem:[%s6709_s11 + $0x124] sm:$0xf]  ;;  %v7600_v5 = vpop.eup %5966  ;;  %v5183_v18 = vor.u32 %v5701_v10, %v5182_v22  ;;  %vm2647_vm1 = vweird.f32 %v7456_v36  ;;  %5978 = vpow2.f32 %v5269_v51  ;;  %v5187_v3 = vor.u32 %v5700_v53, %v5184_v27  ;;  %v5684_v53 = vld [vmem:[%s6709_s11 + $0x114] sm:$0xf] }
 0x237   : > { %v5131_v26 = vor.u32 %v5686_v32, %v5128_v24  ;;  %10401 = vst [vmem:[#allocation91_spill] sm:$0xff] %v7604_v39  ;;  %v7614_v17 = vpop.eup %5968  ;;  %v2609_v60 = vsel %vm7544_vm13, %v7518_v20, %v2604_v11  ;;  %v7624_v52 = vadd.f32 %v7456_v36, %v2644_v46  ;;  %v2658_v45 = vsub.f32 1.0, %v2657_v62  ;;  %vm7650_vm3 = vmor %vm2646_vm15, %vm2647_vm1  ;;  %1796 = vmatmul.bf16.gmra.mxu0 %v6932_v41  ;;  %v5120_v20 = vld [vmem:[%s6709_s11 + $0x118] sm:$0xf0]  ;;  %v5176_v32 = vld [vmem:[%s6709_s11 + $0x188] sm:$0xf0] }
 0x238   : > { %10402 = vst [vmem:[#allocation92_spill] sm:$0xff] %v7608_v58  ;;  %v7618_v57 = vpop.eup %5970  ;;  %v7626_v50 = vor.u32 1.1754944e-38, %v2667_v23  ;;  %2053 = vmatpush.bf16.xpose.msrb.mxu2 %v5183_v18  ;;  %v2703_v10 = vsub.f32 1.0, %v2702_v34  ;;  %v2710_v11 = vand.u32 2147483647, %v7462_v43  ;;  %v2717_v61 = vmul.f32 %v7600_v5, %v7500_v6  ;;  %2102 = vmatpush.bf16.xpose.msrb.mxu3 %v5187_v3 }
 0x239   : > { %10403 = vst [vmem:[#allocation93_spill] sm:$0xff] %v7612_v33  ;;  %2003 = vmatpush.bf16.xpose.msrb.mxu1 %v5131_v26  ;;  %v5973_v22 = vpop.eup %5972  ;;  %v10404_v26 = vand.u32 2147483647, %v7367_v8  ;;  %v7640_v46 = vmul.f32 %v7483_v1, %v6958_v7  ;;  %v7644_v62 = vmul.f32 %v7530_v19, %v6960_v9  ;;  %v5272_v27 = vmul.f32 -1.442695, %v7604_v39  ;;  %v10409_v19 = vld [vmem:[#allocation39_spill] sm:$0xff] }
 0x23a   : > { %1894 = vmatmul.bf16.gmra.mxu2 %v6932_v41  ;;  %v5975_v37 = vpop.eup %5974  ;;  %v5118_v34 = vld [vmem:[%s6709_s11 + $0x110] sm:$0xf]  ;;  %v7659_v9 = vmul.f32 %v2549_v0, %v6972_v25  ;;  %v7662_v1 = vmul.f32 %v2594_v12, %v10409_v19  ;;  %v10410_v8 = vld [vmem:[#allocation40_spill] sm:$0xff]  ;;  %v7669_v3 = vadd.f32 %v7424_v56, %v7422_v35  ;;  %v2649_v12 = vsel %vm7650_vm3, %v7456_v36, %v7624_v52  ;;  %v5174_v56 = vld [vmem:[%s6709_s11 + $0x180] sm:$0xf] }
 0x23b   : > { %1943 = vmatmul.bf16.gmra.mxu3 %v6934_v42  ;;  %vm7630_vm2 = vcmp.eq.f32.partialorder %v10404_v26, 8.507059e+37  ;;  %v5977_v7 = vpop.eup %5976  ;;  %v7665_v18 = vmul.f32 %v2609_v60, %v10410_v8  ;;  %v5685_v26 = vld [vmem:[%s6709_s11 + $0x114] sm:$0xf0]  ;;  %v2659_v25 = vmul.f32 %v7556_v29, %v2658_v45  ;;  %vm2661_vm4 = vweird.f32 %v7454_v44  ;;  %v5699_v0 = vld [vmem:[%s6709_s11 + $0x184] sm:$0xf0] }
 0x23c   : > { %10411 = vst [vmem:[#allocation39_spill] sm:$0xff] %v7669_v3  ;;  %vm2662_vm5 = vweird.f32 %v7556_v29  ;;  %v7682_v35 = vadd.f32 1.0, %v5973_v22  ;;  %v7686_v60 = vpop.f32.mrf.mxu0  ;;  %v5979_v19 = vpop.eup %5978  ;;  %v2704_v8 = vmul.f32 %v7562_v63, %v2703_v10  ;;  %vm2706_vm6 = vweird.f32 %v7462_v43  ;;  %v5698_v45 = vld [vmem:[%s6709_s11 + $0x184] sm:$0xf] }
 0x23d   : > { %v1315_v21 = vpop.f32.mrf.mxu2  ;;  %10412 = vst [vmem:[#allocation40_spill] sm:$0xff] %v7686_v60  ;;  %v2718_v23 = vsub.f32 1.0, %v2717_v61  ;;  %v2762_v36 = vmul.f32 %v7614_v17, %v7508_v48  ;;  %v2777_v52 = vmul.f32 %v7618_v57, %v7522_v14  ;;  %v7696_v22 = vpop.f32.mrf.mxu1  ;;  %v7698_v33 = vadd.f32 1.0, %v5975_v37  ;;  %vm7750_vm11 = vmor %vm2661_vm4, %vm2662_vm5 }
 0x23e   : > { %v1364_v24 = vpop.f32.mrf.mxu3  ;;  %10413 = vst [vmem:[#allocation94_spill] sm:$0xff] %v7696_v22  ;;  %5980 = vpow2.f32 %v5272_v27  ;;  %v5119_v60 = vor.u32 %v5685_v26, %v5118_v34  ;;  %v5123_v3 = vor.u32 %v5684_v53, %v5120_v20  ;;  %v7700_v58 = vadd.f32 1.0, %v5977_v7  ;;  %v10422_v34 = vld [vmem:[#allocation44_spill] sm:$0xff] }
 0x23f   : > { %v7704_v10 = vadd.f32 %v7526_v13, %v7524_v28  ;;  %v7708_v61 = vadd.f32 %v7579_v49, %v7571_v31  ;;  %5982 = vrcp.f32 %v7682_v35  ;;  %v7711_v41 = vadd.f32 1.0, %v5979_v19  ;;  %v5110_v19 = vld [vmem:[%s6709_s11 + $0x100] sm:$0xf] }
 0x240   : > { %1955 = vmatpush.bf16.xpose.msrb.mxu0 %v5119_v60  ;;  %v5179_v37 = vor.u32 %v5698_v45, %v5176_v32  ;;  %v7713_v27 = vadd.f32 %v1364_v24, %v1315_v21  ;;  %v10417_v20 = vand.u32 2147483647, %v7454_v44  ;;  %vm7721_vm8 = vcmp.eq.f32.partialorder %v2710_v11, 8.507059e+37 }
 0x241   : > { %10414 = vst [vmem:[#allocation95_spill] sm:$0xff] %v7704_v10  ;;  %2004 = vmatpush.bf16.xpose.msrb.mxu1 %v5123_v3  ;;  %v2719_v31 = vmul.f32 %v7600_v5, %v2718_v23  ;;  %v2727_v13 = vand.u32 2147483648, %v7500_v6  ;;  %v2763_v49 = vsub.f32 1.0, %v2762_v36  ;;  %v5273_v7 = vmul.f32 -1.442695, %v10422_v34  ;;  %v10426_v36 = vld [vmem:[#allocation41_spill] sm:$0xff] }
 0x242   : > { %10415 = vst [vmem:[#allocation96_spill] sm:$0xff] %v7708_v61  ;;  %vm7717_vm7 = vcmp.eq.f32.partialorder %v10417_v20, 8.507059e+37  ;;  %v2654_v32 = vsel %vm7630_vm2, %v7566_v55, %v2649_v12  ;;  %vm2707_vm9 = vweird.f32 %v7562_v63  ;;  %v2770_v21 = vand.u32 2147483647, %v7508_v48  ;;  %2103 = vmatpush.bf16.xpose.msrb.mxu3 %v5179_v37 }
 0x243   : > { %10416 = vst [vmem:[#allocation97_spill] sm:$0xff] %v7713_v27  ;;  %5984 = vrcp.f32 %v7698_v33  ;;  %v2660_v3 = vadd.f32 %v7556_v29, %v2659_v25  ;;  %v2778_v26 = vsub.f32 1.0, %v2777_v52  ;;  %v10423_v51 = vand.u32 2147483648, %v7462_v43  ;;  %vm7768_vm13 = vmor %vm2706_vm6, %vm2707_vm9  ;;  %v5682_v27 = vld [vmem:[%s6709_s11 + $0x104] sm:$0xf] }
 0x244   : > { %5986 = vrcp.f32 %v7700_v58  ;;  %v5981_v55 = vpop.eup %5980  ;;  %vm2721_vm10 = vweird.f32 %v7500_v6  ;;  %vm2722_vm12 = vweird.f32 %v7600_v5  ;;  %v2764_v60 = vmul.f32 %v7614_v17, %v2763_v49 }
 0x245   : > { %v7734_v24 = vpop.f32.mrf.mxu2  ;;  %v2713_v12 = vor.u32 1.1754944e-38, %v10423_v51  ;;  %5988 = vrcp.f32 %v7711_v41  ;;  %v7759_v23 = vpop.eup %5982  ;;  %v7762_v52 = vmul.f32 %v2654_v32, %v10426_v36  ;;  %v10429_v45 = vand.u32 2147483647, %v7500_v6  ;;  %vm7802_vm1 = vmor %vm2721_vm10, %vm2722_vm12 }
 0x246   : > { %1845 = vmatmul.bf16.gmra.mxu1 %v6934_v42  ;;  %v5175_v42 = vor.u32 %v5699_v0, %v5174_v56  ;;  %v7736_v11 = vpop.f32.mrf.mxu3  ;;  %v2772_v56 = vand.u32 2147483648, %v7508_v48  ;;  %v2720_v0 = vadd.f32 %v7600_v5, %v2719_v31  ;;  %5990 = vpow2.f32 %v5273_v7  ;;  %v7779_v31 = vpop.f32.mrf.mxu0  ;;  %v5112_v7 = vld [vmem:[%s6709_s11 + $0x108] sm:$0xf0] }
 0x247   : > { %vm7774_vm14 = vcmp.eq.f32.partialorder %v10429_v45, 8.507059e+37  ;;  %v2728_v20 = vor.u32 1.1754944e-38, %v2727_v13  ;;  %vm2766_vm15 = vweird.f32 %v7508_v48  ;;  %v2664_v49 = vsel %vm7750_vm11, %v7556_v29, %v2660_v3  ;;  %v10436_v3 = vld [vmem:[#allocation46_spill] sm:$0xff]  ;;  %v10438_v45 = vld [vmem:[#allocation24_spill] sm:$0xff] }
 0x248   : > { %2054 = vmatpush.bf16.xpose.msrb.mxu2 %v5175_v42  ;;  %v2705_v42 = vadd.f32 %v7562_v63, %v2704_v8  ;;  %v5683_v8 = vld [vmem:[%s6709_s11 + $0x104] sm:$0xf0]  ;;  %vm7787_vm0 = vcmp.eq.f32.partialorder %v2770_v21, 8.507059e+37  ;;  %v2779_v32 = vmul.f32 %v7618_v57, %v2778_v26  ;;  %v7792_v51 = vadd.f32 1.0, %v5981_v55  ;;  %v10437_v55 = vld [vmem:[#allocation23_spill] sm:$0xff] }
 0x249   : > { %v7796_v36 = vpop.eup %5984  ;;  %v2785_v21 = vand.u32 2147483647, %v7522_v14  ;;  %v5111_v26 = vor.u32 %v5683_v8, %v5110_v19  ;;  %v2724_v44 = vsel %vm7802_vm1, %v7600_v5, %v2720_v0  ;;  %v2765_v6 = vadd.f32 %v7614_v17, %v2764_v60 }
 0x24a   : > { %v2709_v43 = vsel %vm7768_vm13, %v7562_v63, %v2705_v42  ;;  %v2773_v63 = vor.u32 1.1754944e-38, %v2772_v56  ;;  %v5276_v42 = vmul.f32 -1.442695, %v10436_v3  ;;  %v7809_v25 = vpop.eup %5986  ;;  %vm2767_vm2 = vweird.f32 %v7614_v17 }
 0x24b   : > { %v2822_v56 = vmul.f32 %v7759_v23, %v7682_v35  ;;  %2104 = vmatmul.bf16.vlgmr.msrb.gmra.mxu3 %v10438_v45  ;;  %v7819_v22 = vpop.eup %5988  ;;  %v2669_v19 = vsel %vm7717_vm7, %v7626_v50, %v2664_v49  ;;  %v2714_v8 = vsel %vm7721_vm8, %v2713_v12, %v2709_v43  ;;  %vm2781_vm3 = vweird.f32 %v7522_v14  ;;  %1956 = vmatpush.bf16.xpose.msrb.mxu0 %v5111_v26  ;;  %vm7843_vm5 = vmor %vm2766_vm15, %vm2767_vm2 }
 0x24c   : > { %v2787_v5 = vand.u32 2147483648, %v7522_v14  ;;  %v5991_v29 = vpop.eup %5990  ;;  %v2780_v61 = vadd.f32 %v7618_v57, %v2779_v32  ;;  %vm2782_vm4 = vweird.f32 %v7618_v57  ;;  %v2837_v50 = vmul.f32 %v7796_v36, %v7698_v33 }
 0x24d   : > { %v7828_v0 = vpop.f32.mrf.mxu2  ;;  %5992 = vrcp.f32 %v7792_v51  ;;  %v2729_v53 = vsel %vm7774_vm14, %v2728_v20, %v2724_v44  ;;  %vm7847_vm6 = vcmp.eq.f32.partialorder %v2785_v21, 8.507059e+37  ;;  %v2882_v49 = vmul.f32 %v7809_v25, %v7700_v58  ;;  %vm7867_vm7 = vmor %vm2781_vm3, %vm2782_vm4 }
 0x24e   : > { %v7830_v60 = vpop.f32.mrf.mxu3  ;;  %5994 = vpow2.f32 %v5276_v42  ;;  %v2769_v37 = vsel %vm7843_vm5, %v7614_v17, %v2765_v6  ;;  %v2823_v20 = vsub.f32 1.0, %v2822_v56  ;;  %v2832_v43 = vand.u32 2147483648, %v7682_v35  ;;  %v7873_v44 = vpop.f32.mrf.mxu0 }
 0x24f   : > { %2055 = vmatmul.bf16.vlgmr.msrb.gmra.mxu2 %v10437_v55  ;;  %v2897_v48 = vmul.f32 %v7819_v22, %v7711_v41  ;;  %v7860_v32 = vmul.f32 %v2669_v19, %v6990_v59  ;;  %v7863_v21 = vmul.f32 %v2714_v8, %v6994_v4  ;;  %v2788_v26 = vor.u32 1.1754944e-38, %v2787_v5  ;;  %v10448_v5 = vld [vmem:[#allocation47_spill] sm:$0xff] }
 0x250   : > { %v7871_v17 = vadd.f32 1.0, %v5991_v29  ;;  %v7876_v6 = vmul.f32 %v2729_v53, %v7002_v15  ;;  %v2784_v59 = vsel %vm7867_vm7, %v7618_v57, %v2780_v61  ;;  %v2830_v4 = vand.u32 2147483647, %v7682_v35  ;;  %v10449_v61 = vld [vmem:[#allocation45_spill] sm:$0xff] }
 0x251   : > { %10443 = vst [vmem:[#allocation41_spill] sm:$0xff] %v7860_v32  ;;  %v2838_v14 = vsub.f32 1.0, %v2837_v50  ;;  %v7886_v19 = vsel %vm7787_vm0, %v2773_v63, %v2769_v37  ;;  %vm2826_vm8 = vweird.f32 %v7682_v35  ;;  %v2883_v8 = vsub.f32 1.0, %v2882_v49  ;;  %v10450_v50 = vld [vmem:[#allocation48_spill] sm:$0xff]  ;;  %v10461_v35 = vld [vmem:[#allocation26_spill] sm:$0xff] }
 0x252   : > { %10444 = vst [vmem:[#allocation23_spill] sm:$0xff] %v7863_v21  ;;  %v5277_v29 = vmul.f32 -1.442695, %v10448_v5  ;;  %v2824_v53 = vmul.f32 %v7759_v23, %v2823_v20  ;;  %v7893_v28 = vor.u32 1.1754944e-38, %v2832_v43  ;;  %v2898_v57 = vsub.f32 1.0, %v2897_v48  ;;  %1957 = vmatmul.bf16.vlgmr.msrb.gmra.mxu0 %v10437_v55 }
 0x253   : > { %v7794_v13 = vpop.f32.mrf.mxu1  ;;  %10447 = vst [vmem:[#allocation24_spill] sm:$0xff] %v7876_v6  ;;  %v7890_v15 = vpop.eup %5992  ;;  %v7897_v42 = vadd.f32 %v10450_v50, %v10449_v61  ;;  %v7904_v49 = vsel %vm7847_vm6, %v2788_v26, %v2784_v59  ;;  %v2847_v37 = vand.u32 2147483648, %v7698_v33  ;;  %v2892_v20 = vand.u32 2147483648, %v7700_v58 }
 0x254   : > { %v5995_v63 = vpop.eup %5994  ;;  %5996 = vrcp.f32 %v7871_v17  ;;  %vm7913_vm9 = vcmp.eq.f32.partialorder %v2830_v4, 8.507059e+37  ;;  %v2839_v55 = vmul.f32 %v7796_v36, %v2838_v14  ;;  %vm2841_vm10 = vweird.f32 %v7698_v33 }
 0x255   : > { %10451 = vst [vmem:[#allocation45_spill] sm:$0xff] %v7897_v42  ;;  %v7909_v43 = vpop.f32.mrf.mxu2  ;;  %v2845_v12 = vand.u32 2147483647, %v7698_v33  ;;  %v2890_v26 = vand.u32 2147483647, %v7700_v58  ;;  %v2884_v59 = vmul.f32 %v7809_v25, %v2883_v8  ;;  %v2942_v50 = vmul.f32 %v7890_v15, %v7792_v51 }
 0x256   : > { %v7911_v48 = vpop.f32.mrf.mxu3  ;;  %5998 = vpow2.f32 %v5277_v29  ;;  %v5115_v10 = vor.u32 %v5682_v27, %v5112_v7  ;;  %v2825_v4 = vadd.f32 %v7759_v23, %v2824_v53  ;;  %vm2827_vm11 = vweird.f32 %v7759_v23  ;;  %v7931_v8 = vpop.f32.mrf.mxu0  ;;  %v5743_v33 = vld [vmem:[%s6711_s29 + $0xec] sm:$0xf]  ;;  %v5744_v29 = vld [vmem:[%s6711_s29 + $0xec] sm:$0xf0] }
 0x257   : > { %v2899_v5 = vmul.f32 %v7819_v22, %v2898_v57  ;;  %v7927_v14 = vadd.f32 1.0, %v5995_v63  ;;  %v2848_v3 = vor.u32 1.1754944e-38, %v2847_v37  ;;  %vm2886_vm12 = vweird.f32 %v7700_v58  ;;  %vm7953_vm1 = vmor %vm2826_vm8, %vm2827_vm11 }
 0x258   : > { %v2893_v34 = vor.u32 1.1754944e-38, %v2892_v20  ;;  %v5280_v39 = vmul.f32 -1.442695, %v7897_v42  ;;  %2005 = vmatpush.bf16.xpose.msrb.mxu1 %v5115_v10  ;;  %vm2842_vm13 = vweird.f32 %v7796_v36  ;;  %vm7934_vm14 = vcmp.eq.f32.partialorder %v2845_v12, 8.507059e+37 }
 0x259   : > { %vm7938_vm15 = vcmp.eq.f32.partialorder %v2890_v26, 8.507059e+37  ;;  %vm2901_vm0 = vweird.f32 %v7711_v41  ;;  %v2905_v53 = vand.u32 2147483647, %v7711_v41  ;;  %v2907_v57 = vand.u32 2147483648, %v7711_v41  ;;  %v10460_v26 = vld [vmem:[#allocation25_spill] sm:$0xff]  ;;  %vm7972_vm4 = vmor %vm2841_vm10, %vm2842_vm13 }
 0x25a   : > { %v7947_v10 = vpop.eup %5996  ;;  %v2840_v37 = vadd.f32 %v7796_v36, %v2839_v55  ;;  %v2885_v20 = vadd.f32 %v7809_v25, %v2884_v59  ;;  %vm2887_vm2 = vweird.f32 %v7809_v25  ;;  %v2943_v12 = vsub.f32 1.0, %v2942_v50 }
 0x25b   : > { %v7882_v56 = vpop.f32.mrf.mxu1  ;;  %v2829_v42 = vsel %vm7953_vm1, %v7759_v23, %v2825_v4  ;;  %v2900_v6 = vadd.f32 %v7819_v22, %v2899_v5  ;;  %vm2902_vm3 = vweird.f32 %v7819_v22  ;;  %6000 = vrcp.f32 %v7927_v14  ;;  %2109 = vmatmul.bf16.gmra.mxu3 %v10461_v35  ;;  %vm7986_vm5 = vmor %vm2886_vm12, %vm2887_vm2 }
 0x25c   : > { %v5999_v55 = vpop.eup %5998  ;;  %v2952_v50 = vand.u32 2147483648, %v7792_v51  ;;  %v2967_v23 = vand.u32 2147483648, %v7871_v17  ;;  %6002 = vpow2.f32 %v5280_v39  ;;  %v7980_v5 = vadd.f32 %v7736_v11, %v7734_v24  ;;  %vm8012_vm7 = vmor %vm2901_vm0, %vm2902_vm3 }
 0x25d   : > { %v1865_v4 = vpop.f32.mrf.mxu2  ;;  %vm7990_vm6 = vcmp.eq.f32.partialorder %v2905_v53, 8.507059e+37  ;;  %v2908_v32 = vor.u32 1.1754944e-38, %v2907_v57  ;;  %v2950_v39 = vand.u32 2147483647, %v7792_v51  ;;  %v2957_v24 = vmul.f32 %v7947_v10, %v7871_v17 }
 0x25e   : > { %10464 = vst [vmem:[#allocation48_spill] sm:$0xff] %v7980_v5  ;;  %v1914_v63 = vpop.f32.mrf.mxu3  ;;  %v8000_v11 = vsel %vm7913_vm9, %v7893_v28, %v2829_v42  ;;  %v2844_v58 = vsel %vm7972_vm4, %v7796_v36, %v2840_v37  ;;  %v2889_v53 = vsel %vm7986_vm5, %v7809_v25, %v2885_v20  ;;  %v2944_v61 = vmul.f32 %v7890_v15, %v2943_v12  ;;  %v5742_v37 = vld [vmem:[%s6711_s29 + $0xe4] sm:$0xf]  ;;  %v5416_v5 = vld [vmem:[%s6711_s29 + $0xf0] sm:$0xf0] }
 0x25f   : > { %2060 = vmatmul.bf16.gmra.mxu2 %v10460_v26  ;;  %v2904_v28 = vsel %vm8012_vm7, %v7819_v22, %v2900_v6  ;;  %v8020_v36 = vadd.f32 1.0, %v5999_v55  ;;  %v1812_v25 = vadd.f32 %v7794_v13, %v7779_v31  ;;  %2006 = vmatmul.bf16.vlgmr.msrb.gmra.mxu1 %v10438_v45  ;;  %v1910_v41 = vadd.f32 %v7830_v60, %v7828_v0  ;;  %v1769_v6 = vpop.f32.mrf.mxu0  ;;  %v5422_v0 = vld [vmem:[%s6711_s29 + $0xe8] sm:$0xf] }
 0x260   : > { %v8027_v42 = vor.u32 1.1754944e-38, %v2952_v50  ;;  %v8030_v20 = vor.u32 1.1754944e-38, %v2967_v23  ;;  %v1814_v22 = vadd.f32 %v7882_v56, %v7873_v44  ;;  %vm2947_vm8 = vweird.f32 %v7890_v15  ;;  %v5745_v23 = vld [vmem:[%s6711_s29 + $0xf4] sm:$0xf0] }
 0x261   : > { %v8034_v12 = vpop.eup %6000  ;;  %v2958_v31 = vsub.f32 1.0, %v2957_v24  ;;  %v3012_v45 = vand.u32 2147483648, %v7927_v14  ;;  %v8042_v44 = vsel %vm7934_vm14, %v2848_v3, %v2844_v58  ;;  %v8046_v56 = vsel %vm7938_vm15, %v2893_v34, %v2889_v53  ;;  %v5424_v24 = vld [vmem:[%s6711_s29 + $0xf8] sm:$0xf0]  ;;  %v10472_v3 = vld [vmem:[#allocation51_spill] sm:$0xff]  ;;  %v10473_v53 = vld [vmem:[#allocation52_spill] sm:$0xff] }
 0x262   : > { %10471 = vst [vmem:[#allocation25_spill] sm:$0xff] %v8030_v20  ;;  %v6003_v55 = vpop.eup %6002  ;;  %v8050_v59 = vsel %vm7990_vm6, %v2908_v32, %v2904_v28  ;;  %v8053_v50 = vadd.f32 %v7890_v15, %v2944_v61  ;;  %vm2946_vm9 = vweird.f32 %v7792_v51  ;;  %6004 = vrcp.f32 %v8020_v36  ;;  %1962 = vmatmul.bf16.gmra.mxu0 %v10460_v26  ;;  %v5414_v32 = vld [vmem:[%s6711_s29 + $0xe0] sm:$0xf]  ;;  %v10478_v20 = vld [vmem:[#allocation50_spill] sm:$0xff] }
 0x263   : > { %v7945_v7 = vpop.f32.mrf.mxu1  ;;  %v5281_v27 = vmul.f32 -1.442695, %v10472_v3  ;;  %v3425_v34 = vmul.f32 %v7360_v47, %v1812_v25  ;;  %v3426_v21 = vmul.f32 %v7433_v54, %v1910_v41  ;;  %v8068_v58 = vmul.f32 %v8034_v12, %v7927_v14  ;;  %vm8121_vm11 = vmor %vm2946_vm9, %vm2947_vm8 }
 0x264   : > { %v5284_v57 = vmul.f32 -1.442695, %v10473_v53  ;;  %v3429_v61 = vmul.f32 %v7459_v38, %v1814_v22  ;;  %v1912_v28 = vadd.f32 %v7911_v48, %v7909_v43  ;;  %v8074_v25 = vadd.f32 1.0, %v6003_v55  ;;  %v10477_v55 = vld [vmem:[#allocation49_spill] sm:$0xff] }
 0x265   : > { %v1867_v13 = vpop.f32.mrf.mxu2  ;;  %v1817_v54 = vadd.f32 %v7945_v7, %v7931_v8  ;;  %v5423_v26 = vor.u32 %v5745_v23, %v5422_v0  ;;  %v5427_v41 = vor.u32 %v5743_v33, %v5424_v24  ;;  %vm8080_vm10 = vcmp.eq.f32.partialorder %v2950_v39, 8.507059e+37  ;;  %v10480_v24 = vld [vmem:[#allocation53_spill] sm:$0xff] }
 0x266   : > { %v1916_v47 = vpop.f32.mrf.mxu3  ;;  %v8084_v53 = vpack.c.bf16 %v3429_v61, %v3425_v34  ;;  %v3430_v38 = vmul.f32 %v7640_v46, %v1912_v28  ;;  %v1915_v43 = vadd.f32 %v1914_v63, %v1865_v4  ;;  %v5415_v48 = vor.u32 %v5744_v29, %v5414_v32  ;;  %v5739_v32 = vld [vmem:[%s6711_s29 + $0xcc] sm:$0xf]  ;;  %v5408_v29 = vld [vmem:[%s6711_s29 + $0xd8] sm:$0xf0]  ;;  %v10486_v61 = vld [vmem:[#allocation43_spill] sm:$0xff] }
 0x267   : > { %v2959_v22 = vmul.f32 %v7947_v10, %v2958_v31  ;;  %6006 = vpow2.f32 %v5281_v27  ;;  %v8090_v8 = vadd.f32 %v10478_v20, %v10477_v55  ;;  %v8093_v7 = vmul.f32 %v7644_v62, %v1817_v54  ;;  %4035 = vmatpush.bf16.xpose.msra.mxu2 %v5423_v26  ;;  %4084 = vmatpush.bf16.xpose.msra.mxu3 %v5427_v41  ;;  %v1772_v63 = vpop.f32.mrf.mxu0  ;;  %v10484_v27 = vld [vmem:[#allocation28_spill] sm:$0xff] }
 0x268   : > { %10476 = vst [vmem:[#allocation26_spill] sm:$0xff] %v8084_v53  ;;  %v8095_v39 = vpack.c.bf16 %v3430_v38, %v3426_v21  ;;  %v8098_v0 = vmul.f32 %v7659_v9, %v1915_v43  ;;  %3937 = vmatpush.bf16.xpose.msra.mxu0 %v5415_v48  ;;  %v5419_v46 = vor.u32 %v5742_v37, %v5416_v5  ;;  %v8100_v31 = vpop.eup %6004  ;;  %v3003_v23 = vsub.f32 1.0, %v8068_v58  ;;  %v10487_v54 = vld [vmem:[#allocation56_spill] sm:$0xff] }
 0x269   : > { %v8103_v20 = vor.u32 1.1754944e-38, %v3012_v45  ;;  %6008 = vpow2.f32 %v5284_v57  ;;  %v1917_v62 = vadd.f32 %v1916_v47, %v1867_v13  ;;  %v5285_v9 = vmul.f32 -1.442695, %v10480_v24 }
 0x26a   : > { %10479 = vst [vmem:[#allocation49_spill] sm:$0xff] %v8095_v39  ;;  %6010 = vrcp.f32 %v8074_v25  ;;  %3986 = vmatpush.bf16.xpose.msra.mxu1 %v5419_v46  ;;  %v8111_v45 = vmul.f32 %v7886_v19, %v7004_v16  ;;  %v8115_v13 = vmul.f32 %v7904_v49, %v7010_v30  ;;  %vm2961_vm12 = vweird.f32 %v7871_v17  ;;  %v5406_v16 = vld [vmem:[%s6711_s29 + $0xc8] sm:$0xf]  ;;  %v5741_v19 = vld [vmem:[%s6711_s29 + $0xd4] sm:$0xf0] }
 0x26b   : > { %v1818_v60 = vpop.f32.mrf.mxu1  ;;  %2114 = vmatmul.bf16.gmra.mxu3 %v10484_v27  ;;  %v8132_v30 = vmul.f32 %v8000_v11, %v7014_v40  ;;  %v8136_v51 = vmul.f32 %v8042_v44, %v7028_v2  ;;  %v10485_v49 = vld [vmem:[#allocation42_spill] sm:$0xff]  ;;  %v2949_v21 = vsel %vm8121_vm11, %v7890_v15, %v8053_v50  ;;  %v5398_v40 = vld [vmem:[%s6711_s29 + $0xc0] sm:$0xf]  ;;  %v8151_v28 = vmul.f32 %v8050_v59, %v10486_v61  ;;  %v5738_v15 = vld [vmem:[%s6711_s29 + $0xc4] sm:$0xf] }
 0x26c   : > { %v1819_v4 = vadd.f32 %v1818_v60, %v1769_v6  ;;  %v10481_v6 = vld [vmem:[#allocation27_spill] sm:$0xff]  ;;  %v8140_v34 = vmul.f32 %v8046_v56, %v10485_v49  ;;  %vm2962_vm13 = vweird.f32 %v7947_v10  ;;  %v8156_v2 = vmul.f32 %v8100_v31, %v8020_v36  ;;  %v5740_v56 = vld [vmem:[%s6711_s29 + $0xcc] sm:$0xf0]  ;;  %v5400_v50 = vld [vmem:[%s6711_s29 + $0xd0] sm:$0xf0] }
 0x26d   : > { %v1870_v58 = vpop.f32.mrf.mxu2  ;;  %v6007_v11 = vpop.eup %6006  ;;  %v3438_v44 = vmul.f32 %v7665_v18, %v1917_v62  ;;  %v8163_v47 = vadd.f32 %v7947_v10, %v2959_v22  ;;  %v5289_v26 = vmul.f32 -1.442695, %v10487_v54  ;;  %v5407_v59 = vor.u32 %v5741_v19, %v5406_v16  ;;  %v10491_v22 = vld [vmem:[#allocation57_spill] sm:$0xff]  ;;  %v5390_v60 = vld [vmem:[%s6711_s29 + $0xa8] sm:$0xf]  ;;  %vm8194_vm0 = vmor %vm2961_vm12, %vm2962_vm13 }
 0x26e   : > { %v3437_v5 = vmul.f32 %v7662_v1, %v1819_v4  ;;  %v5288_v1 = vmul.f32 -1.442695, %v8090_v8  ;;  %v1919_v57 = vpop.f32.mrf.mxu3  ;;  %v2954_v43 = vsel %vm8080_vm10, %v8027_v42, %v2949_v21  ;;  %v10488_v48 = vand.u32 2147483647, %v7871_v17  ;;  %v10498_v61 = vld [vmem:[#allocation23_spill] sm:$0xff] }
 0x26f   : > { %2065 = vmatmul.bf16.gmra.mxu2 %v10481_v6  ;;  %v6009_v38 = vpop.eup %6008  ;;  %v3004_v55 = vmul.f32 %v8034_v12, %v3003_v23  ;;  %vm3006_vm15 = vweird.f32 %v7927_v14  ;;  %v5292_v46 = vmul.f32 -1.442695, %v10491_v22  ;;  %2011 = vmatmul.bf16.gmra.mxu1 %v10461_v35  ;;  %6012 = vpow2.f32 %v5285_v9  ;;  %v1774_v62 = vpop.f32.mrf.mxu0  ;;  %v5737_v35 = vld [vmem:[%s6711_s29 + $0xb4] sm:$0xf0]  ;;  %v10504_v9 = vld [vmem:[#allocation25_spill] sm:$0xff] }
 0x270   : > { %vm8172_vm14 = vcmp.eq.f32.partialorder %v10488_v48, 8.507059e+37  ;;  %v8180_v4 = vpop.eup %6010  ;;  %4036 = vmatpush.bf16.xpose.msra.mxu2 %v5407_v59  ;;  %v1920_v42 = vadd.f32 %v1919_v57, %v1870_v58  ;;  %v5399_v3 = vor.u32 %v5740_v56, %v5398_v40  ;;  %v3018_v23 = vsub.f32 1.0, %v8156_v2  ;;  %v5382_v40 = vld [vmem:[%s6711_s29 + $0xa0] sm:$0xf] }
 0x271   : > { %6014 = vpow2.f32 %v5288_v1  ;;  %v8188_v16 = vpack.c.bf16 %v3437_v5, %v8093_v7  ;;  %v8198_v19 = vadd.f32 1.0, %v6009_v38  ;;  %v10494_v1 = vld [vmem:[#allocation41_spill] sm:$0xff]  ;;  %v5735_v7 = vld [vmem:[%s6711_s29 + $0xac] sm:$0xf]  ;;  %v5392_v5 = vld [vmem:[%s6711_s29 + $0xb8] sm:$0xf0]  ;;  %v2964_v17 = vsel %vm8194_vm0, %v7947_v10, %v8163_v47 }
 0x272   : > { %6016 = vpow2.f32 %v5289_v26  ;;  %v3442_v49 = vmul.f32 %v10494_v1, %v1920_v42  ;;  %3938 = vmatpush.bf16.xpose.msra.mxu0 %v5399_v3  ;;  %v3025_v58 = vand.u32 2147483647, %v8020_v36  ;;  %v3062_v57 = vmul.f32 %v8180_v4, %v8074_v25  ;;  %v5384_v47 = vld [vmem:[%s6711_s29 + $0xb0] sm:$0xf0] }
 0x273   : > { %v1821_v33 = vpop.f32.mrf.mxu1  ;;  %6018 = vpow2.f32 %v5292_v46  ;;  %1967 = vmatmul.bf16.gmra.mxu0 %v10481_v6  ;;  %vm3007_vm2 = vweird.f32 %v8034_v12  ;;  %v8224_v26 = vpack.c.bf16 %v3438_v44, %v8098_v0  ;;  %v3005_v59 = vadd.f32 %v8034_v12, %v3004_v55  ;;  %v10501_v0 = vld [vmem:[#allocation24_spill] sm:$0xff] }
 0x274   : > { %v1822_v37 = vadd.f32 %v1821_v33, %v1772_v63  ;;  %v5403_v63 = vor.u32 %v5738_v15, %v5400_v50  ;;  %v8183_v33 = vadd.f32 1.0, %v6007_v11  ;;  %v5736_v11 = vld [vmem:[%s6711_s29 + $0xac] sm:$0xf0]  ;;  %v5391_v15 = vor.u32 %v5737_v35, %v5390_v60  ;;  %v5734_v50 = vld [vmem:[%s6711_s29 + $0xa4] sm:$0xf]  ;;  %vm8244_vm3 = vmor %vm3006_vm15, %vm3007_vm2 }
 0x275   : > { %v1872_v2 = vpop.f32.mrf.mxu2  ;;  %10499 = vst [vmem:[#allocation50_spill] sm:$0xff] %v8224_v26  ;;  %v5395_v6 = vor.u32 %v5735_v7, %v5392_v5  ;;  %v6013_v48 = vpop.eup %6012  ;;  %v3019_v46 = vmul.f32 %v8100_v31, %v3018_v23  ;;  %v10502_v60 = vld [vmem:[#allocation91_spill] sm:$0xff]  ;;  %v2969_v23 = vsel %vm8172_vm14, %v10504_v9, %v2964_v17  ;;  %vm3021_vm4 = vweird.f32 %v8020_v36 }
 0x276   : > { %v3441_v41 = vmul.f32 %v7762_v52, %v1822_v37  ;;  %v5411_v52 = vor.u32 %v5739_v32, %v5408_v29  ;;  %3987 = vmatpush.bf16.xpose.msra.mxu1 %v5403_v63  ;;  %v10495_v32 = vand.u32 2147483647, %v7927_v14  ;;  %v1921_v56 = vpop.f32.mrf.mxu3  ;;  %6020 = vrcp.f32 %v8183_v33 }
 0x277   : > { %v1922_v38 = vadd.f32 %v1921_v56, %v1872_v2  ;;  %6022 = vrcp.f32 %v8198_v19  ;;  %v6015_v3 = vpop.eup %6014  ;;  %v3027_v63 = vand.u32 2147483648, %v8020_v36  ;;  %v8235_v35 = vmul.f32 %v2954_v43, %v10502_v60  ;;  %v10511_v56 = vld [vmem:[#allocation30_spill] sm:$0xff] }
 0x278   : > { %4085 = vmatpush.bf16.xpose.msra.mxu3 %v5411_v52  ;;  %vm8209_vm1 = vcmp.eq.f32.partialorder %v10495_v32, 8.507059e+37  ;;  %v5383_v52 = vor.u32 %v5736_v11, %v5382_v40  ;;  %v6017_v55 = vpop.eup %6016  ;;  %v3072_v1 = vand.u32 2147483648, %v8074_v25  ;;  %4037 = vmatpush.bf16.xpose.msra.mxu2 %v5391_v15  ;;  %v3009_v18 = vsel %vm8244_vm3, %v8034_v12, %v3005_v59  ;;  %v10508_v11 = vld [vmem:[#allocation29_spill] sm:$0xff] }
 0x279   : > { %v3446_v44 = vmul.f32 %v10501_v0, %v1922_v38  ;;  %10503 = vst [vmem:[#allocation27_spill] sm:$0xff] %v8235_v35  ;;  %v6019_v43 = vpop.eup %6018  ;;  %v3070_v7 = vand.u32 2147483647, %v8074_v25  ;;  %v8254_v5 = vadd.f32 1.0, %v6013_v48  ;;  %v3020_v32 = vadd.f32 %v8100_v31, %v3019_v46  ;;  %v5374_v0 = vld [vmem:[%s6711_s29 + $0x88] sm:$0xf] }
 0x27a   : > { %vm3022_vm5 = vweird.f32 %v8100_v31  ;;  %3939 = vmatpush.bf16.xpose.msra.mxu0 %v5383_v52  ;;  %vm8265_vm6 = vcmp.eq.f32.partialorder %v3025_v58, 8.507059e+37  ;;  %v8270_v2 = vadd.f32 1.0, %v6017_v55  ;;  %v8280_v58 = vadd.f32 1.0, %v6019_v43  ;;  %v10516_v52 = vld [vmem:[#allocation60_spill] sm:$0xff]  ;;  %v10518_v43 = vld [vmem:[#allocation46_spill] sm:$0xff] }
 0x27b   : > { %v1823_v37 = vpop.f32.mrf.mxu1  ;;  %v8256_v17 = vpack.c.bf16 %v3446_v44, %v3442_v49  ;;  %2119 = vmatmul.bf16.gmra.mxu3 %v10511_v56  ;;  %vm8289_vm7 = vmor %vm3021_vm4, %vm3022_vm5  ;;  %vm3067_vm8 = vweird.f32 %v8180_v4  ;;  %vm8294_vm9 = vcmp.eq.f32.partialorder %v3070_v7, 8.507059e+37  ;;  %6024 = vrcp.f32 %v8254_v5  ;;  %v5733_v44 = vld [vmem:[%s6711_s29 + $0x94] sm:$0xf0]  ;;  %v10517_v55 = vld [vmem:[#allocation44_spill] sm:$0xff] }
 0x27c   : > { %v1824_v21 = vadd.f32 %v1823_v37, %v1774_v62  ;;  %v3063_v62 = vsub.f32 1.0, %v3062_v57  ;;  %v5387_v37 = vor.u32 %v5734_v50, %v5384_v47  ;;  %v8260_v57 = vadd.f32 1.0, %v6015_v3  ;;  %v5726_v35 = vld [vmem:[%s6711_s29 + $0x64] sm:$0xf] }
 0x27d   : > { %10507 = vst [vmem:[#allocation28_spill] sm:$0xff] %v8256_v17  ;;  %v3014_v50 = vsel %vm8209_vm1, %v8103_v20, %v3009_v18  ;;  %v8278_v47 = vor.u32 1.1754944e-38, %v3072_v1  ;;  %v1875_v38 = vpop.f32.mrf.mxu2  ;;  %v3024_v36 = vsel %vm8289_vm7, %v8100_v31, %v3020_v32  ;;  %v5293_v3 = vmul.f32 -1.442695, %v10516_v52  ;;  %v5376_v1 = vld [vmem:[%s6711_s29 + $0x98] sm:$0xf0] }
 0x27e   : > { %v3445_v10 = vmul.f32 %v10498_v61, %v1824_v21  ;;  %v1777_v21 = vpop.f32.mrf.mxu0  ;;  %v8263_v61 = vpop.eup %6020  ;;  %v3064_v49 = vmul.f32 %v8180_v4, %v3063_v62  ;;  %3988 = vmatpush.bf16.xpose.msra.mxu1 %v5387_v37  ;;  %6026 = vrcp.f32 %v8260_v57  ;;  %v5731_v37 = vld [vmem:[%s6711_s29 + $0x8c] sm:$0xf]  ;;  %v8319_v60 = vmul.f32 %v2969_v23, %v10517_v55  ;;  %v5368_v23 = vld [vmem:[%s6711_s29 + $0x90] sm:$0xf0] }
 0x27f   : > { %2070 = vmatmul.bf16.gmra.mxu2 %v10508_v11  ;;  %v8273_v15 = vpop.eup %6022  ;;  %v3077_v46 = vmul.f32 %v8263_v61, %v8183_v33  ;;  %6028 = vrcp.f32 %v8270_v2  ;;  %2016 = vmatmul.bf16.gmra.mxu1 %v10484_v27  ;;  %vm3066_vm10 = vweird.f32 %v8074_v25  ;;  %v5732_v27 = vld [vmem:[%s6711_s29 + $0x8c] sm:$0xf0]  ;;  %v3132_v18 = vand.u32 2147483648, %v8198_v19 }
 0x280   : > { %v8230_v42 = vpack.c.bf16 %v3445_v10, %v3441_v41  ;;  %4086 = vmatpush.bf16.xpose.msra.mxu3 %v5395_v6  ;;  %v3028_v10 = vor.u32 1.1754944e-38, %v3027_v63  ;;  %v1924_v6 = vpop.f32.mrf.mxu3  ;;  %v3065_v63 = vadd.f32 %v8180_v4, %v3064_v49  ;;  %v3122_v62 = vmul.f32 %v8273_v15, %v8198_v19  ;;  %vm8338_vm11 = vmor %vm3066_vm10, %vm3067_vm8 }
 0x281   : > { %v1925_v29 = vadd.f32 %v1924_v6, %v1875_v38  ;;  %6030 = vrcp.f32 %v8280_v58  ;;  %v5375_v41 = vor.u32 %v5733_v44, %v5374_v0  ;;  %v3085_v12 = vand.u32 2147483647, %v8183_v33  ;;  %v10522_v44 = vld [vmem:[#allocation55_spill] sm:$0xff] }
 0x282   : > { %10500 = vst [vmem:[#allocation53_spill] sm:$0xff] %v8230_v42  ;;  %v3029_v49 = vsel %vm8265_vm6, %v3028_v10, %v3024_v36  ;;  %v3069_v0 = vsel %vm8338_vm11, %v8180_v4, %v3065_v63  ;;  %v3123_v10 = vsub.f32 1.0, %v3122_v62  ;;  %v10521_v36 = vld [vmem:[#allocation54_spill] sm:$0xff]  ;;  %vm3081_vm12 = vweird.f32 %v8183_v33  ;;  %v5719_v42 = vld [vmem:[%s6711_s29 + $0x2c] sm:$0xf] }
 0x283   : > { %v1826_v14 = vpop.f32.mrf.mxu1  ;;  %v8313_v31 = vmul.f32 %v8115_v13, %v1925_v29  ;;  %v8327_v13 = vmul.f32 %v3014_v50, %v10518_v43  ;;  %v3078_v50 = vsub.f32 1.0, %v3077_v46  ;;  %4038 = vmatpush.bf16.xpose.msra.mxu2 %v5375_v41  ;;  %v8342_v29 = vpop.eup %6024  ;;  %v8350_v25 = vadd.f32 %v10522_v44, %v10521_v36  ;;  %1972 = vmatmul.bf16.gmra.mxu0 %v10508_v11  ;;  %v10523_v41 = vld [vmem:[#allocation47_spill] sm:$0xff] }
 0x284   : > { %v1827_v40 = vadd.f32 %v1826_v14, %v1777_v21  ;;  %v5366_v21 = vld [vmem:[%s6711_s29 + $0x80] sm:$0xf]  ;;  %v5379_v14 = vor.u32 %v5731_v37, %v5376_v1  ;;  %v8353_v46 = vpop.eup %6026  ;;  %v3130_v55 = vand.u32 2147483647, %v8198_v19  ;;  %6032 = vpow2.f32 %v5293_v3 }
 0x285   : > { %v5367_v32 = vor.u32 %v5732_v27, %v5366_v21  ;;  %v1877_v63 = vpop.f32.mrf.mxu2  ;;  %v8363_v11 = vmul.f32 %v3029_v49, %v10523_v41  ;;  %vm3126_vm13 = vweird.f32 %v8198_v19  ;;  %v8366_v1 = vor.u32 1.1754944e-38, %v3132_v18  ;;  %v10532_v41 = vld [vmem:[#allocation31_spill] sm:$0xff] }
 0x286   : > { %v8283_v59 = vmul.f32 %v8111_v45, %v1827_v40  ;;  %v3087_v45 = vand.u32 2147483648, %v8183_v33  ;;  %v1779_v9 = vpop.f32.mrf.mxu0  ;;  %v5730_v40 = vld [vmem:[%s6711_s29 + $0x84] sm:$0xf]  ;;  %v3079_v3 = vmul.f32 %v8263_v61, %v3078_v50  ;;  %v3137_v18 = vmul.f32 %v8342_v29, %v8254_v5  ;;  %v5728_v33 = vld [vmem:[%s6711_s29 + $0x6c] sm:$0xf0] }
 0x287   : > { %v5371_v48 = vor.u32 %v5730_v40, %v5368_v23  ;;  %3940 = vmatpush.bf16.xpose.msra.mxu0 %v5367_v32  ;;  %v5296_v32 = vmul.f32 -1.442695, %v8350_v25  ;;  %vm3082_vm14 = vweird.f32 %v8263_v61  ;;  %vm3127_vm15 = vweird.f32 %v8273_v15 }
 0x288   : > { %4087 = vmatpush.bf16.xpose.msra.mxu3 %v5379_v14  ;;  %v8356_v37 = vor.u32 1.1754944e-38, %v3087_v45  ;;  %v1926_v62 = vpop.f32.mrf.mxu3  ;;  %v3147_v45 = vand.u32 2147483648, %v8254_v5  ;;  %v3124_v14 = vmul.f32 %v8273_v15, %v3123_v10  ;;  %v3192_v49 = vand.u32 2147483648, %v8260_v57  ;;  %vm8424_vm3 = vmor %vm3081_vm12, %vm3082_vm14 }
 0x289   : > { %3989 = vmatpush.bf16.xpose.msra.mxu1 %v5371_v48  ;;  %v1927_v21 = vadd.f32 %v1926_v62, %v1877_v63  ;;  %v10526_v48 = vld [vmem:[#allocation45_spill] sm:$0xff]  ;;  %vm8401_vm0 = vcmp.eq.f32.partialorder %v3085_v12, 8.507059e+37  ;;  %vm8405_vm1 = vcmp.eq.f32.partialorder %v3130_v55, 8.507059e+37  ;;  %v3190_v44 = vand.u32 2147483647, %v8260_v57  ;;  %v10533_v12 = vld [vmem:[#allocation32_spill] sm:$0xff]  ;;  %vm8437_vm5 = vmor %vm3126_vm13, %vm3127_vm15 }
 0x28a   : > { %v8390_v23 = vor.u32 1.1754944e-38, %v3147_v45  ;;  %v3125_v45 = vadd.f32 %v8273_v15, %v3124_v14  ;;  %6034 = vpow2.f32 %v5296_v32  ;;  %vm3141_vm2 = vweird.f32 %v8254_v5 }
 0x28b   : > { %v1828_v7 = vpop.f32.mrf.mxu1  ;;  %v3454_v40 = vmul.f32 %v8136_v51, %v1927_v21  ;;  %v3138_v21 = vsub.f32 1.0, %v3137_v18  ;;  %2124 = vmatmul.bf16.gmra.mxu3 %v10533_v12  ;;  %vm3186_vm4 = vweird.f32 %v8260_v57  ;;  %v8429_v14 = vor.u32 1.1754944e-38, %v3192_v49 }
 0x28c   : > { %v1829_v6 = vadd.f32 %v1828_v7, %v1779_v9  ;;  %v8360_v9 = vpop.eup %6028  ;;  %vm3142_vm6 = vweird.f32 %v8342_v29  ;;  %vm3201_vm7 = vweird.f32 %v8270_v2  ;;  %vm8491_vm10 = vcmp.eq.f32.partialorder %v3190_v44, 8.507059e+37 }
 0x28d   : > { %v8369_v27 = vpop.eup %6030  ;;  %v8396_v51 = vpack.c.bf16 %v3454_v40, %v8313_v31  ;;  %v3080_v31 = vadd.f32 %v8263_v61, %v3079_v3  ;;  %v10534_v40 = vld [vmem:[#allocation62_spill] sm:$0xff]  ;;  %vm3202_vm12 = vweird.f32 %v8360_v9  ;;  %vm8508_vm13 = vmor %vm3141_vm2, %vm3142_vm6 }
 0x28e   : > { %v3453_v4 = vmul.f32 %v8132_v30, %v1829_v6  ;;  %v3074_v30 = vsel %vm8294_vm9, %v8278_v47, %v3069_v0  ;;  %v3182_v47 = vmul.f32 %v8353_v46, %v8260_v57  ;;  %v1782_v20 = vpop.f32.mrf.mxu0  ;;  %v3242_v38 = vmul.f32 %v8369_v27, %v8280_v58  ;;  %v6033_v6 = vpop.eup %6032 }
 0x28f   : > { %10525 = vst [vmem:[#allocation43_spill] sm:$0xff] %v8396_v51  ;;  %v8399_v0 = vmul.f32 %v3074_v30, %v10526_v48  ;;  %2075 = vmatmul.bf16.gmra.mxu2 %v10532_v41  ;;  %v5238_v48 = vmul.f32 -1.442695, %v10534_v40  ;;  %v3084_v19 = vsel %vm8424_vm3, %v8263_v61, %v3080_v31  ;;  %2021 = vmatmul.bf16.gmra.mxu1 %v10511_v56  ;;  %vm3187_vm9 = vweird.f32 %v8353_v46 }
 0x290   : > { %v8377_v7 = vpack.c.bf16 %v3453_v4, %v8283_v59  ;;  %v3197_v59 = vmul.f32 %v8360_v9, %v8270_v2  ;;  %v10531_v4 = vld [vmem:[#allocation61_spill] sm:$0xff]  ;;  %v3183_v55 = vsub.f32 1.0, %v3182_v47  ;;  %v3243_v18 = vsub.f32 1.0, %v3242_v38  ;;  %v6035_v56 = vpop.eup %6034  ;;  %vm8519_vm15 = vmor %vm3186_vm4, %vm3187_vm9 }
 0x291   : > { %v5297_v63 = vmul.f32 -1.442695, %v10531_v4  ;;  %v3205_v47 = vand.u32 2147483647, %v8270_v2  ;;  %v3129_v38 = vsel %vm8437_vm5, %v8273_v15, %v3125_v45  ;;  %v5360_v45 = vld [vmem:[%s6711_s29 + $0x78] sm:$0xf0]  ;;  %vm3247_vm14 = vweird.f32 %v8369_v27 }
 0x292   : > { %10524 = vst [vmem:[#allocation42_spill] sm:$0xff] %v8377_v7  ;;  %v3198_v30 = vsub.f32 1.0, %v3197_v59  ;;  %v10540_v59 = vld [vmem:[#allocation63_spill] sm:$0xff]  ;;  %v3184_v3 = vmul.f32 %v8353_v46, %v3183_v55  ;;  %v5352_v55 = vld [vmem:[%s6711_s29 + $0x70] sm:$0xf0]  ;;  %v8502_v10 = vadd.f32 1.0, %v6035_v56 }
 0x293   : > { %v1831_v50 = vpop.f32.mrf.mxu1  ;;  %6036 = vpow2.f32 %v5297_v63  ;;  %v5239_v49 = vmul.f32 -1.442695, %v10540_v59  ;;  %v5358_v63 = vld [vmem:[%s6711_s29 + $0x68] sm:$0xf]  ;;  %vm8495_vm11 = vcmp.eq.f32.partialorder %v3205_v47, 8.507059e+37  ;;  %1977 = vmatmul.bf16.gmra.mxu0 %v10532_v41 }
 0x294   : > { %v1832_v62 = vadd.f32 %v1831_v50, %v1782_v20  ;;  %v1880_v20 = vpop.f32.mrf.mxu2  ;;  %v1929_v50 = vpop.f32.mrf.mxu3  ;;  %v3199_v61 = vmul.f32 %v8360_v9, %v3198_v30  ;;  %6038 = vpow2.f32 %v5238_v48  ;;  %v10543_v30 = vand.u32 2147483647, %v8254_v5 }
 0x295   : > { %v1930_v32 = vadd.f32 %v1929_v50, %v1880_v20  ;;  %v5729_v20 = vld [vmem:[%s6711_s29 + $0x74] sm:$0xf0]  ;;  %v5727_v50 = vld [vmem:[%s6711_s29 + $0x6c] sm:$0xf]  ;;  %vm3306_vm5 = vweird.f32 %v8502_v10 }
 0x296   : > { %v8418_v43 = vmul.f32 %v8140_v34, %v1832_v62  ;;  %v8431_v34 = vadd.f32 1.0, %v6033_v6  ;;  %v3139_v6 = vmul.f32 %v8342_v29, %v3138_v21  ;;  %v8461_v31 = vpop.f32.mrf.mxu0  ;;  %v5359_v15 = vor.u32 %v5729_v20, %v5358_v63  ;;  %v5350_v21 = vld [vmem:[%s6711_s29 + $0x60] sm:$0xf]  ;;  %v10546_v20 = vld [vmem:[#allocation58_spill] sm:$0xff] }
 0x297   : > { %v8454_v62 = vmul.f32 %v8151_v28, %v1930_v32  ;;  %10541 = vst [vmem:[#allocation57_spill] sm:$0xff] %v8461_v31  ;;  %v3244_v28 = vmul.f32 %v8369_v27, %v3243_v18  ;;  %v5351_v51 = vor.u32 %v5728_v33, %v5350_v21  ;;  %vm8474_vm8 = vcmp.eq.f32.partialorder %v10543_v30, 8.507059e+37  ;;  %v10547_v18 = vld [vmem:[#allocation59_spill] sm:$0xff] }
 0x298   : > { %10535 = vst [vmem:[#allocation56_spill] sm:$0xff] %v8418_v43  ;;  %6040 = vrcp.f32 %v8431_v34  ;;  %v5363_v43 = vor.u32 %v5727_v50, %v5360_v45  ;;  %v3207_v63 = vand.u32 2147483648, %v8270_v2  ;;  %v8482_v31 = vadd.f32 %v10547_v18, %v10546_v20  ;;  %4039 = vmatpush.bf16.xpose.msra.mxu2 %v5359_v15  ;;  %v5723_v20 = vld [vmem:[%s6711_s29 + $0x4c] sm:$0xf] }
 0x299   : > { %v3089_v50 = vsel %vm8401_vm0, %v8356_v37, %v3084_v19  ;;  %v3134_v45 = vsel %vm8405_vm1, %v8366_v1, %v3129_v38  ;;  %v3140_v21 = vadd.f32 %v8342_v29, %v3139_v6  ;;  %v3185_v37 = vadd.f32 %v8353_v46, %v3184_v3  ;;  %3941 = vmatpush.bf16.xpose.msra.mxu0 %v5351_v51  ;;  %vm8535_vm0 = vmor %vm3201_vm7, %vm3202_vm12 }
 0x29a   : > { %4088 = vmatpush.bf16.xpose.msra.mxu3 %v5363_v43  ;;  %6042 = vpow2.f32 %v5239_v49  ;;  %v3200_v43 = vadd.f32 %v8360_v9, %v3199_v61  ;;  %v3245_v41 = vadd.f32 %v8369_v27, %v3244_v28  ;;  %v3208_v5 = vor.u32 1.1754944e-38, %v3207_v63  ;;  %v10556_v61 = vld [vmem:[#allocation51_spill] sm:$0xff] }
 0x29b   : > { %v8468_v32 = vpop.f32.mrf.mxu1  ;;  %v3250_v19 = vand.u32 2147483647, %v8280_v58  ;;  %v3252_v38 = vand.u32 2147483648, %v8280_v58  ;;  %v5242_v6 = vmul.f32 -1.442695, %v8482_v31  ;;  %v8529_v15 = vmul.f32 %v3089_v50, %v10556_v61 }
 0x29c   : > { %10542 = vst [vmem:[#allocation41_spill] sm:$0xff] %v8468_v32  ;;  %v5355_v32 = vor.u32 %v5726_v35, %v5352_v55  ;;  %v6037_v35 = vpop.eup %6036  ;;  %v1882_v1 = vpop.f32.mrf.mxu2  ;;  %vm3246_vm1 = vweird.f32 %v8280_v58  ;;  %v3144_v63 = vsel %vm8508_vm13, %v8342_v29, %v3140_v21  ;;  %v3189_v2 = vsel %vm8519_vm15, %v8353_v46, %v3185_v37  ;;  %v10564_v37 = vld [vmem:[#allocation64_spill] sm:$0xff] }
 0x29d   : > { %v1931_v36 = vpop.f32.mrf.mxu3  ;;  %v6039_v49 = vpop.eup %6038  ;;  %v8540_v56 = vadd.f32 1.0, %v6037_v35  ;;  %vm8554_vm2 = vmor %vm3246_vm1, %vm3247_vm14  ;;  %6044 = vrcp.f32 %v8502_v10  ;;  %v3204_v58 = vsel %vm8535_vm0, %v8360_v9, %v3200_v43  ;;  %vm3251_vm3 = vcmp.eq.f32.partialorder %v3250_v19, 8.507059e+37  ;;  %v10563_v9 = vld [vmem:[#allocation33_spill] sm:$0xff] }
 0x29e   : > { %3990 = vmatpush.bf16.xpose.msra.mxu1 %v5355_v32  ;;  %v1932_v47 = vadd.f32 %v1931_v36, %v1882_v1  ;;  %v8526_v3 = vpop.eup %6040  ;;  %v10559_v32 = vld [vmem:[#allocation52_spill] sm:$0xff]  ;;  %v8565_v29 = vadd.f32 1.0, %v6039_v49  ;;  %v1787_v18 = vpop.f32.mrf.mxu0  ;;  %6046 = vpow2.f32 %v5242_v6  ;;  %v10565_v36 = vld [vmem:[#allocation34_spill] sm:$0xff]  ;;  %v3194_v44 = vsel %vm8491_vm10, %v8429_v14, %v3189_v2 }
 0x29f   : > { %v8544_v55 = vmul.f32 %v3134_v45, %v10559_v32  ;;  %v3253_v45 = vor.u32 1.1754944e-38, %v3252_v38  ;;  %v8572_v21 = vmul.f32 %v8526_v3, %v8431_v34  ;;  %2080 = vmatmul.bf16.gmra.mxu2 %v10563_v9  ;;  %6048 = vrcp.f32 %v8540_v56  ;;  %2129 = vmatmul.bf16.gmra.mxu3 %v10565_v36  ;;  %v10567_v6 = vld [vmem:[#allocation66_spill] sm:$0xff] }
 0x2a0   : > { %v3462_v28 = vmul.f32 %v8319_v60, %v1932_v47  ;;  %v3249_v60 = vsel %vm8554_vm2, %v8369_v27, %v3245_v41  ;;  %v6043_v50 = vpop.eup %6042  ;;  %v3149_v27 = vsel %vm8474_vm8, %v8390_v23, %v3144_v63  ;;  %v3209_v43 = vsel %vm8495_vm11, %v3208_v5, %v3204_v58  ;;  %v10566_v47 = vld [vmem:[#allocation65_spill] sm:$0xff]  ;;  %2026 = vmatmul.bf16.gmra.mxu1 %v10533_v12  ;;  %v5342_v63 = vld [vmem:[%s6711_s29 + $0x48] sm:$0xf]  ;;  %v5725_v2 = vld [vmem:[%s6711_s29 + $0x54] sm:$0xf0] }
 0x2a1   : > { %v3254_v41 = vsel %vm3251_vm3, %v3253_v45, %v3249_v60  ;;  %v5246_v49 = vmul.f32 -1.442695, %v10566_v47  ;;  %6050 = vrcp.f32 %v8565_v29  ;;  %v8588_v48 = vadd.f32 1.0, %v6043_v50  ;;  %v5344_v50 = vld [vmem:[%s6711_s29 + $0x58] sm:$0xf0] }
 0x2a2   : > { %v8568_v46 = vpack.c.bf16 %v3462_v28, %v8454_v62  ;;  %v5243_v62 = vmul.f32 -1.442695, %v10564_v37  ;;  %v8596_v30 = vmul.f32 %v3149_v27, %v10480_v24  ;;  %v3258_v5 = vsub.f32 1.0, %v8572_v21  ;;  %v10569_v28 = vld [vmem:[#allocation68_spill] sm:$0xff]  ;;  %v5334_v45 = vld [vmem:[%s6711_s29 + $0x40] sm:$0xf] }
 0x2a3   : > { %v1836_v35 = vpop.f32.mrf.mxu1  ;;  %v8593_v14 = vpop.eup %6044  ;;  %v3267_v38 = vand.u32 2147483648, %v8431_v34  ;;  %v5247_v61 = vmul.f32 -1.442695, %v10567_v6  ;;  %v8602_v57 = vmul.f32 %v3194_v44, %v8090_v8  ;;  %v8616_v60 = vmul.f32 %v3209_v43, %v10487_v54  ;;  %v5724_v12 = vld [vmem:[%s6711_s29 + $0x4c] sm:$0xf0]  ;;  %1982 = vmatmul.bf16.gmra.mxu0 %v10563_v9 }
 0x2a4   : > { %10562 = vst [vmem:[#allocation23_spill] sm:$0xff] %v8568_v46  ;;  %v1837_v1 = vadd.f32 %v1836_v35, %v1787_v18  ;;  %v1885_v51 = vpop.f32.mrf.mxu2  ;;  %6052 = vpow2.f32 %v5243_v62  ;;  %v6047_v58 = vpop.eup %6046  ;;  %v8619_v8 = vmul.f32 %v3254_v41, %v10491_v22  ;;  %v5343_v18 = vor.u32 %v5725_v2, %v5342_v63  ;;  %v5722_v54 = vld [vmem:[%s6711_s29 + $0x44] sm:$0xf] }
 0x2a5   : > { %v1934_v23 = vpop.f32.mrf.mxu3  ;;  %6054 = vpow2.f32 %v5246_v49  ;;  %v8624_v21 = vpop.eup %6048  ;;  %v5347_v27 = vor.u32 %v5723_v20, %v5344_v50  ;;  %v5335_v62 = vor.u32 %v5724_v12, %v5334_v45  ;;  %vm3261_vm4 = vweird.f32 %v8431_v34 }
 0x2a6   : > { %v8591_v19 = vmul.f32 %v8327_v13, %v1837_v1  ;;  %v1935_v33 = vadd.f32 %v1934_v23, %v1885_v51  ;;  %v10568_v13 = vld [vmem:[#allocation67_spill] sm:$0xff]  ;;  %6056 = vrcp.f32 %v8588_v48  ;;  %v1789_v35 = vpop.f32.mrf.mxu0  ;;  %v5336_v1 = vld [vmem:[%s6711_s29 + $0x50] sm:$0xf0]  ;;  %v3312_v22 = vand.u32 2147483648, %v8502_v10  ;;  %4040 = vmatpush.bf16.xpose.msra.mxu2 %v5343_v18 }
 0x2a7   : > { %v8606_v32 = vadd.f32 %v10569_v28, %v10568_v13  ;;  %v3327_v44 = vand.u32 2147483648, %v8540_v56  ;;  %6058 = vpow2.f32 %v5247_v61  ;;  %v5339_v41 = vor.u32 %v5722_v54, %v5336_v1  ;;  %v8634_v49 = vpop.eup %6050  ;;  %4089 = vmatpush.bf16.xpose.msra.mxu3 %v5347_v27  ;;  %3942 = vmatpush.bf16.xpose.msra.mxu0 %v5335_v62 }
 0x2a8   : > { %v8610_v24 = vmul.f32 %v8363_v11, %v1935_v33  ;;  %v3302_v11 = vmul.f32 %v8593_v14, %v8502_v10  ;;  %v3265_v51 = vand.u32 2147483647, %v8431_v34  ;;  %v8637_v23 = vor.u32 1.1754944e-38, %v3267_v38 }
 0x2a9   : > { %10570 = vst [vmem:[#allocation24_spill] sm:$0xff] %v8606_v32  ;;  %v8640_v33 = vmul.f32 -1.442695, %v8606_v32  ;;  %v3259_v28 = vmul.f32 %v8526_v3, %v3258_v5  ;;  %v3310_v61 = vand.u32 2147483647, %v8502_v10  ;;  %v3317_v63 = vmul.f32 %v8624_v21, %v8540_v56  ;;  %3991 = vmatpush.bf16.xpose.msra.mxu1 %v5339_v41 }
 0x2aa   : > { %v8647_v2 = vadd.f32 1.0, %v6047_v58  ;;  %v6053_v38 = vpop.eup %6052  ;;  %v3303_v50 = vsub.f32 1.0, %v3302_v11  ;;  %vm3262_vm6 = vweird.f32 %v8526_v3  ;;  %v8655_v58 = vor.u32 1.1754944e-38, %v3327_v44  ;;  %v5326_v10 = vld [vmem:[%s6711_s29 + $0x28] sm:$0xf] }
 0x2ab   : > { %v1838_v43 = vpop.f32.mrf.mxu1  ;;  %v6055_v12 = vpop.eup %6054  ;;  %v2432_v27 = vmul.f32 %v8634_v49, %v8565_v29  ;;  %vm8661_vm7 = vcmp.eq.f32.partialorder %v3265_v51, 8.507059e+37  ;;  %v2442_v54 = vand.u32 2147483648, %v8565_v29  ;;  %v3260_v41 = vadd.f32 %v8526_v3, %v3259_v28  ;;  %vm8693_vm8 = vmor %vm3261_vm4, %vm3262_vm6  ;;  %v10581_v28 = vld [vmem:[#allocation36_spill] sm:$0xff]  ;;  %v5320_v11 = vld [vmem:[%s6711_s29 + $0x30] sm:$0xf0] }
 0x2ac   : > { %v1839_v13 = vadd.f32 %v1838_v43, %v1789_v35  ;;  %v1887_v20 = vpop.f32.mrf.mxu2  ;;  %v8653_v35 = vor.u32 1.1754944e-38, %v3312_v22  ;;  %v8659_v62 = vpop.eup %6056  ;;  %6060 = vrcp.f32 %v8647_v2  ;;  %v8675_v51 = vadd.f32 1.0, %v6053_v38 }
 0x2ad   : > { %v1936_v18 = vpop.f32.mrf.mxu3  ;;  %v6059_v44 = vpop.eup %6058  ;;  %v8679_v9 = vadd.f32 1.0, %v6055_v12  ;;  %vm3307_vm9 = vweird.f32 %v8593_v14  ;;  %vm8698_vm10 = vcmp.eq.f32.partialorder %v3310_v61, 8.507059e+37  ;;  %vm3321_vm11 = vweird.f32 %v8540_v56 }
 0x2ae   : > { %v3469_v45 = vmul.f32 %v8399_v0, %v1839_v13  ;;  %v1937_v5 = vadd.f32 %v1936_v18, %v1887_v20  ;;  %v10573_v0 = vld [vmem:[#allocation69_spill] sm:$0xff]  ;;  %v3318_v13 = vsub.f32 1.0, %v3317_v63  ;;  %v3304_v20 = vmul.f32 %v8593_v14, %v3303_v50  ;;  %v1792_v46 = vpop.f32.mrf.mxu0  ;;  %vm8725_vm12 = vmor %vm3306_vm5, %vm3307_vm9 }
 0x2af   : > { %v8667_v1 = vmul.f32 -1.442695, %v10573_v0  ;;  %v2440_v18 = vand.u32 2147483647, %v8565_v29  ;;  %v2457_v63 = vand.u32 2147483648, %v8588_v48  ;;  %v8703_v12 = vor.u32 1.1754944e-38, %v2442_v54  ;;  %2134 = vmatmul.bf16.gmra.mxu3 %v10581_v28 }
 0x2b0   : > { %v3470_v43 = vmul.f32 %v8529_v15, %v1937_v5  ;;  %v8671_v22 = vpack.c.bf16 %v3469_v45, %v8591_v19  ;;  %v2433_v19 = vsub.f32 1.0, %v2432_v27  ;;  %v2447_v45 = vmul.f32 %v8659_v62, %v8588_v48  ;;  %v10576_v5 = vld [vmem:[#allocation35_spill] sm:$0xff]  ;;  %2031 = vmatmul.bf16.gmra.mxu1 %v10565_v36 }
 0x2b1   : > { %2085 = vmatmul.bf16.gmra.mxu2 %v10576_v5  ;;  %v8705_v27 = vadd.f32 1.0, %v6059_v44  ;;  %v3264_v34 = vsel %vm8693_vm8, %v8526_v3, %v3260_v41  ;;  %6062 = vrcp.f32 %v8675_v51  ;;  %v3305_v54 = vadd.f32 %v8593_v14, %v3304_v20 }
 0x2b2   : > { %10574 = vst [vmem:[#allocation91_spill] sm:$0xff] %v8671_v22  ;;  %v8682_v15 = vpack.c.bf16 %v3470_v43, %v8610_v24  ;;  %6064 = vrcp.f32 %v8679_v9  ;;  %v8719_v3 = vpop.eup %6060  ;;  %v2448_v20 = vsub.f32 1.0, %v2447_v45  ;;  %vm3322_vm13 = vweird.f32 %v8624_v21 }
 0x2b3   : > { %v1841_v38 = vpop.f32.mrf.mxu1  ;;  %vm2436_vm14 = vweird.f32 %v8565_v29  ;;  %6066 = vrcp.f32 %v8705_v27  ;;  %v3269_v45 = vsel %vm8661_vm7, %v8637_v23, %v3264_v34  ;;  %v10584_v50 = vand.u32 2147483647, %v8540_v56  ;;  %1987 = vmatmul.bf16.gmra.mxu0 %v10576_v5  ;;  %vm8794_vm4 = vmor %vm3321_vm11, %vm3322_vm13  ;;  %v5304_v56 = vld [vmem:[%s6711_s29 + $0x10] sm:$0xf0]  ;;  %v5312_v29 = vld [vmem:[%s6711_s29 + $0x18] sm:$0xf0] }
 0x2b4   : > { %10575 = vst [vmem:[#allocation25_spill] sm:$0xff] %v8682_v15  ;;  %v1842_v43 = vadd.f32 %v1841_v38, %v1792_v46  ;;  %v3319_v15 = vmul.f32 %v8624_v21, %v3318_v13  ;;  %v1890_v22 = vpop.f32.mrf.mxu2  ;;  %v2434_v13 = vmul.f32 %v8634_v49, %v2433_v19  ;;  %v8730_v38 = vor.u32 1.1754944e-38, %v2457_v63  ;;  %v5318_v19 = vld [vmem:[%s6711_s29 + $0x20] sm:$0xf] }
 0x2b5   : > { %v1939_v7 = vpop.f32.mrf.mxu3  ;;  %vm8751_vm15 = vcmp.eq.f32.partialorder %v10584_v50, 8.507059e+37  ;;  %vm2437_vm0 = vweird.f32 %v8634_v49  ;;  %vm2451_vm1 = vweird.f32 %v8588_v48  ;;  %v3309_v23 = vsel %vm8725_vm12, %v8593_v14, %v3305_v54 }
 0x2b6   : > { %v8717_v46 = vmul.f32 %v8544_v55, %v1842_v43  ;;  %v1940_v44 = vadd.f32 %v1939_v7, %v1890_v22  ;;  %v2502_v55 = vand.u32 2147483648, %v8647_v2  ;;  %v5721_v22 = vld [vmem:[%s6711_s29 + $0x34] sm:$0xf0]  ;;  %v8747_v63 = vadd.f32 %v8624_v21, %v3319_v15  ;;  %v1794_v50 = vpop.f32.mrf.mxu0  ;;  %vm8816_vm5 = vmor %vm2436_vm14, %vm2437_vm0 }
 0x2b7   : > { %v5327_v36 = vor.u32 %v5721_v22, %v5326_v10  ;;  %vm8763_vm2 = vcmp.eq.f32.partialorder %v2440_v18, 8.507059e+37  ;;  %v8769_v34 = vmul.f32 %v8719_v3, %v8647_v2  ;;  %v5328_v10 = vld [vmem:[%s6711_s29 + $0x38] sm:$0xf0]  ;;  %v8773_v22 = vpop.eup %6062  ;;  %v2435_v26 = vadd.f32 %v8634_v49, %v2434_v13 }
 0x2b8   : > { %v8738_v7 = vmul.f32 %v8596_v30, %v1940_v44  ;;  %v5720_v30 = vld [vmem:[%s6711_s29 + $0x2c] sm:$0xf0]  ;;  %v5718_v44 = vld [vmem:[%s6711_s29 + $0x24] sm:$0xf]  ;;  %v2449_v41 = vmul.f32 %v8659_v62, %v2448_v20  ;;  %6068 = vpow2.f32 %v8640_v33  ;;  %v5331_v18 = vor.u32 %v5719_v42, %v5328_v10  ;;  %v8778_v54 = vpop.eup %6064  ;;  %v10592_v20 = vld [vmem:[#allocation70_spill] sm:$0xff] }
 0x2b9   : > { %v5319_v61 = vor.u32 %v5720_v30, %v5318_v19  ;;  %v5323_v17 = vor.u32 %v5718_v44, %v5320_v11  ;;  %4041 = vmatpush.bf16.xpose.msra.mxu2 %v5327_v36  ;;  %v8781_v32 = vmul.f32 %v3269_v45, %v10516_v52  ;;  %vm2452_vm3 = vweird.f32 %v8659_v62  ;;  %v10591_v52 = vld [vmem:[#allocation73_spill] sm:$0xff]  ;;  %v5714_v45 = vld [vmem:[%s6711_s29 + $0x4] sm:$0xf]  ;;  %v8806_v36 = vpop.eup %6066 }
 0x2ba   : > { %v8784_v19 = vor.u32 1.1754944e-38, %v2502_v55  ;;  %v3314_v33 = vsel %vm8698_vm10, %v8653_v35, %v3309_v23  ;;  %6070 = vpow2.f32 %v8667_v1  ;;  %v5254_v5 = vmul.f32 -1.442695, %v10591_v52  ;;  %4090 = vmatpush.bf16.xpose.msra.mxu3 %v5331_v18  ;;  %v5302_v23 = vld [vmem:[%s6711_s29] sm:$0xf]  ;;  %vm8857_vm8 = vmor %vm2451_vm1, %vm2452_vm3 }
 0x2bb   : > { %v1843_v14 = vpop.f32.mrf.mxu1  ;;  %3992 = vmatpush.bf16.xpose.msra.mxu1 %v5323_v17  ;;  %v10593_v17 = vld [vmem:[#allocation71_spill] sm:$0xff]  ;;  %3943 = vmatpush.bf16.xpose.msra.mxu0 %v5319_v61  ;;  %v3324_v1 = vsel %vm8794_vm4, %v8624_v21, %v8747_v63  ;;  %v2493_v61 = vsub.f32 1.0, %v8769_v34  ;;  %v2439_v10 = vsel %vm8816_vm5, %v8634_v49, %v2435_v26  ;;  %v2450_v21 = vadd.f32 %v8659_v62, %v2449_v41 }
 0x2bc   : > { %v1844_v13 = vadd.f32 %v1843_v14, %v1794_v50  ;;  %v8802_v55 = vadd.f32 %v10593_v17, %v10592_v20  ;;  %v1892_v24 = vpop.f32.mrf.mxu2  ;;  %v5716_v50 = vld [vmem:[%s6711_s29 + $0xc] sm:$0xf0]  ;;  %v10596_v63 = vand.u32 2147483647, %v8588_v48  ;;  %v2507_v34 = vmul.f32 %v8773_v22, %v8675_v51  ;;  %v10599_v14 = vld [vmem:[#allocation74_spill] sm:$0xff] }
 0x2bd   : > { %v1941_v35 = vpop.f32.mrf.mxu3  ;;  %v5255_v18 = vmul.f32 -1.442695, %v10599_v14  ;;  %v5307_v42 = vor.u32 %v5714_v45, %v5304_v56  ;;  %vm2496_vm7 = vweird.f32 %v8647_v2  ;;  %v2567_v41 = vmul.f32 %v8806_v36, %v8705_v27  ;;  %v10604_v56 = vld [vmem:[#allocation37_spill] sm:$0xff] }
 0x2be   : > { %v3477_v44 = vmul.f32 %v8602_v57, %v1844_v13  ;;  %v1942_v11 = vadd.f32 %v1941_v35, %v1892_v24  ;;  %vm8830_vm6 = vcmp.eq.f32.partialorder %v10596_v63, 8.507059e+37  ;;  %v2552_v57 = vmul.f32 %v8778_v54, %v8679_v9  ;;  %v6069_v49 = vpop.eup %6068  ;;  %v1797_v35 = vpop.f32.mrf.mxu0 }
 0x2bf   : > { %6072 = vpow2.f32 %v5254_v5  ;;  %v5258_v20 = vmul.f32 -1.442695, %v8802_v55  ;;  %v5303_v17 = vor.u32 %v5716_v50, %v5302_v23  ;;  %v8848_v24 = vmul.f32 %v3314_v33, %v8350_v25 }
 0x2c0   : > { %v3478_v13 = vmul.f32 %v8616_v60, %v1942_v11  ;;  %v8841_v26 = vpack.c.bf16 %v3477_v44, %v8717_v46  ;;  %v3329_v60 = vsel %vm8751_vm15, %v8655_v58, %v3324_v1  ;;  %v2515_v5 = vand.u32 2147483647, %v8675_v51  ;;  %v6071_v25 = vpop.eup %6070  ;;  %v10605_v44 = vld [vmem:[#allocation38_spill] sm:$0xff]  ;;  %2036 = vmatmul.bf16.gmra.mxu1 %v10581_v28 }
 0x2c1   : > { %v2444_v43 = vsel %vm8763_vm2, %v8703_v12, %v2439_v10  ;;  %v2454_v58 = vsel %vm8857_vm8, %v8659_v62, %v2450_v21  ;;  %v2494_v48 = vmul.f32 %v8719_v3, %v2493_v61  ;;  %vm2497_vm9 = vweird.f32 %v8719_v3  ;;  %2090 = vmatmul.bf16.gmra.mxu2 %v10604_v56  ;;  %2139 = vmatmul.bf16.gmra.mxu3 %v10605_v44  ;;  %v10606_v62 = vld [vmem:[#allocation76_spill] sm:$0xff] }
 0x2c2   : > { %10600 = vst [vmem:[#allocation29_spill] sm:$0xff] %v8841_v26  ;;  %v8863_v45 = vpack.c.bf16 %v3478_v13, %v8738_v7  ;;  %v2508_v1 = vsub.f32 1.0, %v2507_v34  ;;  %v8874_v30 = vadd.f32 1.0, %v6069_v49  ;;  %6074 = vpow2.f32 %v5255_v18  ;;  %v5717_v49 = vld [vmem:[%s6711_s29 + $0x14] sm:$0xf0]  ;;  %vm8912_vm12 = vmor %vm2496_vm7, %vm2497_vm9 }
 0x2c3   : > { %v1846_v33 = vpop.f32.mrf.mxu1  ;;  %3993 = vmatpush.bf16.xpose.msra.mxu1 %v5307_v42  ;;  %vm2511_vm10 = vweird.f32 %v8675_v51  ;;  %v2553_v12 = vsub.f32 1.0, %v2552_v57  ;;  %v2568_v15 = vsub.f32 1.0, %v2567_v41  ;;  %6076 = vpow2.f32 %v5258_v20  ;;  %3944 = vmatpush.bf16.xpose.msra.mxu0 %v5303_v17  ;;  %v5715_v41 = vld [vmem:[%s6711_s29 + $0xc] sm:$0xf] }
 0x2c4   : > { %10603 = vst [vmem:[#allocation30_spill] sm:$0xff] %v8863_v45  ;;  %v1847_v7 = vadd.f32 %v1846_v33, %v1797_v35  ;;  %v5259_v61 = vmul.f32 -1.442695, %v10606_v62  ;;  %v1895_v11 = vpop.f32.mrf.mxu2  ;;  %v2517_v50 = vand.u32 2147483648, %v8675_v51  ;;  %v8880_v10 = vadd.f32 1.0, %v6071_v25  ;;  %1992 = vmatmul.bf16.gmra.mxu0 %v10604_v56 }
 0x2c5   : > { %v1944_v23 = vpop.f32.mrf.mxu3  ;;  %v6073_v34 = vpop.eup %6072  ;;  %v3422_v57 = vmul.f32 %v3329_v60, %v10531_v4  ;;  %v8887_v18 = vmul.f32 %v2444_v43, %v10534_v40  ;;  %v8890_v13 = vadd.f32 %v8719_v3, %v2494_v48  ;;  %vm2512_vm11 = vweird.f32 %v8773_v22  ;;  %v5310_v40 = vld [vmem:[%s6711_s29 + $0x8] sm:$0xf] }
 0x2c6   : > { %v8883_v21 = vmul.f32 %v8619_v8, %v1847_v7  ;;  %v1945_v63 = vadd.f32 %v1944_v23, %v1895_v11  ;;  %v8896_v42 = vsel %vm8830_vm6, %v8730_v38, %v2454_v58  ;;  %v2509_v8 = vmul.f32 %v8773_v22, %v2508_v1  ;;  %v1799_v35 = vpop.f32.mrf.mxu0  ;;  %vm8951_vm2 = vmor %vm2511_vm10, %vm2512_vm11 }
 0x2c7   : > { %6078 = vrcp.f32 %v8874_v30  ;;  %v2554_v20 = vmul.f32 %v8778_v54, %v2553_v12  ;;  %v2569_v17 = vmul.f32 %v8806_v36, %v2568_v15  ;;  %v5311_v60 = vor.u32 %v5717_v49, %v5310_v40 }
 0x2c8   : > { %v3482_v4 = vmul.f32 %v8781_v32, %v1945_v63  ;;  %6080 = vpow2.f32 %v5259_v61  ;;  %v6075_v38 = vpop.eup %6074  ;;  %v2518_v32 = vor.u32 1.1754944e-38, %v2517_v50  ;;  %v8917_v28 = vadd.f32 1.0, %v6073_v34 }
 0x2c9   : > { %6082 = vrcp.f32 %v8880_v10  ;;  %v5315_v25 = vor.u32 %v5715_v41, %v5312_v29  ;;  %v6077_v43 = vpop.eup %6076  ;;  %v2499_v58 = vsel %vm8912_vm12, %v8719_v3, %v8890_v13  ;;  %v10609_v48 = vand.u32 2147483647, %v8647_v2  ;;  %4042 = vmatpush.bf16.xpose.msra.mxu2 %v5311_v60 }
 0x2ca   : > { %vm8929_vm14 = vcmp.eq.f32.partialorder %v2515_v5, 8.507059e+37  ;;  %vm2556_vm15 = vweird.f32 %v8679_v9  ;;  %v2560_v7 = vand.u32 2147483647, %v8679_v9  ;;  %v2562_v12 = vand.u32 2147483648, %v8679_v9  ;;  %v5775_v9 = vld [vmem:[%s6711_s29 + $0x1ec] sm:$0xf] }
 0x2cb   : > { %vm8925_vm13 = vcmp.eq.f32.partialorder %v10609_v48, 8.507059e+37  ;;  %v1848_v15 = vpop.f32.mrf.mxu1  ;;  %v2510_v3 = vadd.f32 %v8773_v22, %v2509_v8  ;;  %vm2557_vm0 = vweird.f32 %v8778_v54  ;;  %v2577_v2 = vand.u32 2147483648, %v8705_v27  ;;  %4091 = vmatpush.bf16.xpose.msra.mxu3 %v5315_v25  ;;  %v10623_v48 = vld [vmem:[#allocation78_spill] sm:$0xff] }
 0x2cc   : > { %v1849_v5 = vadd.f32 %v1848_v15, %v1799_v35  ;;  %v2555_v61 = vadd.f32 %v8778_v54, %v2554_v20  ;;  %v2570_v11 = vadd.f32 %v8806_v36, %v2569_v17  ;;  %vm2572_vm1 = vweird.f32 %v8806_v36  ;;  %v1897_v50 = vpop.f32.mrf.mxu2  ;;  %vm8963_vm3 = vmor %vm2556_vm15, %vm2557_vm0  ;;  %v10618_v17 = vld [vmem:[#allocation77_spill] sm:$0xff]  ;;  %v10625_v15 = vld [vmem:[#allocation75_spill] sm:$0xff] }
 0x2cd   : > { %v8943_v23 = vadd.f32 1.0, %v6075_v38  ;;  %v1946_v63 = vpop.f32.mrf.mxu3  ;;  %v8945_v34 = vpop.eup %6078  ;;  %6084 = vrcp.f32 %v8917_v28  ;;  %v8956_v13 = vadd.f32 1.0, %v6077_v43  ;;  %v2563_v51 = vor.u32 1.1754944e-38, %v2562_v12 }
 0x2ce   : > { %v3485_v8 = vmul.f32 %v8848_v24, %v1849_v5  ;;  %v1947_v40 = vadd.f32 %v1946_v63, %v1897_v50  ;;  %v6081_v49 = vpop.eup %6080  ;;  %vm2571_vm4 = vweird.f32 %v8705_v27  ;;  %v2575_v20 = vand.u32 2147483647, %v8705_v27 }
 0x2cf   : > { %v5262_v60 = vmul.f32 -1.442695, %v10618_v17  ;;  %v8970_v29 = vpop.eup %6082  ;;  %v2514_v24 = vsel %vm8951_vm2, %v8773_v22, %v2510_v3  ;;  %vm8977_vm5 = vmor %vm2571_vm4, %vm2572_vm1  ;;  %v2578_v38 = vor.u32 1.1754944e-38, %v2577_v2  ;;  %v2559_v27 = vsel %vm8963_vm3, %v8778_v54, %v2555_v61 }
 0x2d0   : > { %v3486_v46 = vmul.f32 %v3422_v57, %v1947_v40  ;;  %v8982_v35 = vpack.c.bf16 %v3485_v8, %v8883_v21  ;;  %v2574_v25 = vsel %vm8977_vm5, %v8806_v36, %v2570_v11  ;;  %v2622_v22 = vand.u32 2147483648, %v8874_v30  ;;  %v10624_v36 = vld [vmem:[#allocation72_spill] sm:$0xff]  ;;  %2041 = vmatmul.bf16.gmra.mxu1 %v10605_v44  ;;  %v5776_v44 = vld [vmem:[%s6711_s29 + $0x1ec] sm:$0xf0] }
 0x2d1   : > { %6086 = vrcp.f32 %v8943_v23  ;;  %v2612_v43 = vmul.f32 %v8945_v34, %v8874_v30  ;;  %v8995_v57 = vadd.f32 1.0, %v6081_v49  ;;  %v2627_v54 = vmul.f32 %v8970_v29, %v8880_v10 }
 0x2d2   : > { %10621 = vst [vmem:[#allocation60_spill] sm:$0xff] %v8982_v35  ;;  %6088 = vrcp.f32 %v8956_v13  ;;  %v8997_v21 = vpack.c.bf16 %v3486_v46, %v3482_v4  ;;  %v5263_v12 = vmul.f32 -1.442695, %v10623_v48  ;;  %v9004_v3 = vadd.f32 %v10625_v15, %v10624_v36  ;;  %v5552_v46 = vld [vmem:[%s6711_s29 + $0x1f8] sm:$0xf0] }
 0x2d3   : > { %6090 = vpow2.f32 %v5262_v60  ;;  %v9006_v2 = vpop.eup %6084  ;;  %v2504_v5 = vsel %vm8925_vm13, %v8784_v19, %v2499_v58  ;;  %v2519_v4 = vsel %vm8929_vm14, %v2518_v32, %v2514_v24  ;;  %vm2561_vm6 = vcmp.eq.f32.partialorder %v2560_v7, 8.507059e+37  ;;  %v5550_v60 = vld [vmem:[%s6711_s29 + $0x1e8] sm:$0xf]  ;;  %v5777_v24 = vld [vmem:[%s6711_s29 + $0x1f4] sm:$0xf0] }
 0x2d4   : > { %10622 = vst [vmem:[#allocation44_spill] sm:$0xff] %v8997_v21  ;;  %vm2576_vm7 = vcmp.eq.f32.partialorder %v2575_v20, 8.507059e+37  ;;  %v2564_v61 = vsel %vm2561_vm6, %v2563_v51, %v2559_v27  ;;  %v2620_v50 = vand.u32 2147483647, %v8874_v30  ;;  %v2635_v63 = vand.u32 2147483647, %v8880_v10  ;;  %v2056_v19 = vpop.f32.mrf.mxu2  ;;  %3945 = vmatmul.bf16.vlgmr.msra.gmra.mxu0 %v8084_v53 }
 0x2d5   : > { %v2579_v11 = vsel %vm2576_vm7, %v2578_v38, %v2574_v25  ;;  %v2613_v56 = vsub.f32 1.0, %v2612_v43  ;;  %v9015_v8 = vor.u32 1.1754944e-38, %v2622_v22  ;;  %v2637_v40 = vand.u32 2147483648, %v8880_v10  ;;  %v2105_v7 = vpop.f32.mrf.mxu3  ;;  %v5542_v27 = vld [vmem:[%s6711_s29 + $0x1e0] sm:$0xf] }
 0x2d6   : > { %6092 = vrcp.f32 %v8995_v57  ;;  %v2628_v58 = vsub.f32 1.0, %v2627_v54  ;;  %v2672_v33 = vmul.f32 %v9006_v2, %v8917_v28  ;;  %v5266_v1 = vmul.f32 -1.442695, %v9004_v3  ;;  %v5770_v21 = vld [vmem:[%s6711_s29 + $0x1c4] sm:$0xf] }
 0x2d7   : > { %v9019_v32 = vpop.eup %6086  ;;  %6094 = vpow2.f32 %v5263_v12  ;;  %v9028_v41 = vmul.f32 %v8896_v42, %v10540_v59  ;;  %v9031_v51 = vmul.f32 %v2504_v5, %v8482_v31  ;;  %v9034_v20 = vmul.f32 %v2519_v4, %v10564_v37  ;;  %v9048_v31 = vpop.f32.mrf.mxu0  ;;  %v5774_v12 = vld [vmem:[%s6711_s29 + $0x1e4] sm:$0xf]  ;;  %v5528_v35 = vld [vmem:[%s6711_s29 + $0x1d0] sm:$0xf0] }
 0x2d8   : > { %v9024_v49 = vpop.eup %6088  ;;  %vm2616_vm8 = vweird.f32 %v8874_v30  ;;  %v9042_v59 = vmul.f32 %v2564_v61, %v10566_v47  ;;  %v9045_v42 = vmul.f32 %v2579_v11, %v10567_v6  ;;  %vm2631_vm9 = vweird.f32 %v8880_v10  ;;  %v5544_v47 = vld [vmem:[%s6711_s29 + $0x1f0] sm:$0xf0] }
 0x2d9   : > { %v6091_v38 = vpop.eup %6090  ;;  %v5551_v37 = vor.u32 %v5777_v24, %v5550_v60  ;;  %v2614_v25 = vmul.f32 %v8945_v34, %v2613_v56  ;;  %v2682_v22 = vand.u32 2147483648, %v8917_v28  ;;  %v5555_v43 = vor.u32 %v5775_v9, %v5552_v46 }
 0x2da   : > { %v5543_v54 = vor.u32 %v5776_v44, %v5542_v27  ;;  %v2629_v36 = vmul.f32 %v8970_v29, %v2628_v58  ;;  %v2673_v6 = vsub.f32 1.0, %v2672_v33  ;;  %v2687_v15 = vmul.f32 %v9019_v32, %v8943_v23 }
 0x2db   : > { %4231 = vmatpush.bf16.xpose.msrb.mxu2 %v5551_v37  ;;  %v5547_v5 = vor.u32 %v5774_v12, %v5544_v47  ;;  %v9062_v61 = vor.u32 1.1754944e-38, %v2637_v40  ;;  %v2680_v11 = vand.u32 2147483647, %v8917_v28  ;;  %v2732_v56 = vmul.f32 %v9024_v49, %v8956_v13  ;;  %4280 = vmatpush.bf16.xpose.msrb.mxu3 %v5555_v43  ;;  %v10628_v40 = vld [vmem:[#allocation81_spill] sm:$0xff]  ;;  %v5536_v47 = vld [vmem:[%s6711_s29 + $0x1d8] sm:$0xf0] }
 0x2dc   : > { %v9060_v4 = vpop.eup %6092  ;;  %v9067_v60 = vadd.f32 1.0, %v6091_v38  ;;  %vm2617_vm10 = vweird.f32 %v8945_v34  ;;  %vm9071_vm11 = vcmp.eq.f32.partialorder %v2620_v50, 8.507059e+37  ;;  %vm2632_vm12 = vweird.f32 %v8970_v29  ;;  %4133 = vmatpush.bf16.xpose.msrb.mxu0 %v5543_v54  ;;  %v2058_v27 = vpop.f32.mrf.mxu2  ;;  %v5772_v50 = vld [vmem:[%s6711_s29 + $0x1cc] sm:$0xf0] }
 0x2dd   : > { %v6095_v58 = vpop.eup %6094  ;;  %6096 = vpow2.f32 %v5266_v1  ;;  %v5267_v24 = vmul.f32 -1.442695, %v10628_v40  ;;  %4182 = vmatpush.bf16.xpose.msrb.mxu1 %v5547_v5  ;;  %v2615_v9 = vadd.f32 %v8945_v34, %v2614_v25  ;;  %vm9078_vm13 = vcmp.eq.f32.partialorder %v2635_v63, 8.507059e+37  ;;  %v2107_v63 = vpop.f32.mrf.mxu3  ;;  %vm9097_vm15 = vmor %vm2616_vm8, %vm2617_vm10 }
 0x2de   : > { %vm2676_vm14 = vweird.f32 %v8917_v28  ;;  %v9083_v37 = vor.u32 1.1754944e-38, %v2682_v22  ;;  %v2106_v46 = vadd.f32 %v2105_v7, %v2056_v19  ;;  %v2630_v1 = vadd.f32 %v8970_v29, %v2629_v36  ;;  %vm9113_vm0 = vmor %vm2631_vm9, %vm2632_vm12 }
 0x2df   : > { %v2674_v44 = vmul.f32 %v9006_v2, %v2673_v6  ;;  %v2688_v43 = vsub.f32 1.0, %v2687_v15  ;;  %v2747_v25 = vmul.f32 %v9060_v4, %v8995_v57  ;;  %v2733_v54 = vsub.f32 1.0, %v2732_v56  ;;  %v9104_v6 = vpop.f32.mrf.mxu0 }
 0x2e0   : > { %6098 = vrcp.f32 %v9067_v60  ;;  %v9091_v12 = vadd.f32 1.0, %v6095_v58  ;;  %v2108_v22 = vadd.f32 %v2107_v63, %v2058_v27  ;;  %v2697_v7 = vand.u32 2147483648, %v8943_v23  ;;  %v2007_v63 = vpop.f32.mrf.mxu1  ;;  %3994 = vmatmul.bf16.vlgmr.msra.gmra.mxu1 %v8095_v39 }
 0x2e1   : > { %v2742_v36 = vand.u32 2147483648, %v8956_v13  ;;  %6100 = vpow2.f32 %v5267_v24  ;;  %v2619_v15 = vsel %vm9097_vm15, %v8945_v34, %v2615_v9  ;;  %vm2677_vm1 = vweird.f32 %v9006_v2 }
 0x2e2   : > { %v3428_v5 = vmul.f32 %v9028_v41, %v2106_v46  ;;  %v3432_v56 = vmul.f32 %v9034_v20, %v2108_v22  ;;  %v2634_v24 = vsel %vm9113_vm0, %v8970_v29, %v2630_v1  ;;  %v2675_v34 = vadd.f32 %v9006_v2, %v2674_v44  ;;  %v10637_v20 = vld [vmem:[#allocation82_spill] sm:$0xff]  ;;  %v10639_v44 = vld [vmem:[#allocation83_spill] sm:$0xff]  ;;  %vm9161_vm7 = vmor %vm2676_vm14, %vm2677_vm1 }
 0x2e3   : > { %v6097_v58 = vpop.eup %6096  ;;  %vm9124_vm2 = vcmp.eq.f32.partialorder %v2680_v11, 8.507059e+37  ;;  %v2689_v10 = vmul.f32 %v9019_v32, %v2688_v43  ;;  %vm2691_vm3 = vweird.f32 %v8943_v23  ;;  %v2748_v27 = vsub.f32 1.0, %v2747_v25 }
 0x2e4   : > { %v2734_v41 = vmul.f32 %v9024_v49, %v2733_v54  ;;  %vm2736_vm4 = vweird.f32 %v8956_v13  ;;  %6102 = vrcp.f32 %v9091_v12  ;;  %v5270_v46 = vmul.f32 -1.442695, %v10637_v20  ;;  %3950 = vmatmul.bf16.gmra.mxu0 %v8188_v16 }
 0x2e5   : > { %v9134_v29 = vpack.c.bf16 %v3432_v56, %v3428_v5  ;;  %vm2692_vm5 = vweird.f32 %v9019_v32  ;;  %v9137_v11 = vor.u32 1.1754944e-38, %v2697_v7  ;;  %v9139_v1 = vor.u32 1.1754944e-38, %v2742_v36  ;;  %v2061_v7 = vpop.f32.mrf.mxu2  ;;  %v2110_v5 = vpop.f32.mrf.mxu3  ;;  %v5534_v56 = vld [vmem:[%s6711_s29 + $0x1c8] sm:$0xf] }
 0x2e6   : > { %v5271_v43 = vmul.f32 -1.442695, %v10639_v44  ;;  %v9142_v25 = vpop.eup %6098  ;;  %v9147_v54 = vsel %vm9071_vm11, %v9015_v8, %v2619_v15  ;;  %vm2751_vm6 = vweird.f32 %v8995_v57  ;;  %v2755_v22 = vand.u32 2147483647, %v8995_v57  ;;  %v10642_v8 = vld [vmem:[#allocation79_spill] sm:$0xff]  ;;  %vm9223_vm12 = vmor %vm2691_vm3, %vm2692_vm5 }
 0x2e7   : > { %10638 = vst [vmem:[#allocation46_spill] sm:$0xff] %v9134_v29  ;;  %v9151_v19 = vadd.f32 1.0, %v6097_v58  ;;  %4092 = vmatmul.bf16.vlgmr.msra.gmra.mxu3 %v9134_v29  ;;  %v6101_v36 = vpop.eup %6100  ;;  %v2639_v30 = vsel %vm9078_vm13, %v9062_v61, %v2634_v24  ;;  %vm2737_vm8 = vweird.f32 %v9024_v49  ;;  %v2749_v33 = vmul.f32 %v9060_v4, %v2748_v27  ;;  %v5773_v58 = vld [vmem:[%s6711_s29 + $0x1d4] sm:$0xf0]  ;;  %v5771_v24 = vld [vmem:[%s6711_s29 + $0x1cc] sm:$0xf] }
 0x2e8   : > { %v2757_v15 = vand.u32 2147483648, %v8995_v57  ;;  %v2679_v61 = vsel %vm9161_vm7, %v9006_v2, %v2675_v34  ;;  %v9172_v28 = vadd.f32 %v9019_v32, %v2689_v10  ;;  %v9175_v38 = vadd.f32 %v9024_v49, %v2734_v41  ;;  %v10643_v2 = vld [vmem:[#allocation80_spill] sm:$0xff]  ;;  %v9187_v10 = vpop.f32.mrf.mxu0  ;;  %vm9241_vm14 = vmor %vm2736_vm4, %vm2737_vm8 }
 0x2e9   : > { %6104 = vpow2.f32 %v5270_v46  ;;  %v2792_v27 = vmul.f32 %v9142_v25, %v9067_v60  ;;  %v9185_v34 = vadd.f32 %v10643_v2, %v10642_v8  ;;  %v5535_v41 = vor.u32 %v5773_v58, %v5534_v56  ;;  %v5526_v46 = vld [vmem:[%s6711_s29 + $0x1c0] sm:$0xf]  ;;  %v10658_v57 = vld [vmem:[#allocation84_spill] sm:$0xff] }
 0x2ea   : > { %6106 = vpow2.f32 %v5271_v43  ;;  %v9192_v39 = vpop.eup %6102  ;;  %v10644_v29 = vand.u32 2147483647, %v8943_v23  ;;  %v9201_v43 = vadd.f32 1.0, %v6101_v36  ;;  %v5539_v8 = vor.u32 %v5771_v24, %v5536_v47 }
 0x2eb   : > { %6108 = vrcp.f32 %v9151_v19  ;;  %v5527_v2 = vor.u32 %v5772_v50, %v5526_v46  ;;  %v3376_v56 = vmul.f32 %v2639_v30, %v10573_v0  ;;  %v10647_v58 = vand.u32 2147483647, %v8956_v13  ;;  %4232 = vmatpush.bf16.xpose.msrb.mxu2 %v5535_v41 }
 0x2ec   : > { %vm9196_vm9 = vcmp.eq.f32.partialorder %v10644_v29, 8.507059e+37  ;;  %v2750_v29 = vadd.f32 %v9060_v4, %v2749_v33  ;;  %vm2752_vm11 = vweird.f32 %v9060_v4  ;;  %v5531_v26 = vor.u32 %v5770_v21, %v5528_v35  ;;  %4281 = vmatpush.bf16.xpose.msrb.mxu3 %v5539_v8 }
 0x2ed   : > { %vm9208_vm10 = vcmp.eq.f32.partialorder %v10647_v58, 8.507059e+37  ;;  %v9217_v50 = vsel %vm9124_vm2, %v9083_v37, %v2679_v61  ;;  %vm9227_vm13 = vcmp.eq.f32.partialorder %v2755_v22, 8.507059e+37  ;;  %v2758_v36 = vor.u32 1.1754944e-38, %v2757_v15  ;;  %4134 = vmatpush.bf16.xpose.msrb.mxu0 %v5527_v2  ;;  %vm9256_vm15 = vmor %vm2751_vm6, %vm2752_vm11  ;;  %v2112_v24 = vpop.f32.mrf.mxu3 }
 0x2ee   : > { %v2008_v35 = vadd.f32 %v2007_v63, %v9048_v31  ;;  %v2694_v21 = vsel %vm9223_vm12, %v9019_v32, %v9172_v28  ;;  %v2793_v37 = vsub.f32 1.0, %v2792_v27  ;;  %v2807_v31 = vmul.f32 %v9192_v39, %v9091_v12  ;;  %v2009_v63 = vpop.f32.mrf.mxu1  ;;  %4183 = vmatpush.bf16.xpose.msrb.mxu1 %v5531_v26  ;;  %v2063_v26 = vpop.f32.mrf.mxu2 }
 0x2ef   : > { %v5274_v9 = vmul.f32 -1.442695, %v9185_v34  ;;  %v6105_v22 = vpop.eup %6104  ;;  %v2739_v32 = vsel %vm9241_vm14, %v9024_v49, %v9175_v38  ;;  %6110 = vrcp.f32 %v9201_v43  ;;  %v2010_v30 = vadd.f32 %v2009_v63, %v9104_v6 }
 0x2f0   : > { %v2111_v33 = vadd.f32 %v2110_v5, %v2061_v7  ;;  %v6107_v15 = vpop.eup %6106  ;;  %v2754_v61 = vsel %vm9256_vm15, %v9060_v4, %v2750_v29  ;;  %v2800_v49 = vand.u32 2147483647, %v9067_v60  ;;  %v2802_v28 = vand.u32 2147483648, %v9067_v60  ;;  %v9276_v2 = vpop.f32.mrf.mxu0 }
 0x2f1   : > { %v5275_v38 = vmul.f32 -1.442695, %v10658_v57  ;;  %v9268_v27 = vpop.eup %6108  ;;  %v2817_v41 = vand.u32 2147483648, %v9091_v12  ;;  %v3427_v6 = vmul.f32 %v8887_v18, %v2008_v35  ;;  %v3431_v7 = vmul.f32 %v9031_v51, %v2010_v30  ;;  %v10663_v30 = vld [vmem:[#allocation87_spill] sm:$0xff] }
 0x2f2   : > { %v2113_v5 = vadd.f32 %v2112_v24, %v2063_v26  ;;  %v2794_v46 = vmul.f32 %v9142_v25, %v2793_v37  ;;  %v2808_v8 = vsub.f32 1.0, %v2807_v31  ;;  %v9274_v4 = vadd.f32 1.0, %v6105_v22  ;;  %v5518_v24 = vld [vmem:[%s6711_s29 + $0x1a8] sm:$0xf] }
 0x2f3   : > { %6112 = vpow2.f32 %v5274_v9  ;;  %v9278_v58 = vadd.f32 1.0, %v6107_v15  ;;  %v9280_v29 = vpack.c.bf16 %v3431_v7, %v3427_v6  ;;  %v3436_v0 = vmul.f32 %v9045_v42, %v2111_v33  ;;  %v10664_v15 = vld [vmem:[#allocation24_spill] sm:$0xff] }
 0x2f4   : > { %v3440_v23 = vmul.f32 %v3376_v56, %v2113_v5  ;;  %v2699_v18 = vsel %vm9196_vm9, %v9137_v11, %v2694_v21  ;;  %vm2796_vm0 = vweird.f32 %v9067_v60  ;;  %v9289_v51 = vmul.f32 %v9268_v27, %v9151_v19  ;;  %v5767_v6 = vld [vmem:[%s6711_s29 + $0x1ac] sm:$0xf]  ;;  %v5510_v5 = vld [vmem:[%s6711_s29 + $0x1a0] sm:$0xf] }
 0x2f5   : > { %6114 = vpow2.f32 %v5275_v38  ;;  %v9291_v35 = vpop.eup %6110  ;;  %v2744_v37 = vsel %vm9208_vm10, %v9139_v1, %v2739_v32  ;;  %vm2797_vm1 = vweird.f32 %v9142_v25  ;;  %vm9297_vm2 = vcmp.eq.f32.partialorder %v2800_v49, 8.507059e+37  ;;  %4043 = vmatmul.bf16.vlgmr.msra.gmra.mxu2 %v9280_v29  ;;  %v2115_v26 = vpop.f32.mrf.mxu3  ;;  %v10665_v38 = vld [vmem:[#allocation50_spill] sm:$0xff] }
 0x2f6   : > { %v9302_v53 = vpack.c.bf16 %v3440_v23, %v3436_v0  ;;  %v2759_v11 = vsel %vm9227_vm13, %v2758_v36, %v2754_v61  ;;  %v2795_v56 = vadd.f32 %v9142_v25, %v2794_v46  ;;  %v2803_v21 = vor.u32 1.1754944e-38, %v2802_v28  ;;  %v2012_v45 = vpop.f32.mrf.mxu1  ;;  %v2066_v47 = vpop.f32.mrf.mxu2  ;;  %vm9318_vm3 = vmor %vm2796_vm0, %vm2797_vm1  ;;  %3999 = vmatmul.bf16.gmra.mxu1 %v10665_v38  ;;  %v5768_v46 = vld [vmem:[%s6711_s29 + $0x1ac] sm:$0xf0] }
 0x2f7   : > { %6116 = vrcp.f32 %v9274_v4  ;;  %v2809_v1 = vmul.f32 %v9192_v39, %v2808_v8  ;;  %v2815_v31 = vand.u32 2147483647, %v9091_v12  ;;  %v9310_v9 = vor.u32 1.1754944e-38, %v2817_v41  ;;  %v5769_v41 = vld [vmem:[%s6711_s29 + $0x1b4] sm:$0xf0] }
 0x2f8   : > { %6118 = vrcp.f32 %v9278_v58  ;;  %4097 = vmatmul.bf16.gmra.mxu3 %v9302_v53  ;;  %v2853_v22 = vsub.f32 1.0, %v9289_v51  ;;  %v2862_v32 = vand.u32 2147483648, %v9151_v19  ;;  %v2867_v13 = vmul.f32 %v9291_v35, %v9201_v43 }
 0x2f9   : > { %v6113_v36 = vpop.eup %6112  ;;  %v5278_v33 = vmul.f32 -1.442695, %v10663_v30  ;;  %v3375_v61 = vmul.f32 %v9147_v54, %v10664_v15  ;;  %v9331_v60 = vmul.f32 %v9217_v50, %v10591_v52  ;;  %v9334_v49 = vmul.f32 %v2699_v18, %v10599_v14  ;;  %v9348_v14 = vpop.f32.mrf.mxu0  ;;  %v5520_v50 = vld [vmem:[%s6711_s29 + $0x1b8] sm:$0xf0]  ;;  %v5766_v18 = vld [vmem:[%s6711_s29 + $0x1a4] sm:$0xf] }
 0x2fa   : > { %v9337_v28 = vmul.f32 %v2744_v37, %v8802_v55  ;;  %v3384_v54 = vmul.f32 %v2759_v11, %v10606_v62  ;;  %v2799_v52 = vsel %vm9318_vm3, %v9142_v25, %v2795_v56  ;;  %vm2811_vm4 = vweird.f32 %v9091_v12  ;;  %v5512_v25 = vld [vmem:[%s6711_s29 + $0x1b0] sm:$0xf0] }
 0x2fb   : > { %v6115_v7 = vpop.eup %6114  ;;  %v5519_v55 = vor.u32 %v5769_v41, %v5518_v24  ;;  %v2810_v8 = vadd.f32 %v9192_v39, %v2809_v1  ;;  %vm2812_vm5 = vweird.f32 %v9192_v39  ;;  %vm9355_vm6 = vcmp.eq.f32.partialorder %v2815_v31, 8.507059e+37 }
 0x2fc   : > { %v5523_v62 = vor.u32 %v5767_v6, %v5520_v50  ;;  %v5511_v23 = vor.u32 %v5768_v46, %v5510_v5  ;;  %vm2856_vm7 = vweird.f32 %v9151_v19  ;;  %v2860_v37 = vand.u32 2147483647, %v9151_v19  ;;  %v10668_v6 = vld [vmem:[#allocation53_spill] sm:$0xff]  ;;  %vm9383_vm8 = vmor %vm2811_vm4, %vm2812_vm5 }
 0x2fd   : > { %v9361_v51 = vpop.eup %6116  ;;  %v2868_v11 = vsub.f32 1.0, %v2867_v13  ;;  %v9365_v56 = vadd.f32 1.0, %v6113_v36  ;;  %4233 = vmatpush.bf16.xpose.msrb.mxu2 %v5519_v55  ;;  %v5515_v1 = vor.u32 %v5766_v18, %v5512_v25  ;;  %v9371_v31 = vsel %vm9297_vm2, %v2803_v21, %v2799_v52  ;;  %3955 = vmatmul.bf16.gmra.mxu0 %v10668_v6  ;;  %v2117_v46 = vpop.f32.mrf.mxu3 }
 0x2fe   : > { %v9367_v63 = vpop.eup %6118  ;;  %v9373_v15 = vor.u32 1.1754944e-38, %v2862_v32  ;;  %v9375_v24 = vadd.f32 1.0, %v6115_v7  ;;  %v2013_v41 = vadd.f32 %v2012_v45, %v9187_v10  ;;  %4282 = vmatpush.bf16.xpose.msrb.mxu3 %v5523_v62  ;;  %v2854_v42 = vmul.f32 %v9268_v27, %v2853_v22  ;;  %v10671_v32 = vld [vmem:[#allocation88_spill] sm:$0xff]  ;;  %v2014_v7 = vpop.f32.mrf.mxu1  ;;  %4135 = vmatpush.bf16.xpose.msrb.mxu0 %v5511_v23 }
 0x2ff   : > { %v2875_v21 = vand.u32 2147483647, %v9201_v43  ;;  %6120 = vpow2.f32 %v5278_v33  ;;  %v5279_v13 = vmul.f32 -1.442695, %v10671_v32  ;;  %4184 = vmatpush.bf16.xpose.msrb.mxu1 %v5515_v1  ;;  %v2814_v10 = vsel %vm9383_vm8, %v9192_v39, %v2810_v8  ;;  %v2068_v52 = vpop.f32.mrf.mxu2  ;;  %v10674_v39 = vld [vmem:[#allocation92_spill] sm:$0xff] }
 0x300   : > { %vm2871_vm9 = vweird.f32 %v9201_v43  ;;  %v2912_v12 = vmul.f32 %v9361_v51, %v9274_v4  ;;  %v2015_v45 = vadd.f32 %v2014_v7, %v9276_v2  ;;  %v2116_v22 = vadd.f32 %v2115_v26, %v2066_v47 }
 0x301   : > { %vm9397_vm10 = vcmp.eq.f32.partialorder %v2860_v37, 8.507059e+37  ;;  %v2869_v55 = vmul.f32 %v9291_v35, %v2868_v11  ;;  %v2927_v50 = vmul.f32 %v9367_v63, %v9278_v58  ;;  %6122 = vrcp.f32 %v9365_v56  ;;  %v9411_v23 = vpop.f32.mrf.mxu0 }
 0x302   : > { %v5283_v5 = vmul.f32 -1.442695, %v10674_v39  ;;  %6124 = vrcp.f32 %v9375_v24  ;;  %v3435_v2 = vmul.f32 %v9042_v59, %v2013_v41  ;;  %v3439_v47 = vmul.f32 %v3375_v61, %v2015_v45 }
 0x303   : > { %v2118_v26 = vadd.f32 %v2117_v46, %v2068_v52  ;;  %v2855_v8 = vadd.f32 %v9268_v27, %v2854_v42  ;;  %vm2857_vm11 = vweird.f32 %v9268_v27  ;;  %v2877_v62 = vand.u32 2147483648, %v9201_v43 }
 0x304   : > { %6126 = vpow2.f32 %v5279_v13  ;;  %v2922_v18 = vand.u32 2147483648, %v9274_v4  ;;  %v9414_v25 = vpack.c.bf16 %v3439_v47, %v3435_v2  ;;  %v3444_v37 = vmul.f32 %v9334_v49, %v2116_v22  ;;  %vm9427_vm13 = vmor %vm2856_vm7, %vm2857_vm11 }
 0x305   : > { %v3448_v11 = vmul.f32 %v3384_v54, %v2118_v26  ;;  %v6121_v1 = vpop.eup %6120  ;;  %v2819_v59 = vsel %vm9355_vm6, %v9310_v9, %v2814_v10  ;;  %vm9420_vm12 = vcmp.eq.f32.partialorder %v2875_v21, 8.507059e+37  ;;  %v2913_v41 = vsub.f32 1.0, %v2912_v12  ;;  %v2120_v47 = vpop.f32.mrf.mxu3 }
 0x306   : > { %10675 = vst [vmem:[#allocation54_spill] sm:$0xff] %v9414_v25  ;;  %v2937_v36 = vand.u32 2147483648, %v9278_v58  ;;  %6128 = vpow2.f32 %v5283_v5  ;;  %v2870_v49 = vadd.f32 %v9291_v35, %v2869_v55  ;;  %vm2872_vm14 = vweird.f32 %v9291_v35  ;;  %4048 = vmatmul.bf16.gmra.mxu2 %v9414_v25  ;;  %v2017_v7 = vpop.f32.mrf.mxu1  ;;  %v5496_v25 = vld [vmem:[%s6711_s29 + $0x190] sm:$0xf0] }
 0x307   : > { %v2928_v54 = vsub.f32 1.0, %v2927_v50  ;;  %v9434_v9 = vpack.c.bf16 %v3448_v11, %v3444_v37  ;;  %v9436_v0 = vpop.eup %6122  ;;  %v2859_v21 = vsel %vm9427_vm13, %v9268_v27, %v2855_v8  ;;  %v2878_v19 = vor.u32 1.1754944e-38, %v2877_v62  ;;  %v2071_v27 = vpop.f32.mrf.mxu2  ;;  %vm9458_vm0 = vmor %vm2871_vm9, %vm2872_vm14  ;;  %v10683_v62 = vld [vmem:[#allocation28_spill] sm:$0xff]  ;;  %v5765_v37 = vld [vmem:[%s6711_s29 + $0x194] sm:$0xf0] }
 0x308   : > { %vm2916_vm15 = vweird.f32 %v9274_v4  ;;  %v2920_v13 = vand.u32 2147483647, %v9274_v4  ;;  %v9443_v10 = vpop.eup %6124  ;;  %v9446_v12 = vmul.f32 %v2819_v59, %v10623_v48  ;;  %v9448_v45 = vor.u32 1.1754944e-38, %v2922_v18  ;;  %4004 = vmatmul.bf16.gmra.mxu1 %v10683_v62  ;;  %v5502_v18 = vld [vmem:[%s6711_s29 + $0x188] sm:$0xf]  ;;  %v10684_v59 = vld [vmem:[#allocation85_spill] sm:$0xff] }
 0x309   : > { %10680 = vst [vmem:[#allocation55_spill] sm:$0xff] %v9434_v9  ;;  %v2935_v22 = vand.u32 2147483647, %v9278_v58  ;;  %v9451_v52 = vadd.f32 1.0, %v6121_v1  ;;  %4102 = vmatmul.bf16.gmra.mxu3 %v9434_v9  ;;  %v2914_v50 = vmul.f32 %v9361_v51, %v2913_v41  ;;  %vm2931_vm1 = vweird.f32 %v9278_v58  ;;  %v5763_v11 = vld [vmem:[%s6711_s29 + $0x18c] sm:$0xf] }
 0x30a   : > { %v6127_v55 = vpop.eup %6126  ;;  %v9464_v5 = vor.u32 1.1754944e-38, %v2937_v36  ;;  %v2982_v2 = vand.u32 2147483648, %v9365_v56  ;;  %v9471_v43 = vsel %vm9397_vm10, %v9373_v15, %v2859_v21  ;;  %v2874_v26 = vsel %vm9458_vm0, %v9291_v35, %v2870_v49  ;;  %v10685_v35 = vld [vmem:[#allocation86_spill] sm:$0xff]  ;;  %v9490_v36 = vpop.f32.mrf.mxu0  ;;  %v5764_v21 = vld [vmem:[%s6711_s29 + $0x18c] sm:$0xf0] }
 0x30b   : > { %vm2917_vm2 = vweird.f32 %v9361_v51  ;;  %v2929_v8 = vmul.f32 %v9367_v63, %v2928_v54  ;;  %v2972_v15 = vmul.f32 %v9436_v0, %v9365_v56  ;;  %v2987_v1 = vmul.f32 %v9443_v10, %v9375_v24  ;;  %v5504_v49 = vld [vmem:[%s6711_s29 + $0x198] sm:$0xf0]  ;;  %v5494_v54 = vld [vmem:[%s6711_s29 + $0x180] sm:$0xf]  ;;  %v5762_v9 = vld [vmem:[%s6711_s29 + $0x184] sm:$0xf] }
 0x30c   : > { %v6129_v33 = vpop.eup %6128  ;;  %v9488_v41 = vadd.f32 %v10685_v35, %v10684_v59  ;;  %v5503_v42 = vor.u32 %v5765_v37, %v5502_v18  ;;  %6130 = vrcp.f32 %v9451_v52  ;;  %v9496_v48 = vadd.f32 1.0, %v6127_v55  ;;  %vm9526_vm7 = vmor %vm2916_vm15, %vm2917_vm2  ;;  %v10710_v55 = vld [vmem:[#allocation27_spill] sm:$0xff] }
 0x30d   : > { %v5507_v46 = vor.u32 %v5763_v11, %v5504_v49  ;;  %v5495_v62 = vor.u32 %v5764_v21, %v5494_v54  ;;  %v2915_v6 = vadd.f32 %v9361_v51, %v2914_v50  ;;  %vm2932_vm3 = vweird.f32 %v9367_v63  ;;  %v10690_v49 = vld [vmem:[#allocation42_spill] sm:$0xff] }
 0x30e   : > { %v9502_v59 = vor.u32 1.1754944e-38, %v2982_v2  ;;  %4234 = vmatpush.bf16.xpose.msrb.mxu2 %v5503_v42  ;;  %v5499_v35 = vor.u32 %v5762_v9, %v5496_v25  ;;  %v2879_v18 = vsel %vm9420_vm12, %v2878_v19, %v2874_v26  ;;  %vm9506_vm4 = vcmp.eq.f32.partialorder %v2920_v13, 8.507059e+37  ;;  %3960 = vmatmul.bf16.gmra.mxu0 %v10690_v49  ;;  %v2019_v13 = vpop.f32.mrf.mxu1  ;;  %v2122_v42 = vpop.f32.mrf.mxu3  ;;  %vm9546_vm9 = vmor %vm2931_vm1, %vm2932_vm3 }
 0x30f   : > { %vm9510_vm5 = vcmp.eq.f32.partialorder %v2935_v22, 8.507059e+37  ;;  %v2995_v11 = vand.u32 2147483647, %v9375_v24  ;;  %v9515_v50 = vadd.f32 1.0, %v6129_v33  ;;  %v2018_v2 = vadd.f32 %v2017_v7, %v9348_v14  ;;  %4283 = vmatpush.bf16.xpose.msrb.mxu3 %v5507_v46  ;;  %4136 = vmatpush.bf16.xpose.msrb.mxu0 %v5495_v62  ;;  %v2073_v26 = vpop.f32.mrf.mxu2  ;;  %v10693_v62 = vld [vmem:[#allocation39_spill] sm:$0xff] }
 0x310   : > { %v2930_v25 = vadd.f32 %v9367_v63, %v2929_v8  ;;  %v2973_v61 = vsub.f32 1.0, %v2972_v15  ;;  %vm2976_vm6 = vweird.f32 %v9365_v56  ;;  %v2988_v9 = vsub.f32 1.0, %v2987_v1  ;;  %4185 = vmatpush.bf16.xpose.msrb.mxu1 %v5499_v35  ;;  %v10694_v15 = vld [vmem:[#allocation95_spill] sm:$0xff]  ;;  %v10697_v35 = vld [vmem:[#allocation57_spill] sm:$0xff] }
 0x311   : > { %v5282_v19 = vmul.f32 -1.442695, %v9488_v41  ;;  %vm2991_vm8 = vweird.f32 %v9375_v24  ;;  %v2997_v7 = vand.u32 2147483648, %v9375_v24  ;;  %6132 = vrcp.f32 %v9496_v48 }
 0x312   : > { %v2020_v22 = vadd.f32 %v2019_v13, %v9411_v23  ;;  %v2121_v46 = vadd.f32 %v2120_v47, %v2071_v27  ;;  %v3392_v8 = vmul.f32 %v2879_v18, %v10628_v40  ;;  %v2919_v4 = vsel %vm9526_vm7, %v9361_v51, %v2915_v6  ;;  %v9540_v54 = vpop.eup %6130  ;;  %v9558_v58 = vpop.f32.mrf.mxu0  ;;  %v10698_v18 = vld [vmem:[#allocation41_spill] sm:$0xff] }
 0x313   : > { %v5287_v33 = vmul.f32 -1.442695, %v10693_v62  ;;  %v5291_v1 = vmul.f32 -1.442695, %v10694_v15  ;;  %6134 = vrcp.f32 %v9515_v50  ;;  %v3443_v40 = vmul.f32 %v9331_v60, %v2018_v2  ;;  %v10700_v2 = vld [vmem:[#allocation89_spill] sm:$0xff] }
 0x314   : > { %v3447_v51 = vmul.f32 %v9337_v28, %v2020_v22  ;;  %v2123_v6 = vadd.f32 %v2122_v42, %v2073_v26  ;;  %v2934_v27 = vsel %vm9546_vm9, %v9367_v63, %v2930_v25  ;;  %v2974_v47 = vmul.f32 %v9436_v0, %v2973_v61  ;;  %v10701_v25 = vld [vmem:[#allocation90_spill] sm:$0xff] }
 0x315   : > { %v2989_v21 = vmul.f32 %v9443_v10, %v2988_v9  ;;  %6136 = vpow2.f32 %v5282_v19  ;;  %v1834_v13 = vadd.f32 %v10698_v18, %v10697_v35  ;;  %v3452_v60 = vmul.f32 %v9446_v12, %v2121_v46 }
 0x316   : > { %v9562_v14 = vpack.c.bf16 %v3447_v51, %v3443_v40  ;;  %v3456_v28 = vmul.f32 %v3392_v8, %v2123_v6  ;;  %vm2977_vm10 = vweird.f32 %v9436_v0  ;;  %v3032_v63 = vmul.f32 %v9540_v54, %v9451_v52  ;;  %v2022_v42 = vpop.f32.mrf.mxu1  ;;  %v2125_v35 = vpop.f32.mrf.mxu3 }
 0x317   : > { %6138 = vpow2.f32 %v5287_v33  ;;  %v9570_v61 = vadd.f32 %v10701_v25, %v10700_v2  ;;  %v9572_v9 = vpop.eup %6132  ;;  %v10702_v19 = vand.u32 2147483647, %v9365_v56  ;;  %vm2992_vm12 = vweird.f32 %v9443_v10  ;;  %vm9602_vm14 = vmor %vm2976_vm6, %vm2977_vm10  ;;  %v2076_v40 = vpop.f32.mrf.mxu2  ;;  %v5761_v2 = vld [vmem:[%s6711_s29 + $0x174] sm:$0xf0]  ;;  %v5759_v25 = vld [vmem:[%s6711_s29 + $0x16c] sm:$0xf] }
 0x318   : > { %10699 = vst [vmem:[#allocation47_spill] sm:$0xff] %v9562_v14  ;;  %vm9581_vm13 = vcmp.eq.f32.partialorder %v2995_v11, 8.507059e+37  ;;  %6140 = vpow2.f32 %v5291_v1  ;;  %4053 = vmatmul.bf16.gmra.mxu2 %v9562_v14  ;;  %v9586_v46 = vpack.c.bf16 %v3456_v28, %v3452_v60  ;;  %v2924_v26 = vsel %vm9506_vm4, %v9448_v45, %v2919_v4  ;;  %vm9614_vm15 = vmor %vm2991_vm8, %vm2992_vm12  ;;  %v10714_v28 = vld [vmem:[#allocation43_spill] sm:$0xff]  ;;  %v10715_v1 = vld [vmem:[#allocation56_spill] sm:$0xff] }
 0x319   : > { %vm9576_vm11 = vcmp.eq.f32.partialorder %v10702_v19, 8.507059e+37  ;;  %v2939_v8 = vsel %vm9510_vm5, %v9464_v5, %v2934_v27  ;;  %v2975_v33 = vadd.f32 %v9436_v0, %v2974_v47  ;;  %v2990_v11 = vadd.f32 %v9443_v10, %v2989_v21  ;;  %v9596_v23 = vpop.eup %6134  ;;  %v10713_v27 = vld [vmem:[#allocation93_spill] sm:$0xff]  ;;  %4009 = vmatmul.bf16.gmra.mxu1 %v10714_v28 }
 0x31a   : > { %10707 = vst [vmem:[#allocation45_spill] sm:$0xff] %v9586_v46  ;;  %v2998_v45 = vor.u32 1.1754944e-38, %v2997_v7  ;;  %v3042_v5 = vand.u32 2147483648, %v9451_v52  ;;  %v3461_v4 = vmul.f32 %v10710_v55, %v1834_v13  ;;  %4107 = vmatmul.bf16.gmra.mxu3 %v9586_v46  ;;  %v3033_v7 = vsub.f32 1.0, %v3032_v63  ;;  %v5486_v63 = vld [vmem:[%s6711_s29 + $0x168] sm:$0xf] }
 0x31b   : > { %v6137_v51 = vpop.eup %6136  ;;  %v3047_v6 = vmul.f32 %v9572_v9, %v9496_v48  ;;  %v5286_v47 = vmul.f32 -1.442695, %v10713_v27  ;;  %v5290_v21 = vmul.f32 -1.442695, %v9570_v61  ;;  %v3387_v18 = vmul.f32 %v9371_v31, %v10618_v17 }
 0x31c   : > { %v3391_v24 = vmul.f32 %v9471_v43, %v9004_v3  ;;  %v9627_v13 = vmul.f32 %v2924_v26, %v10637_v20  ;;  %v9630_v60 = vmul.f32 %v2939_v8, %v10639_v44  ;;  %v2979_v17 = vsel %vm9602_vm14, %v9436_v0, %v2975_v33  ;;  %v9645_v44 = vpop.f32.mrf.mxu0  ;;  %v5488_v43 = vld [vmem:[%s6711_s29 + $0x178] sm:$0xf0]  ;;  %v5478_v26 = vld [vmem:[%s6711_s29 + $0x160] sm:$0xf]  ;;  %v5760_v8 = vld [vmem:[%s6711_s29 + $0x16c] sm:$0xf0] }
 0x31d   : > { %v6139_v19 = vpop.eup %6138  ;;  %v2994_v3 = vsel %vm9614_vm15, %v9443_v10, %v2990_v11  ;;  %vm3037_vm0 = vweird.f32 %v9540_v54  ;;  %v3107_v20 = vmul.f32 %v9596_v23, %v9515_v50  ;;  %v5487_v31 = vor.u32 %v5761_v2, %v5486_v63  ;;  %v5758_v10 = vld [vmem:[%s6711_s29 + $0x164] sm:$0xf]  ;;  %v5480_v11 = vld [vmem:[%s6711_s29 + $0x170] sm:$0xf0] }
 0x31e   : > { %v6141_v55 = vpop.eup %6140  ;;  %v9650_v37 = vadd.f32 1.0, %v6137_v51  ;;  %v9653_v0 = vpack.c.bf16 %v3461_v4, %v10715_v1  ;;  %v5491_v33 = vor.u32 %v5759_v25, %v5488_v43  ;;  %v5479_v56 = vor.u32 %v5760_v8, %v5478_v26  ;;  %v2024_v12 = vpop.f32.mrf.mxu1 }
 0x31f   : > { %v3034_v28 = vmul.f32 %v9540_v54, %v3033_v7  ;;  %vm3036_vm1 = vweird.f32 %v9451_v52  ;;  %v3048_v46 = vsub.f32 1.0, %v3047_v6  ;;  %6142 = vpow2.f32 %v5286_v47  ;;  %4235 = vmatpush.bf16.xpose.msrb.mxu2 %v5487_v31  ;;  %v2078_v25 = vpop.f32.mrf.mxu2  ;;  %v2127_v31 = vpop.f32.mrf.mxu3 }
 0x320   : > { %v5483_v63 = vor.u32 %v5758_v10, %v5480_v11  ;;  %v2999_v2 = vsel %vm9581_vm13, %v2998_v45, %v2994_v3  ;;  %v9661_v51 = vor.u32 1.1754944e-38, %v3042_v5  ;;  %v9663_v14 = vadd.f32 1.0, %v6139_v19  ;;  %3965 = vmatmul.bf16.gmra.mxu0 %v9653_v0  ;;  %4284 = vmatpush.bf16.xpose.msrb.mxu3 %v5491_v33  ;;  %v10716_v45 = vld [vmem:[#allocation97_spill] sm:$0xff]  ;;  %v10720_v3 = vld [vmem:[#allocation48_spill] sm:$0xff]  ;;  %vm9706_vm5 = vmor %vm3036_vm1, %vm3037_vm0 }
 0x321   : > { %v2023_v4 = vadd.f32 %v2022_v42, %v9490_v36  ;;  %v9670_v7 = vsel %vm9576_vm11, %v9502_v59, %v2979_v17  ;;  %v3108_v6 = vsub.f32 1.0, %v3107_v20  ;;  %6144 = vpow2.f32 %v5290_v21  ;;  %4137 = vmatpush.bf16.xpose.msrb.mxu0 %v5479_v56  ;;  %v10732_v21 = vld [vmem:[#allocation40_spill] sm:$0xff]  ;;  %v5472_v56 = vld [vmem:[%s6711_s29 + $0x158] sm:$0xf0] }
 0x322   : > { %v9672_v47 = vadd.f32 1.0, %v6141_v55  ;;  %4186 = vmatpush.bf16.xpose.msrb.mxu1 %v5483_v63  ;;  %6146 = vrcp.f32 %v9650_v37  ;;  %v5295_v5 = vmul.f32 -1.442695, %v10716_v45  ;;  %v2025_v36 = vadd.f32 %v2024_v12, %v9558_v58 }
 0x323   : > { %v2126_v42 = vadd.f32 %v2125_v35, %v2076_v40  ;;  %v3400_v19 = vmul.f32 %v2999_v2, %v10658_v57  ;;  %v3035_v59 = vadd.f32 %v9540_v54, %v3034_v28  ;;  %v10717_v22 = vand.u32 2147483647, %v9451_v52 }
 0x324   : > { %v3049_v17 = vmul.f32 %v9572_v9, %v3048_v46  ;;  %v5299_v20 = vmul.f32 -1.442695, %v10720_v3  ;;  %6148 = vrcp.f32 %v9663_v14  ;;  %v3451_v58 = vmul.f32 %v3387_v18, %v2023_v4  ;;  %v9692_v8 = vpop.f32.mrf.mxu0 }
 0x325   : > { %vm9681_vm2 = vcmp.eq.f32.partialorder %v10717_v22, 8.507059e+37  ;;  %v3455_v40 = vmul.f32 %v3391_v24, %v2025_v36  ;;  %v2128_v35 = vadd.f32 %v2127_v31, %v2078_v25  ;;  %v6143_v43 = vpop.eup %6142  ;;  %v3055_v57 = vand.u32 2147483647, %v9496_v48  ;;  %v5464_v22 = vld [vmem:[%s6711_s29 + $0x150] sm:$0xf0] }
 0x326   : > { %v3057_v28 = vand.u32 2147483648, %v9496_v48  ;;  %v3109_v26 = vmul.f32 %v9596_v23, %v3108_v6  ;;  %6150 = vrcp.f32 %v9672_v47  ;;  %v3460_v55 = vmul.f32 %v9630_v60, %v2126_v42  ;;  %v2027_v6 = vpop.f32.mrf.mxu1  ;;  %v10728_v42 = vld [vmem:[#allocation96_spill] sm:$0xff] }
 0x327   : > { %6152 = vpow2.f32 %v5295_v5  ;;  %v9694_v46 = vpack.c.bf16 %v3455_v40, %v3451_v58  ;;  %v3464_v1 = vmul.f32 %v3400_v19, %v2128_v35  ;;  %v6145_v18 = vpop.eup %6144  ;;  %vm3051_vm3 = vweird.f32 %v9496_v48  ;;  %v2081_v19 = vpop.f32.mrf.mxu2 }
 0x328   : > { %vm3052_vm4 = vweird.f32 %v9572_v9  ;;  %v3117_v24 = vand.u32 2147483648, %v9515_v50  ;;  %6154 = vpow2.f32 %v5299_v20  ;;  %v9700_v33 = vpop.eup %6146  ;;  %v3050_v60 = vadd.f32 %v9572_v9, %v3049_v17  ;;  %v2130_v58 = vpop.f32.mrf.mxu3 }
 0x329   : > { %vm3112_vm6 = vweird.f32 %v9596_v23  ;;  %v9712_v10 = vadd.f32 1.0, %v6143_v43  ;;  %4058 = vmatmul.bf16.gmra.mxu2 %v9694_v46  ;;  %v9715_v11 = vpack.c.bf16 %v3464_v1, %v3460_v55  ;;  %v3039_v63 = vsel %vm9706_vm5, %v9540_v54, %v3035_v59  ;;  %vm9731_vm8 = vmor %vm3051_vm3, %vm3052_vm4  ;;  %v5755_v55 = vld [vmem:[%s6711_s29 + $0x14c] sm:$0xf]  ;;  %v10733_v1 = vld [vmem:[#allocation94_spill] sm:$0xff] }
 0x32a   : > { %vm9720_vm7 = vcmp.eq.f32.partialorder %v3055_v57, 8.507059e+37  ;;  %v3058_v2 = vor.u32 1.1754944e-38, %v3057_v28  ;;  %v3110_v4 = vadd.f32 %v9596_v23, %v3109_v26  ;;  %v9725_v12 = vpop.eup %6148  ;;  %vm3111_vm9 = vweird.f32 %v9515_v50  ;;  %v5470_v28 = vld [vmem:[%s6711_s29 + $0x148] sm:$0xf]  ;;  %v5757_v26 = vld [vmem:[%s6711_s29 + $0x154] sm:$0xf0] }
 0x32b   : > { %10723 = vst [vmem:[#allocation61_spill] sm:$0xff] %v9715_v11  ;;  %v9737_v36 = vadd.f32 1.0, %v6145_v18  ;;  %v5294_v25 = vmul.f32 -1.442695, %v10728_v42  ;;  %4112 = vmatmul.bf16.gmra.mxu3 %v9715_v11  ;;  %v3092_v48 = vmul.f32 %v9700_v33, %v9650_v37  ;;  %vm9748_vm10 = vmor %vm3111_vm9, %vm3112_vm6  ;;  %v3115_v20 = vand.u32 2147483647, %v9515_v50 }
 0x32c   : > { %v9741_v59 = vpop.eup %6150  ;;  %v3118_v31 = vor.u32 1.1754944e-38, %v3117_v24  ;;  %v3399_v35 = vmul.f32 %v9670_v7, %v9185_v34  ;;  %v9758_v43 = vsel %vm9681_vm2, %v9661_v51, %v3039_v63  ;;  %v3054_v57 = vsel %vm9731_vm8, %v9572_v9, %v3050_v60  ;;  %v10731_v50 = vld [vmem:[#allocation23_spill] sm:$0xff]  ;;  %v9777_v18 = vpop.f32.mrf.mxu0  ;;  %v5756_v63 = vld [vmem:[%s6711_s29 + $0x14c] sm:$0xf0] }
 0x32d   : > { %v6153_v40 = vpop.eup %6152  ;;  %6156 = vrcp.f32 %v9712_v10  ;;  %4014 = vmatmul.bf16.gmra.mxu1 %v10731_v50  ;;  %v3114_v7 = vsel %vm9748_vm10, %v9596_v23, %v3110_v4  ;;  %v3167_v51 = vmul.f32 %v9725_v12, %v9663_v14  ;;  %v9775_v9 = vadd.f32 %v10733_v1, %v10732_v21  ;;  %v5462_v60 = vld [vmem:[%s6711_s29 + $0x140] sm:$0xf]  ;;  %v5754_v4 = vld [vmem:[%s6711_s29 + $0x144] sm:$0xf] }
 0x32e   : > { %v6155_v34 = vpop.eup %6154  ;;  %v5471_v24 = vor.u32 %v5757_v26, %v5470_v28  ;;  %6158 = vrcp.f32 %v9737_v36  ;;  %v3227_v5 = vmul.f32 %v9741_v59, %v9672_v47  ;;  %v5475_v17 = vor.u32 %v5755_v55, %v5472_v56  ;;  %v10734_v55 = vld [vmem:[#allocation91_spill] sm:$0xff] }
 0x32f   : > { %v5463_v23 = vor.u32 %v5756_v63, %v5462_v60  ;;  %v3093_v54 = vsub.f32 1.0, %v3092_v48  ;;  %vm3116_vm11 = vcmp.eq.f32.partialorder %v3115_v20, 8.507059e+37  ;;  %v9787_v50 = vadd.f32 1.0, %v6153_v40 }
 0x330   : > { %4236 = vmatpush.bf16.xpose.msrb.mxu2 %v5471_v24  ;;  %v5467_v21 = vor.u32 %v5754_v4, %v5464_v22  ;;  %v3059_v28 = vsel %vm9720_vm7, %v3058_v2, %v3054_v57  ;;  %vm3096_vm12 = vweird.f32 %v9650_v37  ;;  %v3119_v26 = vsel %vm3116_vm11, %v3118_v31, %v3114_v7  ;;  %3970 = vmatmul.bf16.gmra.mxu0 %v10734_v55  ;;  %v2029_v22 = vpop.f32.mrf.mxu1  ;;  %v2132_v7 = vpop.f32.mrf.mxu3 }
 0x331   : > { %v9792_v1 = vadd.f32 1.0, %v6155_v34  ;;  %v2028_v11 = vadd.f32 %v2027_v6, %v9645_v44  ;;  %4285 = vmatpush.bf16.xpose.msrb.mxu3 %v5475_v17  ;;  %vm3097_vm13 = vweird.f32 %v9700_v33  ;;  %v3168_v48 = vsub.f32 1.0, %v3167_v51  ;;  %4138 = vmatpush.bf16.xpose.msrb.mxu0 %v5463_v23  ;;  %v2083_v6 = vpop.f32.mrf.mxu2 }
 0x332   : > { %6160 = vpow2.f32 %v5294_v25  ;;  %v5298_v20 = vmul.f32 -1.442695, %v9775_v9  ;;  %4187 = vmatpush.bf16.xpose.msrb.mxu1 %v5467_v21  ;;  %v3175_v2 = vand.u32 2147483647, %v9663_v14  ;;  %v3228_v31 = vsub.f32 1.0, %v3227_v5  ;;  %vm9844_vm1 = vmor %vm3096_vm12, %vm3097_vm13 }
 0x333   : > { %v9798_v52 = vpop.eup %6156  ;;  %v2030_v40 = vadd.f32 %v2029_v22, %v9692_v8  ;;  %v2131_v44 = vadd.f32 %v2130_v58, %v2081_v19  ;;  %v3404_v57 = vmul.f32 %v3059_v28, %v10671_v32  ;;  %v3094_v34 = vmul.f32 %v9700_v33, %v3093_v54  ;;  %v5751_v28 = vld [vmem:[%s6711_s29 + $0x12c] sm:$0xf] }
 0x334   : > { %v3408_v25 = vmul.f32 %v3119_v26, %v10674_v39  ;;  %6162 = vrcp.f32 %v9787_v50  ;;  %v9806_v51 = vpop.eup %6158  ;;  %v3459_v24 = vmul.f32 %v9627_v13, %v2028_v11  ;;  %v2133_v60 = vadd.f32 %v2132_v7, %v2083_v6  ;;  %v9816_v39 = vpop.f32.mrf.mxu0 }
 0x335   : > { %6164 = vrcp.f32 %v9792_v1  ;;  %v3463_v56 = vmul.f32 %v3399_v35, %v2030_v40  ;;  %v9812_v8 = vmul.f32 %v9798_v52, %v9712_v10  ;;  %v3169_v32 = vmul.f32 %v9725_v12, %v3168_v48 }
 0x336   : > { %v3177_v54 = vand.u32 2147483648, %v9663_v14  ;;  %6166 = vpow2.f32 %v5298_v20  ;;  %v3229_v19 = vmul.f32 %v9741_v59, %v3228_v31  ;;  %v3468_v63 = vmul.f32 %v3404_v57, %v2131_v44  ;;  %v5448_v20 = vld [vmem:[%s6711_s29 + $0x130] sm:$0xf0] }
 0x337   : > { %v9819_v58 = vpack.c.bf16 %v3463_v56, %v3459_v24  ;;  %v3472_v5 = vmul.f32 %v3408_v25, %v2133_v60  ;;  %v10736_v11 = vand.u32 2147483647, %v9650_v37  ;;  %v10739_v17 = vand.u32 2147483648, %v9650_v37 }
 0x338   : > { %v6161_v13 = vpop.eup %6160  ;;  %vm3172_vm15 = vweird.f32 %v9725_v12  ;;  %v3212_v4 = vmul.f32 %v9806_v51, %v9737_v36  ;;  %v3095_v21 = vadd.f32 %v9700_v33, %v3094_v34  ;;  %vm3232_vm0 = vweird.f32 %v9741_v59  ;;  %v2032_v44 = vpop.f32.mrf.mxu1 }
 0x339   : > { %10735 = vst [vmem:[#allocation31_spill] sm:$0xff] %v9819_v58  ;;  %vm9823_vm14 = vcmp.eq.f32.partialorder %v10736_v11, 8.507059e+37  ;;  %v3103_v23 = vor.u32 1.1754944e-38, %v10739_v17  ;;  %4063 = vmatmul.bf16.gmra.mxu2 %v9819_v58  ;;  %v9836_v26 = vpack.c.bf16 %v3472_v5, %v3468_v63  ;;  %v3170_v31 = vadd.f32 %v9725_v12, %v3169_v32  ;;  %v2135_v32 = vpop.f32.mrf.mxu3  ;;  %v10749_v63 = vld [vmem:[#allocation25_spill] sm:$0xff]  ;;  %v5454_v5 = vld [vmem:[%s6711_s29 + $0x128] sm:$0xf] }
 0x33a   : > { %v9838_v48 = vpop.eup %6162  ;;  %vm3171_vm2 = vweird.f32 %v9663_v14  ;;  %vm9851_vm3 = vcmp.eq.f32.partialorder %v3175_v2, 8.507059e+37  ;;  %v3153_v57 = vsub.f32 1.0, %v9812_v8  ;;  %v3178_v34 = vor.u32 1.1754944e-38, %v3177_v54  ;;  %v2086_v14 = vpop.f32.mrf.mxu2  ;;  %v5753_v11 = vld [vmem:[%s6711_s29 + $0x134] sm:$0xf0] }
 0x33b   : > { %10740 = vst [vmem:[#allocation32_spill] sm:$0xff] %v9836_v26  ;;  %v9855_v6 = vpop.eup %6164  ;;  %vm9860_vm4 = vmor %vm3171_vm2, %vm3172_vm15  ;;  %v3230_v25 = vadd.f32 %v9741_v59, %v3229_v19  ;;  %vm3231_vm5 = vweird.f32 %v9672_v47  ;;  %4117 = vmatmul.bf16.gmra.mxu3 %v9836_v26  ;;  %v3213_v7 = vsub.f32 1.0, %v3212_v4  ;;  %v3235_v56 = vand.u32 2147483647, %v9672_v47  ;;  %v5752_v4 = vld [vmem:[%s6711_s29 + $0x12c] sm:$0xf0] }
 0x33c   : > { %v6167_v2 = vpop.eup %6166  ;;  %vm9869_vm6 = vmor %vm3231_vm5, %vm3232_vm0  ;;  %v3237_v60 = vand.u32 2147483648, %v9672_v47  ;;  %v9875_v8 = vadd.f32 1.0, %v6161_v13  ;;  %v3403_v54 = vmul.f32 %v9758_v43, %v10663_v30  ;;  %v3099_v19 = vsel %vm9844_vm1, %v9700_v33, %v3095_v21  ;;  %v5446_v47 = vld [vmem:[%s6711_s29 + $0x120] sm:$0xf]  ;;  %v9894_v33 = vpop.f32.mrf.mxu0  ;;  %v5750_v21 = vld [vmem:[%s6711_s29 + $0x124] sm:$0xf] }
 0x33d   : > { %vm3157_vm7 = vweird.f32 %v9798_v52  ;;  %4019 = vmatmul.bf16.gmra.mxu1 %v10749_v63  ;;  %v3174_v13 = vsel %vm9860_vm4, %v9725_v12, %v3170_v31  ;;  %v3287_v30 = vmul.f32 %v9838_v48, %v9787_v50  ;;  %v3347_v43 = vmul.f32 %v9855_v6, %v9792_v1  ;;  %v5456_v63 = vld [vmem:[%s6711_s29 + $0x138] sm:$0xf0] }
 0x33e   : > { %v5455_v17 = vor.u32 %v5753_v11, %v5454_v5  ;;  %vm3156_vm8 = vweird.f32 %v9712_v10  ;;  %v3234_v22 = vsel %vm9869_vm6, %v9741_v59, %v3230_v25  ;;  %v9903_v37 = vadd.f32 1.0, %v6167_v2  ;;  %v10750_v25 = vld [vmem:[#allocation29_spill] sm:$0xff] }
 0x33f   : > { %v5447_v12 = vor.u32 %v5752_v4, %v5446_v47  ;;  %v5451_v31 = vor.u32 %v5750_v21, %v5448_v20  ;;  %v3104_v26 = vsel %vm9823_vm14, %v3103_v23, %v3099_v19  ;;  %v3154_v5 = vmul.f32 %v9798_v52, %v3153_v57  ;;  %v5430_v19 = vld [vmem:[%s6711_s29 + $0x100] sm:$0xf]  ;;  %vm9941_vm11 = vmor %vm3156_vm8, %vm3157_vm7  ;;  %v10764_v4 = vld [vmem:[#allocation60_spill] sm:$0xff] }
 0x340   : > { %v3238_v11 = vor.u32 1.1754944e-38, %v3237_v60  ;;  %4237 = vmatpush.bf16.xpose.msrb.mxu2 %v5455_v17  ;;  %v5459_v58 = vor.u32 %v5751_v28, %v5456_v63  ;;  %v3179_v55 = vsel %vm9851_vm3, %v3178_v34, %v3174_v13  ;;  %vm3236_vm9 = vcmp.eq.f32.partialorder %v3235_v56, 8.507059e+37  ;;  %3975 = vmatmul.bf16.gmra.mxu0 %v10750_v25  ;;  %v2034_v57 = vpop.f32.mrf.mxu1  ;;  %v5748_v63 = vld [vmem:[%s6711_s29 + $0x10c] sm:$0xf0]  ;;  %v5432_v13 = vld [vmem:[%s6711_s29 + $0x110] sm:$0xf0] }
 0x341   : > { %6168 = vrcp.f32 %v9875_v8  ;;  %v2033_v59 = vadd.f32 %v2032_v44, %v9777_v18  ;;  %4188 = vmatpush.bf16.xpose.msrb.mxu1 %v5451_v31  ;;  %v3214_v2 = vmul.f32 %v9806_v51, %v3213_v7  ;;  %v3288_v23 = vsub.f32 1.0, %v3287_v30  ;;  %4139 = vmatpush.bf16.xpose.msrb.mxu0 %v5447_v12 }
 0x342   : > { %v3239_v35 = vsel %vm3236_vm9, %v3238_v11, %v3234_v22  ;;  %v3348_v24 = vsub.f32 1.0, %v3347_v43  ;;  %4286 = vmatpush.bf16.xpose.msrb.mxu3 %v5459_v58  ;;  %v3407_v28 = vmul.f32 %v3104_v26, %v9488_v41  ;;  %6170 = vrcp.f32 %v9903_v37  ;;  %v2088_v44 = vpop.f32.mrf.mxu2  ;;  %v2137_v58 = vpop.f32.mrf.mxu3 }
 0x343   : > { %v2035_v18 = vadd.f32 %v2034_v57, %v9816_v39  ;;  %v2136_v40 = vadd.f32 %v2135_v32, %v2086_v14  ;;  %v3155_v34 = vadd.f32 %v9798_v52, %v3154_v5  ;;  %v3412_v22 = vmul.f32 %v3179_v55, %v10693_v62  ;;  %v5746_v39 = vld [vmem:[%s6711_s29 + $0x104] sm:$0xf] }
 0x344   : > { %vm3217_vm10 = vweird.f32 %v9806_v51  ;;  %v3222_v7 = vand.u32 2147483648, %v9737_v36  ;;  %v3416_v56 = vmul.f32 %v3239_v35, %v10694_v15  ;;  %v3467_v41 = vmul.f32 %v3403_v54, %v2033_v59  ;;  %v9930_v55 = vpop.f32.mrf.mxu0 }
 0x345   : > { %v3471_v26 = vmul.f32 %v3407_v28, %v2035_v18  ;;  %v2138_v60 = vadd.f32 %v2137_v58, %v2088_v44  ;;  %v3215_v14 = vadd.f32 %v9806_v51, %v3214_v2  ;;  %v3289_v32 = vmul.f32 %v9838_v48, %v3288_v23  ;;  %v10761_v58 = vld [vmem:[#allocation30_spill] sm:$0xff] }
 0x346   : > { %v3349_v62 = vmul.f32 %v9855_v6, %v3348_v24  ;;  %v5431_v47 = vor.u32 %v5748_v63, %v5430_v19  ;;  %v3476_v15 = vmul.f32 %v3412_v22, %v2136_v40  ;;  %v5435_v17 = vor.u32 %v5746_v39, %v5432_v13  ;;  %v5440_v39 = vld [vmem:[%s6711_s29 + $0x118] sm:$0xf0] }
 0x347   : > { %v9933_v30 = vpop.eup %6168  ;;  %v9935_v43 = vpack.c.bf16 %v3471_v26, %v3467_v41  ;;  %v3480_v54 = vmul.f32 %v3416_v56, %v2138_v60  ;;  %v10753_v21 = vand.u32 2147483647, %v9712_v10  ;;  %v10756_v12 = vand.u32 2147483648, %v9712_v10  ;;  %v5438_v56 = vld [vmem:[%s6711_s29 + $0x108] sm:$0xf] }
 0x348   : > { %vm3216_vm13 = vweird.f32 %v9737_v36  ;;  %v9954_v5 = vpop.eup %6170  ;;  %v3220_v59 = vand.u32 2147483647, %v9737_v36  ;;  %v3223_v2 = vor.u32 1.1754944e-38, %v3222_v7  ;;  %vm3292_vm15 = vweird.f32 %v9838_v48  ;;  %v2037_v36 = vpop.f32.mrf.mxu1  ;;  %v5749_v41 = vld [vmem:[%s6711_s29 + $0x114] sm:$0xf0] }
 0x349   : > { %vm9947_vm12 = vcmp.eq.f32.partialorder %v10753_v21, 8.507059e+37  ;;  %v3163_v31 = vor.u32 1.1754944e-38, %v10756_v12  ;;  %vm9958_vm14 = vmor %vm3216_vm13, %vm3217_vm10  ;;  %4068 = vmatmul.bf16.gmra.mxu2 %v9935_v43  ;;  %v9965_v35 = vpack.c.bf16 %v3480_v54, %v3476_v15  ;;  %4189 = vmatpush.bf16.xpose.msrb.mxu1 %v5435_v17  ;;  %v3159_v10 = vsel %vm9941_vm11, %v9798_v52, %v3155_v34  ;;  %v5747_v26 = vld [vmem:[%s6711_s29 + $0x10c] sm:$0xf] }
 0x34a   : > { %v3219_v23 = vsel %vm9958_vm14, %v9806_v51, %v3215_v14  ;;  %v3290_v24 = vadd.f32 %v9838_v48, %v3289_v32  ;;  %vm3291_vm0 = vweird.f32 %v9787_v50  ;;  %4140 = vmatpush.bf16.xpose.msrb.mxu0 %v5431_v47  ;;  %v3272_v57 = vmul.f32 %v9933_v30, %v9875_v8  ;;  %v2091_v51 = vpop.f32.mrf.mxu2  ;;  %v2140_v7 = vpop.f32.mrf.mxu3 }
 0x34b   : > { %v3297_v28 = vand.u32 2147483648, %v9787_v50  ;;  %v3350_v52 = vadd.f32 %v9855_v6, %v3349_v62  ;;  %vm3352_vm1 = vweird.f32 %v9855_v6  ;;  %4122 = vmatmul.bf16.gmra.mxu3 %v9965_v35  ;;  %vm9983_vm2 = vmor %vm3291_vm0, %vm3292_vm15  ;;  %v3295_v40 = vand.u32 2147483647, %v9787_v50 }
 0x34c   : > { %v3332_v44 = vmul.f32 %v9954_v5, %v9903_v37  ;;  %v3355_v34 = vand.u32 2147483647, %v9792_v1  ;;  %v3357_v22 = vand.u32 2147483648, %v9792_v1  ;;  %vm3351_vm3 = vweird.f32 %v9792_v1  ;;  %v10008_v1 = vpop.f32.mrf.mxu0 }
 0x34d   : > { %4024 = vmatmul.bf16.gmra.mxu1 %v10761_v58  ;;  %v3164_v60 = vsel %vm9947_vm12, %v3163_v31, %v3159_v10  ;;  %vm3221_vm4 = vcmp.eq.f32.partialorder %v3220_v59, 8.507059e+37  ;;  %v3294_v50 = vsel %vm9983_vm2, %v9838_v48, %v3290_v24  ;;  %vm10004_vm5 = vmor %vm3351_vm3, %vm3352_vm1  ;;  %v5439_v63 = vor.u32 %v5749_v41, %v5438_v56  ;;  %v10765_v41 = vld [vmem:[#allocation44_spill] sm:$0xff] }
 0x34e   : > { %v3224_v14 = vsel %vm3221_vm4, %v3223_v2, %v3219_v23  ;;  %v3298_v32 = vor.u32 1.1754944e-38, %v3297_v28  ;;  %v3354_v62 = vsel %vm10004_vm5, %v9855_v6, %v3350_v52  ;;  %v5443_v47 = vor.u32 %v5747_v26, %v5440_v39  ;;  %v10766_v39 = vld [vmem:[#allocation26_spill] sm:$0xff] }
 0x34f   : > { %v3273_v13 = vsub.f32 1.0, %v3272_v57  ;;  %vm3296_vm6 = vcmp.eq.f32.partialorder %v3295_v40, 8.507059e+37  ;;  %v3333_v48 = vsub.f32 1.0, %v3332_v44  ;;  %v3358_v15 = vor.u32 1.1754944e-38, %v3357_v22  ;;  %4238 = vmatpush.bf16.xpose.msrb.mxu2 %v5439_v63 }
 0x350   : > { %v3299_v54 = vsel %vm3296_vm6, %v3298_v32, %v3294_v50  ;;  %vm3356_vm7 = vcmp.eq.f32.partialorder %v3355_v34, 8.507059e+37  ;;  %v2038_v17 = vadd.f32 %v2037_v36, %v9894_v33  ;;  %3980 = vmatmul.bf16.gmra.mxu0 %v10764_v4  ;;  %4287 = vmatpush.bf16.xpose.msrb.mxu3 %v5443_v47  ;;  %v2039_v20 = vpop.f32.mrf.mxu1  ;;  %v3411_v12 = vmul.f32 %v3164_v60, %v10713_v27 }
 0x351   : > { %v3359_v21 = vsel %vm3356_vm7, %v3358_v15, %v3354_v62  ;;  %v3415_v31 = vmul.f32 %v3224_v14, %v9570_v61  ;;  %v2040_v6 = vadd.f32 %v2039_v20, %v9930_v55  ;;  %v2141_v11 = vadd.f32 %v2140_v7, %v2091_v51  ;;  %v10767_v15 = vld [vmem:[#allocation46_spill] sm:$0xff] }
 0x352   : > { %v2093_v59 = vpop.f32.mrf.mxu2  ;;  %v3274_v2 = vmul.f32 %v9933_v30, %v3273_v13  ;;  %v3420_v10 = vmul.f32 %v3299_v54, %v10716_v45  ;;  %v3334_v23 = vmul.f32 %v9954_v5, %v3333_v48  ;;  %v2142_v33 = vpop.f32.mrf.mxu3  ;;  %v3424_v24 = vmul.f32 %v3359_v21, %v10720_v3  ;;  %v10768_v54 = vld [vmem:[#allocation49_spill] sm:$0xff] }
 0x353   : > { %v3475_v36 = vmul.f32 %v3411_v12, %v2038_v17  ;;  %v3479_v57 = vmul.f32 %v3415_v31, %v2040_v6  ;;  %v2143_v28 = vadd.f32 %v2142_v33, %v2093_v59  ;;  %vm3277_vm8 = vweird.f32 %v9933_v30  ;;  %v10769_v33 = vld [vmem:[#allocation53_spill] sm:$0xff] }
 0x354   : > { %v1995_v52 = vpop.f32.mrf.mxu0  ;;  %v3484_v61 = vmul.f32 %v3420_v10, %v2141_v11  ;;  %v3275_v55 = vadd.f32 %v9933_v30, %v3274_v2  ;;  %v3335_v51 = vadd.f32 %v9954_v5, %v3334_v23  ;;  %vm3337_vm9 = vweird.f32 %v9954_v5  ;;  %v3489_v11 = vld [vmem:[#allocation2 + $0xb0] sm:$0xff] }
 0x355   : > { %v10023_v27 = vpack.c.bf16 %v3479_v57, %v3475_v36  ;;  %v3488_v18 = vmul.f32 %v3424_v24, %v2143_v28  ;;  %vm3276_vm10 = vweird.f32 %v9875_v8  ;;  %v3282_v3 = vand.u32 2147483648, %v9875_v8  ;;  %v3491_v57 = vld [vmem:[#allocation2 + $0xd8] sm:$0xff] }
 0x356   : > { %v3342_v40 = vand.u32 2147483648, %v9903_v37  ;;  %vm3278_vm11 = vmor %vm3276_vm10, %vm3277_vm8  ;;  %v3280_v34 = vand.u32 2147483647, %v9875_v8  ;;  %vm3336_vm12 = vweird.f32 %v9903_v37  ;;  %v3340_v22 = vand.u32 2147483647, %v9903_v37 }
 0x357   : > { %v10030_v45 = vpack.c.bf16 %v3488_v18, %v3484_v61  ;;  %vm3338_vm13 = vmor %vm3336_vm12, %vm3337_vm9  ;;  %v3279_v7 = vsel %vm3278_vm11, %v9933_v30, %v3275_v55  ;;  %v3283_v26 = vor.u32 1.1754944e-38, %v3282_v3  ;;  %v10770_v61 = vld [vmem:[#allocation54_spill] sm:$0xff] }
 0x358   : > { %v2042_v44 = vpop.f32.mrf.mxu1  ;;  %v3339_v56 = vsel %vm3338_vm13, %v9954_v5, %v3335_v51  ;;  %v3343_v60 = vor.u32 1.1754944e-38, %v3342_v40  ;;  %vm3281_vm14 = vcmp.eq.f32.partialorder %v3280_v34, 8.507059e+37  ;;  %vm3341_vm15 = vcmp.eq.f32.partialorder %v3340_v22, 8.507059e+37  ;;  %v10771_v51 = vld [vmem:[#allocation55_spill] sm:$0xff]  ;;  %v3493_v34 = vld [vmem:[#allocation2 + $0x50] sm:$0xff] }
 0x359   : > { %4073 = vmatmul.bf16.gmra.mxu2 %v10023_v27  ;;  %v3284_v19 = vsel %vm3281_vm14, %v3283_v26, %v3279_v7  ;;  %v2043_v63 = vadd.f32 %v2042_v44, %v10008_v1  ;;  %v10772_v44 = vld [vmem:[#allocation28_spill] sm:$0xff] }
 0x35a   : > { %v3344_v8 = vsel %vm3341_vm15, %v3343_v60, %v3339_v56  ;;  %v3419_v14 = vmul.f32 %v3284_v19, %v10728_v42 }
 0x35b   : > { %4127 = vmatmul.bf16.gmra.mxu3 %v10030_v45  ;;  %v3423_v30 = vmul.f32 %v3344_v8, %v9775_v9 }
 0x35c   : > { %v3946_v50 = vpop.f32.mrf.mxu0  ;;  %v3483_v5 = vmul.f32 %v3419_v14, %v2043_v63  ;;  %v3495_v63 = vld [vmem:[#allocation2 + $0x30] sm:$0xff] }
 0x35d   : > { %4029 = vmatmul.bf16.gmra.mxu1 %v10765_v41 }
 0x360   : > { %4141 = vmatmul.bf16.vlgmr.msrb.gmra.mxu0 %v10766_v39  ;;  %v2044_v37 = vpop.f32.mrf.mxu1 }
 0x361   : > { %v2045_v32 = vadd.f32 %v2044_v37, %v1995_v52 }
 0x363   : > { %v3487_v62 = vmul.f32 %v3423_v30, %v2045_v32  ;;  %v10773_v30 = vld [vmem:[#allocation47_spill] sm:$0xff] }
 0x364   : > { %v3948_v47 = vpop.f32.mrf.mxu0 }
 0x365   : > { %v10046_v13 = vpack.c.bf16 %v3487_v62, %v3483_v5 }
 0x368   : > { %v3995_v48 = vpop.f32.mrf.mxu1 }
 0x369   : > { %4078 = vmatmul.bf16.gmra.mxu2 %v10046_v13  ;;  %v3996_v12 = vadd.f32 %v3995_v48, %v3946_v50 }
 0x36a   : > { %v4093_v17 = vpop.f32.mrf.mxu3 }
 0x36b   : > { %4288 = vmatmul.bf16.vlgmr.msrb.gmra.mxu3 %v10767_v15 }
 0x36c   : > { %v3951_v1 = vpop.f32.mrf.mxu0 }
 0x36d   : > { %4190 = vmatmul.bf16.vlgmr.msrb.gmra.mxu1 %v10768_v54  ;;  %v3497_v54 = vld [vmem:[#allocation2 + $0x80] sm:$0xff] }
 0x370   : > { %4146 = vmatmul.bf16.gmra.mxu0 %v8188_v16  ;;  %v3997_v42 = vpop.f32.mrf.mxu1 }
 0x371   : > { %v3998_v24 = vadd.f32 %v3997_v42, %v3948_v47  ;;  %v10774_v47 = vld [vmem:[#allocation45_spill] sm:$0xff] }
 0x372   : > { %v4095_v9 = vpop.f32.mrf.mxu3 }
 0x374   : > { %v3953_v21 = vpop.f32.mrf.mxu0 }
 0x378   : > { %v4000_v20 = vpop.f32.mrf.mxu1  ;;  %v4044_v31 = vpop.f32.mrf.mxu2 }
 0x379   : > { %4239 = vmatmul.bf16.vlgmr.msrb.gmra.mxu2 %v9280_v29  ;;  %v4045_v6 = vadd.f32 %v4044_v31, %v3996_v12  ;;  %v4001_v55 = vadd.f32 %v4000_v20, %v3951_v1 }
 0x37b   : > { %4293 = vmatmul.bf16.gmra.mxu3 %v9302_v53  ;;  %v4098_v2 = vpop.f32.mrf.mxu3  ;;  %v4094_v10 = vadd.f32 %v4093_v17, %v4045_v6  ;;  %v3499_v6 = vld [vmem:[#allocation2 + $0xe8] sm:$0xff] }
 0x37c   : > { %v3956_v59 = vpop.f32.mrf.mxu0 }
 0x37d   : > { %4195 = vmatmul.bf16.gmra.mxu1 %v10665_v38  ;;  %v4329_v23 = vadd.f32 %v4094_v10, %v3489_v11 }
 0x37f   : > { %4361 = vst [vmem:[#allocation2 + $0xb0] sm:$0xff] %v4329_v23 }
 0x380   : > { %4151 = vmatmul.bf16.gmra.mxu0 %v10769_v33  ;;  %v4002_v16 = vpop.f32.mrf.mxu1  ;;  %v4046_v36 = vpop.f32.mrf.mxu2 }
 0x381   : > { %v4047_v29 = vadd.f32 %v4046_v36, %v3998_v24  ;;  %v4003_v50 = vadd.f32 %v4002_v16, %v3953_v21  ;;  %v10776_v16 = vld [vmem:[#allocation61_spill] sm:$0xff] }
 0x383   : > { %v4100_v52 = vpop.f32.mrf.mxu3  ;;  %v4096_v53 = vadd.f32 %v4095_v9, %v4047_v29  ;;  %v3501_v29 = vld [vmem:[#allocation2 + $0x60] sm:$0xff] }
 0x384   : > { %v3958_v28 = vpop.f32.mrf.mxu0 }
 0x385   : > { %v4331_v18 = vadd.f32 %v4096_v53, %v3491_v57 }
 0x387   : > { %4363 = vst [vmem:[#allocation2 + $0xd8] sm:$0xff] %v4331_v18 }
 0x388   : > { %v4005_v38 = vpop.f32.mrf.mxu1 }
 0x389   : > { %4244 = vmatmul.bf16.gmra.mxu2 %v10770_v61  ;;  %v4049_v3 = vpop.f32.mrf.mxu2  ;;  %v4006_v62 = vadd.f32 %v4005_v38, %v3956_v59  ;;  %v10778_v61 = vld [vmem:[#allocation91_spill] sm:$0xff] }
 0x38a   : > { %v4050_v40 = vadd.f32 %v4049_v3, %v4001_v55 }
 0x38b   : > { %4298 = vmatmul.bf16.gmra.mxu3 %v10771_v51  ;;  %v3503_v51 = vld [vmem:[#allocation2 + $0x8] sm:$0xff] }
 0x38c   : > { %v3961_v22 = vpop.f32.mrf.mxu0  ;;  %v4103_v7 = vpop.f32.mrf.mxu3  ;;  %v4099_v56 = vadd.f32 %v4098_v2, %v4050_v40 }
 0x38d   : > { %4200 = vmatmul.bf16.gmra.mxu1 %v10772_v44 }
 0x38e   : > { %v4333_v26 = vadd.f32 %v4099_v56, %v3493_v34  ;;  %v10779_v34 = vld [vmem:[#allocation31_spill] sm:$0xff] }
 0x390   : > { %4156 = vmatmul.bf16.gmra.mxu0 %v10690_v49  ;;  %v4007_v60 = vpop.f32.mrf.mxu1  ;;  %4365 = vst [vmem:[#allocation2 + $0x50] sm:$0xff] %v4333_v26  ;;  %v10775_v49 = vld [vmem:[#allocation43_spill] sm:$0xff]  ;;  %v10780_v26 = vld [vmem:[#allocation32_spill] sm:$0xff] }
 0x391   : > { %v4051_v19 = vpop.f32.mrf.mxu2  ;;  %v4008_v20 = vadd.f32 %v4007_v60, %v3958_v28 }
 0x392   : > { %v4052_v8 = vadd.f32 %v4051_v19, %v4003_v50  ;;  %v10781_v19 = vld [vmem:[#allocation25_spill] sm:$0xff] }
 0x394   : > { %v3963_v39 = vpop.f32.mrf.mxu0  ;;  %v4105_v37 = vpop.f32.mrf.mxu3  ;;  %v4101_v14 = vadd.f32 %v4100_v52, %v4052_v8  ;;  %v3505_v8 = vld [vmem:[#allocation2 + $0x38] sm:$0xff] }
 0x396   : > { %v4335_v32 = vadd.f32 %v4101_v14, %v3495_v63 }
 0x398   : > { %v4010_v5 = vpop.f32.mrf.mxu1  ;;  %4367 = vst [vmem:[#allocation2 + $0x30] sm:$0xff] %v4335_v32 }
 0x399   : > { %4249 = vmatmul.bf16.gmra.mxu2 %v10773_v30  ;;  %v4011_v33 = vadd.f32 %v4010_v5, %v3961_v22 }
 0x39b   : > { %4303 = vmatmul.bf16.gmra.mxu3 %v10774_v47  ;;  %v4054_v48 = vpop.f32.mrf.mxu2  ;;  %v3507_v47 = vld [vmem:[#allocation2 + $0x40] sm:$0xff] }
 0x39c   : > { %v4055_v15 = vadd.f32 %v4054_v48, %v4006_v62 }
 0x39d   : > { %4205 = vmatmul.bf16.gmra.mxu1 %v10775_v49  ;;  %v3966_v1 = vpop.f32.mrf.mxu0  ;;  %v4108_v17 = vpop.f32.mrf.mxu3 }
 0x39e   : > { %v4104_v42 = vadd.f32 %v4103_v7, %v4055_v15 }
 0x3a0   : > { %v4337_v21 = vadd.f32 %v4104_v42, %v3497_v54  ;;  %4161 = vmatmul.bf16.gmra.mxu0 %v9653_v0  ;;  %v4012_v9 = vpop.f32.mrf.mxu1  ;;  %v10777_v0 = vld [vmem:[#allocation23_spill] sm:$0xff] }
 0x3a1   : > { %v4013_v38 = vadd.f32 %v4012_v9, %v3963_v39 }
 0x3a2   : > { %4369 = vst [vmem:[#allocation2 + $0x80] sm:$0xff] %v4337_v21 }
 0x3a3   : > { %v4056_v12 = vpop.f32.mrf.mxu2 }
 0x3a4   : > { %v4057_v31 = vadd.f32 %v4056_v12, %v4008_v20 }
 0x3a5   : > { %v3968_v11 = vpop.f32.mrf.mxu0  ;;  %v4110_v59 = vpop.f32.mrf.mxu3 }
 0x3a6   : > { %v4106_v2 = vadd.f32 %v4105_v37, %v4057_v31 }
 0x3a8   : > { %v4339_v10 = vadd.f32 %v4106_v2, %v3499_v6  ;;  %v3511_v2 = vld [vmem:[#allocation2 + $0x70] sm:$0xff] }
 0x3a9   : > { %4254 = vmatmul.bf16.gmra.mxu2 %v9694_v46 }
 0x3aa   : > { %v4015_v23 = vpop.f32.mrf.mxu1  ;;  %4371 = vst [vmem:[#allocation2 + $0xe8] sm:$0xff] %v4339_v10 }
 0x3ab   : > { %4308 = vmatmul.bf16.gmra.mxu3 %v10776_v16  ;;  %v4016_v56 = vadd.f32 %v4015_v23, %v3966_v1 }
 0x3ac   : > { %v4059_v24 = vpop.f32.mrf.mxu2 }
 0x3ad   : > { %v4060_v36 = vadd.f32 %v4059_v24, %v4011_v33  ;;  %4210 = vmatmul.bf16.gmra.mxu1 %v10777_v0  ;;  %v3971_v57 = vpop.f32.mrf.mxu0 }
 0x3ae   : > { %v4113_v28 = vpop.f32.mrf.mxu3 }
 0x3af   : > { %v4109_v52 = vadd.f32 %v4108_v17, %v4060_v36 }
 0x3b0   : > { %4166 = vmatmul.bf16.gmra.mxu0 %v10778_v61 }
 0x3b1   : > { %v4341_v53 = vadd.f32 %v4109_v52, %v3501_v29 }
 0x3b2   : > { %v4017_v18 = vpop.f32.mrf.mxu1 }
 0x3b3   : > { %4373 = vst [vmem:[#allocation2 + $0x60] sm:$0xff] %v4341_v53  ;;  %v4018_v32 = vadd.f32 %v4017_v18, %v3968_v11  ;;  %v3515_v18 = vld [vmem:[#allocation2 + $0x10] sm:$0xff] }
 0x3b4   : > { %v4061_v46 = vpop.f32.mrf.mxu2 }
 0x3b5   : > { %v4062_v55 = vadd.f32 %v4061_v46, %v4013_v38  ;;  %v3973_v3 = vpop.f32.mrf.mxu0 }
 0x3b6   : > { %v4115_v40 = vpop.f32.mrf.mxu3 }
 0x3b7   : > { %v4111_v44 = vadd.f32 %v4110_v59, %v4062_v55 }
 0x3b9   : > { %4259 = vmatmul.bf16.gmra.mxu2 %v10779_v34  ;;  %v4343_v22 = vadd.f32 %v4111_v44, %v3503_v51  ;;  %v3517_v44 = vld [vmem:[#allocation2 + $0xa0] sm:$0xff] }
 0x3ba   : > { %v4020_v7 = vpop.f32.mrf.mxu1 }
 0x3bb   : > { %4375 = vst [vmem:[#allocation2 + $0x8] sm:$0xff] %v4343_v22  ;;  %4313 = vmatmul.bf16.gmra.mxu3 %v10780_v26  ;;  %v4021_v17 = vadd.f32 %v4020_v7, %v3971_v57 }
 0x3bc   : > { %v4064_v60 = vpop.f32.mrf.mxu2 }
 0x3bd   : > { %v4065_v50 = vadd.f32 %v4064_v60, %v4016_v56  ;;  %4215 = vmatmul.bf16.gmra.mxu1 %v10781_v19  ;;  %v3976_v63 = vpop.f32.mrf.mxu0 }
 0x3be   : > { %v4118_v39 = vpop.f32.mrf.mxu3 }
 0x3bf   : > { %v4114_v37 = vadd.f32 %v4113_v28, %v4065_v50 }
 0x3c0   : > { %4171 = vmatmul.bf16.gmra.mxu0 %v10750_v25  ;;  %v3509_v25 = vld [vmem:[#allocation2 + $0xe0] sm:$0xff] }
 0x3c1   : > { %v4345_v14 = vadd.f32 %v4114_v37, %v3505_v8  ;;  %v3519_v8 = vld [vmem:[#allocation2 + $0x20] sm:$0xff] }
 0x3c2   : > { %v4022_v30 = vpop.f32.mrf.mxu1 }
 0x3c3   : > { %4377 = vst [vmem:[#allocation2 + $0x38] sm:$0xff] %v4345_v14  ;;  %v4023_v11 = vadd.f32 %v4022_v30, %v3973_v3 }
 0x3c4   : > { %v4066_v5 = vpop.f32.mrf.mxu2 }
 0x3c5   : > { %v4067_v62 = vadd.f32 %v4066_v5, %v4018_v32  ;;  %v3978_v48 = vpop.f32.mrf.mxu0 }
 0x3c6   : > { %v4120_v15 = vpop.f32.mrf.mxu3 }
 0x3c7   : > { %v4116_v49 = vadd.f32 %v4115_v40, %v4067_v62  ;;  %v3490_v62 = vld [vmem:[#allocation2] sm:$0xff] }
 0x3c9   : > { %4264 = vmatmul.bf16.gmra.mxu2 %v9935_v43  ;;  %v4347_v54 = vadd.f32 %v4116_v49, %v3507_v47 }
 0x3ca   : > { %v4025_v1 = vpop.f32.mrf.mxu1 }
 0x3cb   : > { %4379 = vst [vmem:[#allocation2 + $0x40] sm:$0xff] %v4347_v54  ;;  %4318 = vmatmul.bf16.gmra.mxu3 %v9965_v35  ;;  %v4026_v16 = vadd.f32 %v4025_v1, %v3976_v63 }
 0x3cc   : > { %v4069_v42 = vpop.f32.mrf.mxu2 }
 0x3cd   : > { %v4070_v21 = vadd.f32 %v4069_v42, %v4021_v17  ;;  %4220 = vmatmul.bf16.gmra.mxu1 %v10761_v58  ;;  %v3981_v9 = vpop.f32.mrf.mxu0 }
 0x3ce   : > { %v4123_v20 = vpop.f32.mrf.mxu3 }
 0x3cf   : > { %v4119_v12 = vadd.f32 %v4118_v39, %v4070_v21  ;;  %v3492_v21 = vld [vmem:[#allocation2 + $0x18] sm:$0xff] }
 0x3d0   : > { %4176 = vmatmul.bf16.gmra.mxu0 %v10764_v4  ;;  %v3513_v4 = vld [vmem:[#allocation2 + $0xa8] sm:$0xff] }
 0x3d1   : > { %v4349_v31 = vadd.f32 %v4119_v12, %v3509_v25 }
 0x3d2   : > { %v4027_v6 = vpop.f32.mrf.mxu1 }
 0x3d3   : > { %4381 = vst [vmem:[#allocation2 + $0xe0] sm:$0xff] %v4349_v31  ;;  %v4028_v53 = vadd.f32 %v4027_v6, %v3978_v48 }
 0x3d4   : > { %v4071_v43 = vpop.f32.mrf.mxu2 }
 0x3d5   : > { %v4072_v59 = vadd.f32 %v4071_v43, %v4023_v11  ;;  %v3983_v10 = vpop.f32.mrf.mxu0 }
 0x3d6   : > { %v4125_v23 = vpop.f32.mrf.mxu3 }
 0x3d7   : > { %v4121_v35 = vadd.f32 %v4120_v15, %v4072_v59  ;;  %v3494_v59 = vld [vmem:[#allocation2 + $0x68] sm:$0xff] }
 0x3d9   : > { %4269 = vmatmul.bf16.gmra.mxu2 %v10023_v27  ;;  %v4351_v33 = vadd.f32 %v4121_v35, %v3511_v2 }
 0x3da   : > { %v4030_v58 = vpop.f32.mrf.mxu1 }
 0x3db   : > { %4383 = vst [vmem:[#allocation2 + $0x70] sm:$0xff] %v4351_v33  ;;  %4323 = vmatmul.bf16.gmra.mxu3 %v10030_v45  ;;  %v4031_v3 = vadd.f32 %v4030_v58, %v3981_v9 }
 0x3dc   : > { %v4074_v24 = vpop.f32.mrf.mxu2 }
 0x3dd   : > { %v4075_v36 = vadd.f32 %v4074_v24, %v4026_v16  ;;  %4225 = vmatmul.bf16.gmra.mxu1 %v10765_v41  ;;  %v4142_v0 = vpop.f32.mrf.mxu0 }
 0x3de   : > { %v4128_v29 = vpop.f32.mrf.mxu3 }
 0x3df   : > { %v4124_v57 = vadd.f32 %v4123_v20, %v4075_v36  ;;  %v3496_v36 = vld [vmem:[#allocation2 + $0x48] sm:$0xff] }
 0x3e1   : > { %v4353_v28 = vadd.f32 %v4124_v57, %v3513_v4 }
 0x3e2   : > { %v4032_v52 = vpop.f32.mrf.mxu1 }
 0x3e3   : > { %4385 = vst [vmem:[#allocation2 + $0xa8] sm:$0xff] %v4353_v28  ;;  %v4033_v60 = vadd.f32 %v4032_v52, %v3983_v10 }
 0x3e4   : > { %v4076_v61 = vpop.f32.mrf.mxu2 }
 0x3e5   : > { %v4077_v27 = vadd.f32 %v4076_v61, %v4028_v53  ;;  %v4144_v38 = vpop.f32.mrf.mxu0  ;;  %v3498_v61 = vld [vmem:[#allocation2 + $0x88] sm:$0xff] }
 0x3e6   : > { %v4130_v46 = vpop.f32.mrf.mxu3 }
 0x3e7   : > { %v4126_v55 = vadd.f32 %v4125_v23, %v4077_v27 }
 0x3e9   : > { %4274 = vmatmul.bf16.gmra.mxu2 %v10046_v13  ;;  %v4355_v45 = vadd.f32 %v4126_v55, %v3515_v18 }
 0x3ea   : > { %v4191_v51 = vpop.f32.mrf.mxu1 }
 0x3eb   : > { %4387 = vst [vmem:[#allocation2 + $0x10] sm:$0xff] %v4355_v45  ;;  %v4192_v30 = vadd.f32 %v4191_v51, %v4142_v0 }
 0x3ec   : > { %v4079_v41 = vpop.f32.mrf.mxu2 }
 0x3ed   : > { %v4080_v40 = vadd.f32 %v4079_v41, %v4031_v3  ;;  %v4147_v34 = vpop.f32.mrf.mxu0  ;;  %v3500_v41 = vld [vmem:[#allocation2 + $0xb8] sm:$0xff] }
 0x3ee   : > { %v4289_v22 = vpop.f32.mrf.mxu3 }
 0x3ef   : > { %v4129_v7 = vadd.f32 %v4128_v29, %v4080_v40 }
 0x3f1   : > { %v4357_v56 = vadd.f32 %v4129_v7, %v3517_v44 }
 0x3f2   : > { %v4193_v26 = vpop.f32.mrf.mxu1 }
 0x3f3   : > { %4389 = vst [vmem:[#allocation2 + $0xa0] sm:$0xff] %v4357_v56  ;;  %v4194_v1 = vadd.f32 %v4193_v26, %v4144_v38 }
 0x3f4   : > { %v4081_v50 = vpop.f32.mrf.mxu2 }
 0x3f5   : > { %v4082_v19 = vadd.f32 %v4081_v50, %v4033_v60  ;;  %v4149_v13 = vpop.f32.mrf.mxu0  ;;  %v3502_v50 = vld [vmem:[#allocation2 + $0xf0] sm:$0xff] }
 0x3f6   : > { %v4291_v63 = vpop.f32.mrf.mxu3 }
 0x3f7   : > { %v4131_v39 = vadd.f32 %v4130_v46, %v4082_v19 }
 0x3f9   : > { %v4359_v37 = vadd.f32 %v4131_v39, %v3519_v8 }
 0x3fa   : > { %v4196_v14 = vpop.f32.mrf.mxu1 }
 0x3fb   : > { %4391 = vst [vmem:[#allocation2 + $0x20] sm:$0xff] %v4359_v37  ;;  %v4197_v31 = vadd.f32 %v4196_v14, %v4147_v34 }
 0x3fc   : > { %v4240_v32 = vpop.f32.mrf.mxu2 }
 0x3fd   : > { %v4241_v5 = vadd.f32 %v4240_v32, %v4192_v30  ;;  %v4152_v49 = vpop.f32.mrf.mxu0  ;;  %v3504_v32 = vld [vmem:[#allocation2 + $0x78] sm:$0xff] }
 0x3fe   : > { %v4294_v47 = vpop.f32.mrf.mxu3 }
 0x3ff   : > { %v4290_v48 = vadd.f32 %v4289_v22, %v4241_v5 }
 0x401   : > { %v4330_v15 = vadd.f32 %v4290_v48, %v3490_v62 }
 0x402   : > { %v4198_v54 = vpop.f32.mrf.mxu1 }
 0x403   : > { %4362 = vst [vmem:[#allocation2] sm:$0xff] %v4330_v15  ;;  %v4199_v33 = vadd.f32 %v4198_v54, %v4149_v13 }
 0x404   : > { %v4242_v17 = vpop.f32.mrf.mxu2 }
 0x405   : > { %v4243_v42 = vadd.f32 %v4242_v17, %v4194_v1  ;;  %v4154_v6 = vpop.f32.mrf.mxu0  ;;  %v3506_v17 = vld [vmem:[#allocation2 + $0x58] sm:$0xff] }
 0x406   : > { %v4296_v25 = vpop.f32.mrf.mxu3 }
 0x407   : > { %v4292_v9 = vadd.f32 %v4291_v63, %v4243_v42 }
 0x409   : > { %v4332_v20 = vadd.f32 %v4292_v9, %v3492_v21 }
 0x40a   : > { %v4201_v12 = vpop.f32.mrf.mxu1 }
 0x40b   : > { %4364 = vst [vmem:[#allocation2 + $0x18] sm:$0xff] %v4332_v20  ;;  %v4202_v28 = vadd.f32 %v4201_v12, %v4152_v49 }
 0x40c   : > { %v4245_v11 = vpop.f32.mrf.mxu2 }
 0x40d   : > { %v4246_v43 = vadd.f32 %v4245_v11, %v4197_v31  ;;  %v4157_v24 = vpop.f32.mrf.mxu0  ;;  %v3508_v31 = vld [vmem:[#allocation2 + $0xc8] sm:$0xff] }
 0x40e   : > { %v4299_v2 = vpop.f32.mrf.mxu3 }
 0x40f   : > { %v4295_v10 = vadd.f32 %v4294_v47, %v4246_v43 }
 0x411   : > { %v4334_v23 = vadd.f32 %v4295_v10, %v3494_v59 }
 0x412   : > { %v4203_v35 = vpop.f32.mrf.mxu1 }
 0x413   : > { %4366 = vst [vmem:[#allocation2 + $0x68] sm:$0xff] %v4334_v23  ;;  %v4204_v45 = vadd.f32 %v4203_v35, %v4154_v6 }
 0x414   : > { %v4247_v58 = vpop.f32.mrf.mxu2 }
 0x415   : > { %v4248_v16 = vadd.f32 %v4247_v58, %v4199_v33  ;;  %v4159_v18 = vpop.f32.mrf.mxu0  ;;  %v3510_v33 = vld [vmem:[#allocation2 + $0x90] sm:$0xff] }
 0x416   : > { %v4301_v4 = vpop.f32.mrf.mxu3 }
 0x417   : > { %v4297_v0 = vadd.f32 %v4296_v25, %v4248_v16 }
 0x419   : > { %v4336_v29 = vadd.f32 %v4297_v0, %v3496_v36 }
 0x41a   : > { %v4206_v57 = vpop.f32.mrf.mxu1 }
 0x41b   : > { %4368 = vst [vmem:[#allocation2 + $0x48] sm:$0xff] %v4336_v29  ;;  %v4207_v56 = vadd.f32 %v4206_v57, %v4157_v24  ;;  %v3512_v57 = vld [vmem:[#allocation2 + $0xc0] sm:$0xff] }
 0x41c   : > { %v4250_v52 = vpop.f32.mrf.mxu2 }
 0x41d   : > { %v4251_v53 = vadd.f32 %v4250_v52, %v4202_v28  ;;  %v4162_v34 = vpop.f32.mrf.mxu0 }
 0x41e   : > { %v4304_v27 = vpop.f32.mrf.mxu3 }
 0x41f   : > { %v4300_v38 = vadd.f32 %v4299_v2, %v4251_v53 }
 0x421   : > { %v4338_v46 = vadd.f32 %v4300_v38, %v3498_v61 }
 0x422   : > { %v4208_v55 = vpop.f32.mrf.mxu1 }
 0x423   : > { %4370 = vst [vmem:[#allocation2 + $0x88] sm:$0xff] %v4338_v46  ;;  %v4209_v39 = vadd.f32 %v4208_v55, %v4159_v18  ;;  %v3514_v55 = vld [vmem:[#allocation2 + $0xd0] sm:$0xff] }
 0x424   : > { %v4252_v51 = vpop.f32.mrf.mxu2 }
 0x425   : > { %v4253_v3 = vadd.f32 %v4252_v51, %v4204_v45  ;;  %v4164_v13 = vpop.f32.mrf.mxu0 }
 0x426   : > { %v4306_v40 = vpop.f32.mrf.mxu3 }
 0x427   : > { %v4302_v44 = vadd.f32 %v4301_v4, %v4253_v3 }
 0x429   : > { %v4340_v22 = vadd.f32 %v4302_v44, %v3500_v41 }
 0x42a   : > { %v4211_v7 = vpop.f32.mrf.mxu1 }
 0x42b   : > { %4372 = vst [vmem:[#allocation2 + $0xb8] sm:$0xff] %v4340_v22  ;;  %v4212_v48 = vadd.f32 %v4211_v7, %v4162_v34  ;;  %v3516_v7 = vld [vmem:[#allocation2 + $0x28] sm:$0xff] }
 0x42c   : > { %v4255_v26 = vpop.f32.mrf.mxu2 }
 0x42d   : > { %v4256_v60 = vadd.f32 %v4255_v26, %v4207_v56  ;;  %v4167_v49 = vpop.f32.mrf.mxu0 }
 0x42e   : > { %v4309_v19 = vpop.f32.mrf.mxu3 }
 0x42f   : > { %v4305_v8 = vadd.f32 %v4304_v27, %v4256_v60 }
 0x431   : > { %v4342_v63 = vadd.f32 %v4305_v8, %v3502_v50 }
 0x432   : > { %v4213_v37 = vpop.f32.mrf.mxu1 }
 0x433   : > { %4374 = vst [vmem:[#allocation2 + $0xf0] sm:$0xff] %v4342_v63  ;;  %v4214_v9 = vadd.f32 %v4213_v37, %v4164_v13  ;;  %v3518_v63 = vld [vmem:[#allocation2 + $0xf8] sm:$0xff] }
 0x434   : > { %v4257_v14 = vpop.f32.mrf.mxu2 }
 0x435   : > { %v4258_v30 = vadd.f32 %v4257_v14, %v4209_v39  ;;  %v4169_v6 = vpop.f32.mrf.mxu0 }
 0x436   : > { %v4311_v62 = vpop.f32.mrf.mxu3 }
 0x437   : > { %v4307_v5 = vadd.f32 %v4306_v40, %v4258_v30 }
 0x439   : > { %v4344_v47 = vadd.f32 %v4307_v5, %v3504_v32 }
 0x43a   : > { %v4216_v1 = vpop.f32.mrf.mxu1 }
 0x43b   : > { %4376 = vst [vmem:[#allocation2 + $0x78] sm:$0xff] %v4344_v47  ;;  %v4217_v2 = vadd.f32 %v4216_v1, %v4167_v49  ;;  %v3520_v47 = vld [vmem:[#allocation2 + $0x98] sm:$0xff] }
 0x43c   : > { %v4260_v15 = vpop.f32.mrf.mxu2 }
 0x43d   : > { %v4261_v54 = vadd.f32 %v4260_v15, %v4212_v48  ;;  %v4172_v16 = vpop.f32.mrf.mxu0 }
 0x43e   : > { %v4314_v25 = vpop.f32.mrf.mxu3 }
 0x43f   : > { %v4310_v42 = vadd.f32 %v4309_v19, %v4261_v54 }
 0x441   : > { %v4346_v21 = vadd.f32 %v4310_v42, %v3506_v17 }
 0x442   : > { %v4218_v43 = vpop.f32.mrf.mxu1 }
 0x443   : > { %4378 = vst [vmem:[#allocation2 + $0x58] sm:$0xff] %v4346_v21  ;;  %v4219_v4 = vadd.f32 %v4218_v43, %v4169_v6 }
 0x444   : > { %v4262_v20 = vpop.f32.mrf.mxu2 }
 0x445   : > { %v4263_v12 = vadd.f32 %v4262_v20, %v4214_v9  ;;  %v4174_v27 = vpop.f32.mrf.mxu0 }
 0x446   : > { %v4316_v23 = vpop.f32.mrf.mxu3 }
 0x447   : > { %v4312_v11 = vadd.f32 %v4311_v62, %v4263_v12 }
 0x449   : > { %v4348_v59 = vadd.f32 %v4312_v11, %v3508_v31 }
 0x44a   : > { %v4221_v36 = vpop.f32.mrf.mxu1 }
 0x44b   : > { %4380 = vst [vmem:[#allocation2 + $0xc8] sm:$0xff] %v4348_v59  ;;  %v4222_v61 = vadd.f32 %v4221_v36, %v4172_v16 }
 0x44c   : > { %v4265_v10 = vpop.f32.mrf.mxu2 }
 0x44d   : > { %v4266_v35 = vadd.f32 %v4265_v10, %v4217_v2  ;;  %v4177_v34 = vpop.f32.mrf.mxu0 }
 0x44e   : > { %v4319_v28 = vpop.f32.mrf.mxu3 }
 0x44f   : > { %v4315_v58 = vadd.f32 %v4314_v25, %v4266_v35 }
 0x451   : > { %v4350_v24 = vadd.f32 %v4315_v58, %v3510_v33 }
 0x452   : > { %v4223_v18 = vpop.f32.mrf.mxu1 }
 0x453   : > { %4382 = vst [vmem:[#allocation2 + $0x90] sm:$0xff] %v4350_v24  ;;  %v4224_v41 = vadd.f32 %v4223_v18, %v4174_v27 }
 0x454   : > { %v4267_v0 = vpop.f32.mrf.mxu2 }
 0x455   : > { %v4268_v29 = vadd.f32 %v4267_v0, %v4219_v4  ;;  %v4179_v13 = vpop.f32.mrf.mxu0 }
 0x456   : > { %v4321_v51 = vpop.f32.mrf.mxu3 }
 0x457   : > { %v4317_v52 = vadd.f32 %v4316_v23, %v4268_v29 }
 0x459   : > { %v4352_v53 = vadd.f32 %v4317_v52, %v3512_v57 }
 0x45a   : > { %v4226_v22 = vpop.f32.mrf.mxu1 }
 0x45b   : > { %4384 = vst [vmem:[#allocation2 + $0xc0] sm:$0xff] %v4352_v53  ;;  %v4227_v50 = vadd.f32 %v4226_v22, %v4177_v34 }
 0x45c   : > { %v4270_v38 = vpop.f32.mrf.mxu2 }
 0x45d   : > { %v4271_v46 = vadd.f32 %v4270_v38, %v4222_v61 }
 0x45e   : > { %v4324_v60 = vpop.f32.mrf.mxu3 }
 0x45f   : > { %v4320_v45 = vadd.f32 %v4319_v28, %v4271_v46 }
 0x461   : > { %v4354_v3 = vadd.f32 %v4320_v45, %v3514_v55 }
 0x462   : > { %v4228_v37 = vpop.f32.mrf.mxu1 }
 0x463   : > { %4386 = vst [vmem:[#allocation2 + $0xd0] sm:$0xff] %v4354_v3  ;;  %v4229_v30 = vadd.f32 %v4228_v37, %v4179_v13 }
 0x464   : > { %v4272_v40 = vpop.f32.mrf.mxu2 }
 0x465   : > { %v4273_v44 = vadd.f32 %v4272_v40, %v4224_v41 }
 0x466   : > { %v4326_v5 = vpop.f32.mrf.mxu3 }
 0x467   : > { %v4322_v56 = vadd.f32 %v4321_v51, %v4273_v44 }
 0x469   : > { %v4356_v26 = vadd.f32 %v4322_v56, %v3516_v7 }
 0x46b   : > { %4388 = vst [vmem:[#allocation2 + $0x28] sm:$0xff] %v4356_v26 }
 0x46c   : > { %v4275_v19 = vpop.f32.mrf.mxu2 }
 0x46d   : > { %v4276_v8 = vadd.f32 %v4275_v19, %v4227_v50 }
 0x46f   : > { %v4325_v39 = vadd.f32 %v4324_v60, %v4276_v8 }
 0x471   : > { %v4358_v14 = vadd.f32 %v4325_v39, %v3518_v63 }
 0x473   : > { %4390 = vst [vmem:[#allocation2 + $0xf8] sm:$0xff] %v4358_v14 }
 0x474   : > { %v4277_v32 = vpop.f32.mrf.mxu2 }
 0x475   : > { %v4278_v62 = vadd.f32 %v4277_v32, %v4229_v30 }
 0x477   : > { %v4327_v48 = vadd.f32 %v4326_v5, %v4278_v62  ;;  %4396 = sbr.rel (%p5556_p13) target bundleno = 1181 (0x49d), region = 68 }
 0x479   : > { %v4360_v15 = vadd.f32 %v4327_v48, %v3520_v47 }
 0x47b   : > { %4392 = vst [vmem:[#allocation2 + $0x98] sm:$0xff] %v4360_v15 }
 0x47c   : > { %v4397_v49 = vld [vmem:[#allocation2 + $0xb0] sm:$0xff]  ;;  %v4398_v54 = vld [vmem:[#allocation2] sm:$0xff]  ;;  %v4399_v1 = vld [vmem:[#allocation2 + $0xd8] sm:$0xff] }
 0x47d   : > { %4429 = vst [vmem:[%s6713_s13] sm:$0xff] %v4397_v49  ;;  %v4400_v17 = vld [vmem:[#allocation2 + $0x18] sm:$0xff]  ;;  %v4401_v42 = vld [vmem:[#allocation2 + $0x50] sm:$0xff]  ;;  %v4402_v21 = vld [vmem:[#allocation2 + $0x68] sm:$0xff] }
 0x47e   : > { %4430 = vst [vmem:[%s6713_s13 + $0x8] sm:$0xff] %v4398_v54  ;;  %v4403_v25 = vld [vmem:[#allocation2 + $0x30] sm:$0xff]  ;;  %v4404_v9 = vld [vmem:[#allocation2 + $0x48] sm:$0xff]  ;;  %v4405_v20 = vld [vmem:[#allocation2 + $0x80] sm:$0xff] }
 0x47f   : > { %4431 = vst [vmem:[%s6713_s13 + $0x10] sm:$0xff] %v4399_v1  ;;  %v4406_v12 = vld [vmem:[#allocation2 + $0x88] sm:$0xff]  ;;  %v4408_v6 = vld [vmem:[#allocation2 + $0xb8] sm:$0xff]  ;;  %v4409_v11 = vld [vmem:[#allocation2 + $0x60] sm:$0xff] }
 0x480   : > { %4432 = vst [vmem:[%s6713_s13 + $0x18] sm:$0xff] %v4400_v17  ;;  %v4407_v31 = vld [vmem:[#allocation2 + $0xe8] sm:$0xff]  ;;  %v4410_v43 = vld [vmem:[#allocation2 + $0xf0] sm:$0xff]  ;;  %v4412_v2 = vld [vmem:[#allocation2 + $0x78] sm:$0xff] }
 0x481   : > { %4433 = vst [vmem:[%s6713_s13 + $0x20] sm:$0xff] %v4401_v42  ;;  %v4411_v59 = vld [vmem:[#allocation2 + $0x8] sm:$0xff]  ;;  %v4413_v10 = vld [vmem:[#allocation2 + $0x38] sm:$0xff]  ;;  %v4415_v35 = vld [vmem:[#allocation2 + $0x40] sm:$0xff] }
 0x482   : > { %4434 = vst [vmem:[%s6713_s13 + $0x28] sm:$0xff] %v4402_v21  ;;  %v4414_v23 = vld [vmem:[#allocation2 + $0x58] sm:$0xff]  ;;  %v4416_v33 = vld [vmem:[#allocation2 + $0xc8] sm:$0xff]  ;;  %v4417_v58 = vld [vmem:[#allocation2 + $0xe0] sm:$0xff] }
 0x483   : > { %4435 = vst [vmem:[%s6713_s13 + $0x30] sm:$0xff] %v4403_v25  ;;  %v4418_v16 = vld [vmem:[#allocation2 + $0x90] sm:$0xff]  ;;  %v4420_v36 = vld [vmem:[#allocation2 + $0xc0] sm:$0xff]  ;;  %v4421_v4 = vld [vmem:[#allocation2 + $0xa8] sm:$0xff] }
 0x484   : > { %4436 = vst [vmem:[%s6713_s13 + $0x38] sm:$0xff] %v4404_v9  ;;  %v4419_v24 = vld [vmem:[#allocation2 + $0x70] sm:$0xff]  ;;  %v4424_v57 = vld [vmem:[#allocation2 + $0x28] sm:$0xff]  ;;  %v4425_v28 = vld [vmem:[#allocation2 + $0xa0] sm:$0xff] }
 0x485   : > { %4437 = vst [vmem:[%s6713_s13 + $0x40] sm:$0xff] %v4405_v20  ;;  %v4422_v0 = vld [vmem:[#allocation2 + $0xd0] sm:$0xff]  ;;  %v4426_v52 = vld [vmem:[#allocation2 + $0xf8] sm:$0xff]  ;;  %v4427_v53 = vld [vmem:[#allocation2 + $0x20] sm:$0xff] }
 0x486   : > { %4438 = vst [vmem:[%s6713_s13 + $0x48] sm:$0xff] %v4406_v12  ;;  %v4423_v29 = vld [vmem:[#allocation2 + $0x10] sm:$0xff]  ;;  %v4428_v61 = vld [vmem:[#allocation2 + $0x98] sm:$0xff] }
 0x487   : > { %4439 = vst [vmem:[%s6713_s13 + $0x50] sm:$0xff] %v4407_v31 }
 0x488   : > { %4440 = vst [vmem:[%s6713_s13 + $0x58] sm:$0xff] %v4408_v6 }
 0x489   : > { %4441 = vst [vmem:[%s6713_s13 + $0x60] sm:$0xff] %v4409_v11 }
 0x48a   : > { %4442 = vst [vmem:[%s6713_s13 + $0x68] sm:$0xff] %v4410_v43 }
 0x48b   : > { %4443 = vst [vmem:[%s6713_s13 + $0x70] sm:$0xff] %v4411_v59 }
 0x48c   : > { %4444 = vst [vmem:[%s6713_s13 + $0x78] sm:$0xff] %v4412_v2 }
 0x48d   : > { %4445 = vst [vmem:[%s6713_s13 + $0x80] sm:$0xff] %v4413_v10 }
 0x48e   : > { %4446 = vst [vmem:[%s6713_s13 + $0x88] sm:$0xff] %v4414_v23 }
 0x48f   : > { %4447 = vst [vmem:[%s6713_s13 + $0x90] sm:$0xff] %v4415_v35 }
 0x490   : > { %4448 = vst [vmem:[%s6713_s13 + $0x98] sm:$0xff] %v4416_v33 }
 0x491   : > { %4449 = vst [vmem:[%s6713_s13 + $0xa0] sm:$0xff] %v4417_v58 }
 0x492   : > { %4450 = vst [vmem:[%s6713_s13 + $0xa8] sm:$0xff] %v4418_v16 }
 0x493   : > { %4451 = vst [vmem:[%s6713_s13 + $0xb0] sm:$0xff] %v4419_v24 }
 0x494   : > { %4452 = vst [vmem:[%s6713_s13 + $0xb8] sm:$0xff] %v4420_v36 }
 0x495   : > { %4453 = vst [vmem:[%s6713_s13 + $0xc0] sm:$0xff] %v4421_v4 }
 0x496   : > { %4454 = vst [vmem:[%s6713_s13 + $0xc8] sm:$0xff] %v4422_v0 }
 0x497   : > { %4455 = vst [vmem:[%s6713_s13 + $0xd0] sm:$0xff] %v4423_v29 }
 0x498   : > { %4456 = vst [vmem:[%s6713_s13 + $0xd8] sm:$0xff] %v4424_v57 }
 0x499   : > { %4457 = vst [vmem:[%s6713_s13 + $0xe0] sm:$0xff] %v4425_v28 }
 0x49a   : > { %4458 = vst [vmem:[%s6713_s13 + $0xe8] sm:$0xff] %v4426_v52 }
 0x49b   : > { %4459 = vst [vmem:[%s6713_s13 + $0xf0] sm:$0xff] %v4427_v53 }
 0x49c   : > { %4460 = vst [vmem:[%s6713_s13 + $0xf8] sm:$0xff] %v4428_v61 }
 0x49d PF: > { %s5779_s2 = sshll.u32 %s6440_s25, 8  ;;  %s10782_s0 = sld [smem:[#allocation102_spill]] }
 0x49e   : > { %s4475_s16 = sshll.u32 %s6713_s13, 4  ;;  %s4462_s5 = scalar_lea.sflag [#allocation6], %s312_s17  ;;  %s4476_s16 = int_to_ptr.vmem [resolvable:$true] %s4475_s16 }
 0x4a3   : > { %s4474_s7 = scalar_lea.hbm %s10782_s0, %s5779_s2  ;;  %s6342_s25 = scalar_lea.hbm %s10782_s0, 512 }
 0x4a4   : > { %s4477_s8 = sshll.u32 %s4474_s7, 4  ;;  %s4478_s8 = int_to_ptr.hbm [resolvable:$true] %s4477_s8 }
 0x4a5   : > { %s6336_s14 = sshra.s32 %s4478_s8, 4  ;;  %s6337_s14 = int_to_ptr.hbm [resolvable:$true] %s6336_s14 }
 0x4a6   : > { %s6338_s9 = scalar_lea.hbm %s6337_s14, 256  ;;  %p6343_p4 = scmp.lt.s32.totalorder %s6337_s14, %s10782_s0 }
 0x4a7   : > { %p6339_p0 = scmp.ne.s32.totalorder %s6337_s14, %s6338_s9  ;;  %p6344_p5 = scmp.lt.s32.totalorder %s6342_s25, %s6338_s9 }
 0x4a9   : > { %p6340_p2 = pnand %p6339_p0, %p6655_p6  ;;  %p6345_p8 = por %p6344_p5, %p6343_p4 }
 0x4ab   : > { %p6341_p3 = pneg %p6340_p2 }
 0x4ad   : > { %p6346_p9 = pnand %p6345_p8, %p6341_p3 }
 0x4af   : > { %6349 = shalt.err (!%p6346_p9)
}
 0x4b0   : > { %s6461_s17 = smov 256   ;;  %s6462_s23 = smov 16  }
 0x4b1   : > { %5792 = dma.vmem_to_hbm [thread:$0]  (%p6655_p6), %s4476_s16, 4096, %s4478_s8, %s4462_s5, %s6461_s17, %s6461_s17, %s6462_s23  }
 0x4b2 PF: > { %p5818_p10 = scmp.ge.s32.totalorder %s6452_s28, 2  ;;  %s4492_s27 = sand.u32 1, %s6424_s21  }
 0x4b3   : > { %s4493_s15 = scalar_lea.sflag [#allocation6], %s4492_s27 }
 0x4b4   : > { %p5812_p1 = pnand %p5818_p10, %p6659_p7 }
 0x4b6   : > { %p5813_p12 = pneg %p5812_p1 }
 0x4b8   : > { %6407 = dma.done.wait (%p5813_p12), %s4493_s15, 4096  }
 0x4b9   : > { %6409 = vsyncadd (%p5813_p12), %s4493_s15, 4294963200  ;;  %s22_s28 = sadd.s32 1, %s6452_s28   ;;  %s10783_s11 = sld [smem:[#allocation22_spill]] }
 0x4ba   : > { %p19_p11 = scmp.ge.s32.totalorder %s22_s28, 6   ;;  %s10784_s6 = sld [smem:[#allocation17_spill]] }
 0x4bb   : > { %s10785_s23 = sld [smem:[#allocation21_spill]]  ;;  %s10789_s18 = smov %s6416_s19 }
 0x4bc   : > { %s10786_s25 = sld [smem:[#allocation18_spill]]  ;;  %s10790_s19 = smov %s6420_s20 }
 0x4bd   : > { %s10787_s29 = sld [smem:[#allocation19_spill]]  ;;  %s10792_s21 = smov %s6428_s22 }
 0x4be   : > { %s10788_s27 = sld [smem:[#allocation20_spill]]  ;;  %s10794_s24 = smov %s6444_s26 }
 0x4bf   : > { %s10791_s20 = smov %s10783_s11  ;;  %21 = sbr.rel (!%p19_p11) target bundleno = 16 (0x10), region = 130 }
 0x4c0   : > { %s10793_s22 = smov %s10784_s6 }
 0x4c3   : > { %s10795_s26 = smov %s10787_s29 }
 0x4c4   :  { %4499 = vsyncpa [#allocation5], 1 }
 0x4c5   :  { %4501 = vsyncpa [#allocation5 + $0x1], 1 }
 0x4c6   :  { %4502 = vsyncpa [#allocation8], 1 }
 0x4c7   :  { %4503 = vsyncpa [#allocation6], 1 }
 0x4c8   :  { %4505 = vsyncpa [#allocation6 + $0x1], 1 }

</bundles_post_ra>
